<compile_context>
chip_gen: v7x
topology: tpu7x:2x2x1
jax: 0.10.0
libtpu: 0.0.40
codegen_flags: <defaults>
</compile_context>

<pallas_src>
import functools

import jax
import jax.numpy as jnp
from jax.experimental import pallas as pl
from jax.experimental.pallas import tpu as pltpu

EPS = 1e-5                  # PyTorch BatchNorm2d default eps
MXU_DTYPE = jnp.bfloat16    # matmul operand dtype (accumulation stays f32)


def _round_up(x, m):
    return (x + m - 1) // m * m


def _mask(tap, conds):
    if not conds:
        return tap
    valid = conds[0]
    for c in conds[1:]:
        valid = jnp.logical_and(valid, c)
    return jnp.where(valid, tap, jnp.zeros((), tap.dtype))


# ------------------------------ kernel helpers ------------------------------ #

def _conv3x3_taps(src_ref, w_ref, row, col, *, H, W, pad):
    """3x3 / stride-1 / zero-pad-1 convolution.

    `src_ref` holds the activation as a flat row-major (pad + H*W + pad, C)
    slab (the `pad` slack rows on either side are don't-care: every
    out-of-image tap is masked below).  Each of the 9 taps is a contiguous,
    row-shifted slice of the flat slab, so the conv is 9 MXU matmuls
    accumulated in f32 -- no materialised im2col and no in-kernel reshapes.
    """
    M = H * W
    acc = None
    for k in range(9):
        dy, dx = k // 3 - 1, k % 3 - 1
        off = pad + dy * W + dx
        tap = src_ref[off:off + M, :]                          # (M, C)
        conds = []
        if dy == -1:
            conds.append(row >= W)        # first image row has no row above
        if dy == 1:
            conds.append(row < M - W)     # last image row has no row below
        if dx == -1:
            conds.append(col >= 1)        # first column: nothing to the left
        if dx == 1:
            conds.append(col <= W - 2)    # last column: nothing to the right
        tap = _mask(tap, conds)
        term = jnp.dot(tap, w_ref[k], preferred_element_type=jnp.float32)
        acc = term if acc is None else acc + term
    return acc                                                  # (M, Cout) f32


def _wide_basic_s1_kernel(x_ref, col_ref, a1_ref, c1_ref, w1_ref, b1_ref,
                          w2_ref, b2_ref, *rest, H, W, P1, P2, has_sc_conv):
    """Whole WideBasic block for one image, stride == 1.

    residual: BN1+ReLU (fused) -> conv1 3x3 (BN2 pre-folded) -> ReLU
              -> Dropout(eval = identity) -> conv2 3x3
    shortcut: 1x1 conv (has_sc_conv) or identity add.
    """
    if has_sc_conv:
        wsc_ref, o_ref, s1_ref, s2_ref = rest
    else:
        o_ref, s1_ref, s2_ref = rest
    M = H * W

    # BN1 + ReLU on the raw input, staged into the middle of the slack-padded
    # VMEM buffer.  Slack rows are never written; they are masked per tap.
    x = x_ref[0]                                                # (M, Cin) f32
    s1_ref[P1:P1 + M, :] = jnp.maximum(
        x * a1_ref[...] + c1_ref[...], 0.0).astype(s1_ref.dtype)

    row = jax.lax.broadcasted_iota(jnp.int32, (M, 1), 0)
    col = col_ref[...]

    # conv1 (BN2 folded into w1/b1) + ReLU, staged in VMEM -- never hits HBM.
    acc1 = _conv3x3_taps(s1_ref, w1_ref, row, col, H=H, W=W, pad=P1)
    s2_ref[P2:P2 + M, :] = jnp.maximum(acc1 + b1_ref[...], 0.0).astype(s2_ref.dtype)

    # conv2 straight from the VMEM staging buffer.
    acc2 = _conv3x3_taps(s2_ref, w2_ref, row, col, H=H, W=W, pad=P2)

    if has_sc_conv:
        sc = jnp.dot(x.astype(wsc_ref.dtype), wsc_ref[...],
                     preferred_element_type=jnp.float32)
    else:
        sc = x                               # identity shortcut: free VPU add
    o_ref[0] = (acc2 + sc + b2_ref[...]).astype(o_ref.dtype)


def _wide_basic_s2_kernel(xp_ref, col_ref, a1_ref, c1_ref, w1_ref, b1_ref,
                          w2_ref, b2_ref, wsc_ref, o_ref, s1_ref, s2_ref,
                          *, Ho, Wo, P1, P2):
    """Whole WideBasic block for one image, stride == 2 (fully fused).

    conv1 is a stride-2 conv: tap (ky,kx) reads input (2*oy+ky-1, 2*ox+kx-1),
    i.e. polyphase slab (py,px) = ((ky+1)%2, (kx+1)%2) shifted by
    (ry,rx) in {-1,0}^2.  Each tap is therefore a contiguous row-shift of one
    flat (Ho*Wo, Cin) slab -> 9 MXU matmuls, like the stride-1 case.
    The 1x1/stride-2 shortcut conv reads exactly phase (0,0) of the raw input.
    """
    Mo = Ho * Wo
    SEG = Mo + 2 * P1

    # BN1 + ReLU of every raw input phase, staged in VMEM (bf16).
    for ph in range(4):
        base = ph * SEG
        s1_ref[base + P1:base + P1 + Mo, :] = jnp.maximum(
            xp_ref[0, ph] * a1_ref[...] + c1_ref[...], 0.0).astype(s1_ref.dtype)

    row = jax.lax.broadcasted_iota(jnp.int32, (Mo, 1), 0)
    col = col_ref[...]

    # conv1 (stride 2, pad 1, BN2 folded) via polyphase taps.
    acc1 = None
    for ky in range(3):
        py, ry = (1, -1) if ky == 0 else ((0, 0) if ky == 1 else (1, 0))
        for kx in range(3):
            px, rx = (1, -1) if kx == 0 else ((0, 0) if kx == 1 else (1, 0))
            off = (py * 2 + px) * SEG + P1 + ry * Wo + rx
            tap = s1_ref[off:off + Mo, :]
            conds = []
            if ry == -1:
                conds.append(row >= Wo)     # top padding row of the conv
            if rx == -1:
                conds.append(col >= 1)      # left padding column
            tap = _mask(tap, conds)
            term = jnp.dot(tap, w1_ref[ky * 3 + kx],
                           preferred_element_type=jnp.float32)
            acc1 = term if acc1 is None else acc1 + term

    s2_ref[P2:P2 + Mo, :] = jnp.maximum(acc1 + b1_ref[...], 0.0).astype(s2_ref.dtype)

    # conv2 (stride 1) straight from the VMEM staging buffer.
    acc2 = _conv3x3_taps(s2_ref, w2_ref, row, col, H=Ho, W=Wo, pad=P2)

    # 1x1 / stride-2 shortcut conv == matmul on raw phase (0,0).
    sc = jnp.dot(xp_ref[0, 0].astype(wsc_ref.dtype), wsc_ref[...],
                 preferred_element_type=jnp.float32)
    o_ref[0] = (acc2 + sc + b2_ref[...]).astype(o_ref.dtype)


# -------------------------------- JAX glue --------------------------------- #

def wide_basic_forward(x_nhwc, params, *, stride):
    """Inference forward of the WideBasic block (x is NHWC, f32)."""
    f32 = jnp.float32
    N, H, W, Cin = x_nhwc.shape
    Cout = params["conv1_w"].shape[0]
    # TODO(synk): WideResNet only uses stride 1 or 2; other strides unimplemented.
    assert stride in (1, 2)
    Ho, Wo = (H - 1) // stride + 1, (W - 1) // stride + 1
    M, Mo = H * W, Ho * Wo
    assert M % 8 == 0 and Mo % 8 == 0, "flat-tap conv assumes 8-aligned H*W"

    # ---- fold the BatchNorms (inference) into per-channel scale/shift ----
    a1 = params["bn1_gamma"] * jax.lax.rsqrt(params["bn1_var"] + EPS)
    c1 = params["bn1_beta"] - params["bn1_mean"] * a1
    a2 = params["bn2_gamma"] * jax.lax.rsqrt(params["bn2_var"] + EPS)
    c2 = params["bn2_beta"] - params["bn2_mean"] * a2

    # ---- fold BN2 into conv1 at trace time ----
    w1 = params["conv1_w"].transpose(2, 3, 1, 0) * a2          # (3,3,Cin,Cout)
    b1 = params["conv1_b"] * a2 + c2
    w2 = params["conv2_w"].transpose(2, 3, 1, 0)               # (3,3,Cout,Cout)
    b2 = params["conv2_b"]

    has_sc = "short_w" in params
    if has_sc:
        wsc = params["short_w"].transpose(2, 3, 1, 0).reshape(Cin, Cout)
        b2 = b2 + params["short_b"]          # shortcut bias folded into final add
    else:
        assert Cin == Cout and stride == 1

    w1_k = w1.reshape(9, Cin, Cout).astype(MXU_DTYPE)
    w2_k = w2.reshape(9, Cout, Cout).astype(MXU_DTYPE)
    a1 = a1.reshape(1, Cin).astype(f32)
    c1 = c1.reshape(1, Cin).astype(f32)
    b1 = b1.reshape(1, Cout).astype(f32)
    b2 = b2.reshape(1, Cout).astype(f32)
    col = (jnp.arange(Mo, dtype=jnp.int32) % Wo).reshape(Mo, 1)

    # Slack rows (multiple of 8 so staging stores stay sublane-aligned).
    P2 = _round_up(Wo + 1, 8)
    # NOTE: for production WRN widths that are not 128-multiples (160/320) one
    # would also pad Cout to a lane-dense multiple of 128; for much larger
    # images tile rows of the image instead of taking a whole image per step.
    cparams = pltpu.CompilerParams(dimension_semantics=("parallel",),
                                   vmem_limit_bytes=64 * 1024 * 1024)

    common_specs = [pl.BlockSpec((Mo, 1), lambda n: (0, 0)),
                    pl.BlockSpec((1, Cin), lambda n: (0, 0)),
                    pl.BlockSpec((1, Cin), lambda n: (0, 0)),
                    pl.BlockSpec((9, Cin, Cout), lambda n: (0, 0, 0)),
                    pl.BlockSpec((1, Cout), lambda n: (0, 0)),
                    pl.BlockSpec((9, Cout, Cout), lambda n: (0, 0, 0)),
                    pl.BlockSpec((1, Cout), lambda n: (0, 0))]

    if stride == 1:
        P1 = _round_up(W + 1, 8)
        inputs = [x_nhwc.reshape(N, M, Cin).astype(f32), col,
                  a1, c1, w1_k, b1, w2_k, b2]
        in_specs = [pl.BlockSpec((1, M, Cin), lambda n: (n, 0, 0))] + common_specs
        if has_sc:
            inputs.append(wsc.astype(MXU_DTYPE))
            in_specs.append(pl.BlockSpec((Cin, Cout), lambda n: (0, 0)))
        kernel = functools.partial(_wide_basic_s1_kernel, H=H, W=W,
                                   P1=P1, P2=P2, has_sc_conv=has_sc)
        scratch = [pltpu.VMEM((M + 2 * P1, Cin), MXU_DTYPE),
                   pltpu.VMEM((M + 2 * P2, Cout), MXU_DTYPE)]
    else:
        assert H % 2 == 0 and W % 2 == 0, "polyphase path assumes even H, W"
        P1 = _round_up(Wo + 1, 8)
        # stride-2 polyphase relayout: xp[n, 2*py+px, r*Wo+c] = x[n, 2r+py, 2c+px]
        xp = x_nhwc.reshape(N, Ho, 2, Wo, 2, Cin).transpose(0, 2, 4, 1, 3, 5)
        xp = xp.reshape(N, 4, Mo, Cin).astype(f32)
        inputs = [xp, col, a1, c1, w1_k, b1, w2_k, b2, wsc.astype(MXU_DTYPE)]
        in_specs = ([pl.BlockSpec((1, 4, Mo, Cin), lambda n: (n, 0, 0, 0))]
                    + common_specs
                    + [pl.BlockSpec((Cin, Cout), lambda n: (0, 0))])
        kernel = functools.partial(_wide_basic_s2_kernel, Ho=Ho, Wo=Wo,
                                   P1=P1, P2=P2)
        scratch = [pltpu.VMEM((4 * (Mo + 2 * P1), Cin), MXU_DTYPE),
                   pltpu.VMEM((Mo + 2 * P2, Cout), MXU_DTYPE)]

    out = pl.pallas_call(
        kernel,
        out_shape=jax.ShapeDtypeStruct((N, Mo, Cout), f32),
        grid=(N,),
        in_specs=in_specs,
        out_specs=pl.BlockSpec((1, Mo, Cout), lambda n: (n, 0, 0)),
        scratch_shapes=scratch,
        compiler_params=cparams,
    )(*inputs)
    return out.reshape(N, Ho, Wo, Cout)


# -------------------------- reference & parameters -------------------------- #

def reference_forward(x_nhwc, params, *, stride):
    def bn(x, g, b, m, v):
        return (x - m) * (g * jax.lax.rsqrt(v + EPS)) + b

    def conv(x, w_oihw, b, s, pad):
        w = w_oihw.transpose(2, 3, 1, 0)  # -> HWIO
        y = jax.lax.conv_general_dilated(
            x, w, window_strides=(s, s), padding=[(pad, pad), (pad, pad)],
            dimension_numbers=("NHWC", "HWIO", "NHWC"))
        return y + b

    h = jnp.maximum(bn(x_nhwc, params["bn1_gamma"], params["bn1_beta"],
                       params["bn1_mean"], params["bn1_var"]), 0.0)
    h = conv(h, params["conv1_w"], params["conv1_b"], stride, 1)
    h = jnp.maximum(bn(h, params["bn2_gamma"], params["bn2_beta"],
                       params["bn2_mean"], params["bn2_var"]), 0.0)
    # TODO(synk): Dropout(p=0.5) is identity in eval mode; training-mode
    # stochastic masking (pltpu.prng_random_bits) intentionally not implemented.
    h = conv(h, params["conv2_w"], params["conv2_b"], 1, 1)
    if "short_w" in params:
        sc = conv(x_nhwc, params["short_w"], params["short_b"], stride, 0)
    else:
        sc = x_nhwc
    return h + sc


def init_params(key, cin, cout, *, shortcut):
    ks = jax.random.split(key, 16)
    r = lambda k, shape, s=0.1: s * jax.random.normal(k, shape, jnp.float32)
    p = {
        "bn1_gamma": 1.0 + r(ks[0], (cin,)),
        "bn1_beta": r(ks[1], (cin,)),
        "bn1_mean": r(ks[2], (cin,)),
        "bn1_var": jnp.abs(r(ks[3], (cin,), 0.5)) + 0.5,
        "conv1_w": r(ks[4], (cout, cin, 3, 3), 0.2),
        "conv1_b": r(ks[5], (cout,)),
        "bn2_gamma": 1.0 + r(ks[6], (cout,)),
        "bn2_beta": r(ks[7], (cout,)),
        "bn2_mean": r(ks[8], (cout,)),
        "bn2_var": jnp.abs(r(ks[9], (cout,), 0.5)) + 0.5,
        "conv2_w": r(ks[10], (cout, cout, 3, 3), 0.2),
        "conv2_b": r(ks[11], (cout,)),
    }
    if shortcut:
        p["short_w"] = r(ks[12], (cout, cin, 1, 1), 0.2)
        p["short_b"] = r(ks[13], (cout,))
    return p


if __name__ == "__main__":
    N, H, W = 2, 16, 16
    # (Cin, Cout, stride, shortcut-conv)  -- shortcut conv iff in!=out or stride!=1
    configs = [
        (4, 8, 2, True),    # downsampling block: strided conv1 + 1x1 conv shortcut
        (8, 8, 1, False),   # identity-shortcut block
        (4, 8, 1, True),    # channel-expanding block at stride 1
    ]

    key = jax.random.PRNGKey(0)
    for idx, (cin, cout, stride, sc) in enumerate(configs):
        kx, kp, key = jax.random.split(key, 3)
        x_nchw = jax.random.normal(kx, (N, cin, H, W), jnp.float32)  # PyTorch NCHW
        x_nhwc = jnp.transpose(x_nchw, (0, 2, 3, 1))                 # kernel layout
        params = init_params(kp, cin, cout, shortcut=sc)

        fwd = jax.jit(functools.partial(wide_basic_forward, stride=stride))
        out = jax.block_until_ready(fwd(x_nhwc, params))

        ref = reference_forward(x_nhwc, params, stride=stride)
        Ho = (H - 1) // stride + 1
        assert out.shape == (N, Ho, Ho, cout), out.shape
        err = float(jnp.max(jnp.abs(out - ref)))
        scale = float(jnp.max(jnp.abs(ref))) + 1e-6
        # bf16 MXU operands vs f32 reference -> check relative-to-scale error.
        assert err / scale < 2e-2, f"config {idx}: rel err {err / scale:.3e}"
    print("KERNEL_OK")
</pallas_src>

<mosaic_0001>
module attributes {stable_mosaic.version = 11 : i64} {
  func.func @_wide_basic_s2_kernel(%arg0: i32, %arg1: memref<1x4x64x4xf32, #tpu.memory_space<vmem>>, %arg2: memref<64x1xi32, #tpu.memory_space<vmem>>, %arg3: memref<1x4xf32, #tpu.memory_space<vmem>>, %arg4: memref<1x4xf32, #tpu.memory_space<vmem>>, %arg5: memref<9x4x8xbf16, #tpu.memory_space<vmem>>, %arg6: memref<1x8xf32, #tpu.memory_space<vmem>>, %arg7: memref<9x8x8xbf16, #tpu.memory_space<vmem>>, %arg8: memref<1x8xf32, #tpu.memory_space<vmem>>, %arg9: memref<4x8xbf16, #tpu.memory_space<vmem>>, %arg10: memref<1x64x8xf32, #tpu.memory_space<vmem>>, %arg11: memref<384x4xbf16, #tpu.memory_space<vmem>>, %arg12: memref<96x8xbf16, #tpu.memory_space<vmem>>) attributes {dimension_semantics = [#tpu.dimension_semantics<parallel>], iteration_bounds = array<i64: 2>, scalar_prefetch = 0 : i64, scratch_operands = 2 : i64, tpu.core_type = #tpu.core_type<tc>, window_params = [{transform_indices = @transform_0, window_bounds = array<i64: 1, 4, 64, 4>}, {pipeline_mode = #tpu.pipeline_mode<synchronous>, transform_indices = @transform_1, window_bounds = array<i64: 64, 1>}, {pipeline_mode = #tpu.pipeline_mode<synchronous>, transform_indices = @transform_2, window_bounds = array<i64: 1, 4>}, {pipeline_mode = #tpu.pipeline_mode<synchronous>, transform_indices = @transform_3, window_bounds = array<i64: 1, 4>}, {pipeline_mode = #tpu.pipeline_mode<synchronous>, transform_indices = @transform_4, window_bounds = array<i64: 9, 4, 8>}, {pipeline_mode = #tpu.pipeline_mode<synchronous>, transform_indices = @transform_5, window_bounds = array<i64: 1, 8>}, {pipeline_mode = #tpu.pipeline_mode<synchronous>, transform_indices = @transform_6, window_bounds = array<i64: 9, 8, 8>}, {pipeline_mode = #tpu.pipeline_mode<synchronous>, transform_indices = @transform_7, window_bounds = array<i64: 1, 8>}, {pipeline_mode = #tpu.pipeline_mode<synchronous>, transform_indices = @transform_8, window_bounds = array<i64: 4, 8>}, {transform_indices = @transform_9, window_bounds = array<i64: 1, 64, 8>}]} {
    %c0 = arith.constant 0 : index
    %c0_0 = arith.constant 0 : index
    %c0_1 = arith.constant 0 : index
    %c0_2 = arith.constant 0 : index
    %0 = vector.load %arg1[%c0, %c0_0, %c0_1, %c0_2] : memref<1x4x64x4xf32, #tpu.memory_space<vmem>>, vector<1x1x64x4xf32>
    %1 = vector.shape_cast %0 : vector<1x1x64x4xf32> to vector<64x4xf32>
    %c0_3 = arith.constant 0 : index
    %c0_4 = arith.constant 0 : index
    %2 = vector.load %arg3[%c0_3, %c0_4] : memref<1x4xf32, #tpu.memory_space<vmem>>, vector<1x4xf32>
    %3 = vector.broadcast %2 : vector<1x4xf32> to vector<64x4xf32>
    %4 = arith.mulf %1, %3 : vector<64x4xf32>
    %c0_5 = arith.constant 0 : index
    %c0_6 = arith.constant 0 : index
    %5 = vector.load %arg4[%c0_5, %c0_6] : memref<1x4xf32, #tpu.memory_space<vmem>>, vector<1x4xf32>
    %6 = vector.broadcast %5 : vector<1x4xf32> to vector<64x4xf32>
    %7 = arith.addf %4, %6 : vector<64x4xf32>
    %cst = arith.constant 0.000000e+00 : f32
    %8 = vector.broadcast %cst : f32 to vector<64x4xf32>
    %9 = arith.maximumf %7, %8 : vector<64x4xf32>
    %10 = arith.truncf %9 : vector<64x4xf32> to vector<64x4xbf16>
    %c16 = arith.constant 16 : index
    %c0_7 = arith.constant 0 : index
    %11 = vector.load %arg11[%c16, %c0_7] : memref<384x4xbf16, #tpu.memory_space<vmem>>, vector<64x4xbf16>
    tpu.vector_store %arg11[%c16, %c0_7], %10 {strides = array<i32>} : memref<384x4xbf16, #tpu.memory_space<vmem>>, vector<64x4xbf16>,
    %c0_8 = arith.constant 0 : index
    %c1 = arith.constant 1 : index
    %c0_9 = arith.constant 0 : index
    %c0_10 = arith.constant 0 : index
    %12 = vector.load %arg1[%c0_8, %c1, %c0_9, %c0_10] : memref<1x4x64x4xf32, #tpu.memory_space<vmem>>, vector<1x1x64x4xf32>
    %13 = vector.shape_cast %12 : vector<1x1x64x4xf32> to vector<64x4xf32>
    %c0_11 = arith.constant 0 : index
    %c0_12 = arith.constant 0 : index
    %14 = vector.load %arg3[%c0_11, %c0_12] : memref<1x4xf32, #tpu.memory_space<vmem>>, vector<1x4xf32>
    %15 = vector.broadcast %14 : vector<1x4xf32> to vector<64x4xf32>
    %16 = arith.mulf %13, %15 : vector<64x4xf32>
    %c0_13 = arith.constant 0 : index
    %c0_14 = arith.constant 0 : index
    %17 = vector.load %arg4[%c0_13, %c0_14] : memref<1x4xf32, #tpu.memory_space<vmem>>, vector<1x4xf32>
    %18 = vector.broadcast %17 : vector<1x4xf32> to vector<64x4xf32>
    %19 = arith.addf %16, %18 : vector<64x4xf32>
    %cst_15 = arith.constant 0.000000e+00 : f32
    %20 = vector.broadcast %cst_15 : f32 to vector<64x4xf32>
    %21 = arith.maximumf %19, %20 : vector<64x4xf32>
    %22 = arith.truncf %21 : vector<64x4xf32> to vector<64x4xbf16>
    %c112 = arith.constant 112 : index
    %c0_16 = arith.constant 0 : index
    %23 = vector.load %arg11[%c112, %c0_16] : memref<384x4xbf16, #tpu.memory_space<vmem>>, vector<64x4xbf16>
    tpu.vector_store %arg11[%c112, %c0_16], %22 {strides = array<i32>} : memref<384x4xbf16, #tpu.memory_space<vmem>>, vector<64x4xbf16>,
    %c0_17 = arith.constant 0 : index
    %c2 = arith.constant 2 : index
    %c0_18 = arith.constant 0 : index
    %c0_19 = arith.constant 0 : index
    %24 = vector.load %arg1[%c0_17, %c2, %c0_18, %c0_19] : memref<1x4x64x4xf32, #tpu.memory_space<vmem>>, vector<1x1x64x4xf32>
    %25 = vector.shape_cast %24 : vector<1x1x64x4xf32> to vector<64x4xf32>
    %c0_20 = arith.constant 0 : index
    %c0_21 = arith.constant 0 : index
    %26 = vector.load %arg3[%c0_20, %c0_21] : memref<1x4xf32, #tpu.memory_space<vmem>>, vector<1x4xf32>
    %27 = vector.broadcast %26 : vector<1x4xf32> to vector<64x4xf32>
    %28 = arith.mulf %25, %27 : vector<64x4xf32>
    %c0_22 = arith.constant 0 : index
    %c0_23 = arith.constant 0 : index
    %29 = vector.load %arg4[%c0_22, %c0_23] : memref<1x4xf32, #tpu.memory_space<vmem>>, vector<1x4xf32>
    %30 = vector.broadcast %29 : vector<1x4xf32> to vector<64x4xf32>
    %31 = arith.addf %28, %30 : vector<64x4xf32>
    %cst_24 = arith.constant 0.000000e+00 : f32
    %32 = vector.broadcast %cst_24 : f32 to vector<64x4xf32>
    %33 = arith.maximumf %31, %32 : vector<64x4xf32>
    %34 = arith.truncf %33 : vector<64x4xf32> to vector<64x4xbf16>
    %c208 = arith.constant 208 : index
    %c0_25 = arith.constant 0 : index
    %35 = vector.load %arg11[%c208, %c0_25] : memref<384x4xbf16, #tpu.memory_space<vmem>>, vector<64x4xbf16>
    tpu.vector_store %arg11[%c208, %c0_25], %34 {strides = array<i32>} : memref<384x4xbf16, #tpu.memory_space<vmem>>, vector<64x4xbf16>,
    %c0_26 = arith.constant 0 : index
    %c3 = arith.constant 3 : index
    %c0_27 = arith.constant 0 : index
    %c0_28 = arith.constant 0 : index
    %36 = vector.load %arg1[%c0_26, %c3, %c0_27, %c0_28] : memref<1x4x64x4xf32, #tpu.memory_space<vmem>>, vector<1x1x64x4xf32>
    %37 = vector.shape_cast %36 : vector<1x1x64x4xf32> to vector<64x4xf32>
    %c0_29 = arith.constant 0 : index
    %c0_30 = arith.constant 0 : index
    %38 = vector.load %arg3[%c0_29, %c0_30] : memref<1x4xf32, #tpu.memory_space<vmem>>, vector<1x4xf32>
    %39 = vector.broadcast %38 : vector<1x4xf32> to vector<64x4xf32>
    %40 = arith.mulf %37, %39 : vector<64x4xf32>
    %c0_31 = arith.constant 0 : index
    %c0_32 = arith.constant 0 : index
    %41 = vector.load %arg4[%c0_31, %c0_32] : memref<1x4xf32, #tpu.memory_space<vmem>>, vector<1x4xf32>
    %42 = vector.broadcast %41 : vector<1x4xf32> to vector<64x4xf32>
    %43 = arith.addf %40, %42 : vector<64x4xf32>
    %cst_33 = arith.constant 0.000000e+00 : f32
    %44 = vector.broadcast %cst_33 : f32 to vector<64x4xf32>
    %45 = arith.maximumf %43, %44 : vector<64x4xf32>
    %46 = arith.truncf %45 : vector<64x4xf32> to vector<64x4xbf16>
    %c304 = arith.constant 304 : index
    %c0_34 = arith.constant 0 : index
    %47 = vector.load %arg11[%c304, %c0_34] : memref<384x4xbf16, #tpu.memory_space<vmem>>, vector<64x4xbf16>
    tpu.vector_store %arg11[%c304, %c0_34], %46 {strides = array<i32>} : memref<384x4xbf16, #tpu.memory_space<vmem>>, vector<64x4xbf16>,
    %48 = tpu.iota {dimensions = array<i32: 0>} : vector<64x1xi32>
    %c0_35 = arith.constant 0 : index
    %c0_36 = arith.constant 0 : index
    %49 = vector.load %arg2[%c0_35, %c0_36] : memref<64x1xi32, #tpu.memory_space<vmem>>, vector<64x1xi32>
    %c295 = arith.constant 295 : index
    %c0_37 = arith.constant 0 : index
    %50 = vector.load %arg11[%c295, %c0_37] : memref<384x4xbf16, #tpu.memory_space<vmem>>, vector<64x4xbf16>
    %c8_i32 = arith.constant 8 : i32
    %51 = vector.broadcast %c8_i32 : i32 to vector<64x1xi32>
    %52 = arith.cmpi sge, %48, %51 : vector<64x1xi32>
    %c1_i32 = arith.constant 1 : i32
    %53 = vector.broadcast %c1_i32 : i32 to vector<64x1xi32>
    %54 = arith.cmpi sge, %49, %53 : vector<64x1xi32>
    %55 = arith.andi %52, %54 : vector<64x1xi1>
    %cst_38 = arith.constant 0.000000e+00 : bf16
    %56 = vector.shape_cast %55 : vector<64x1xi1> to vector<64x1xi1>
    %57 = vector.broadcast %56 : vector<64x1xi1> to vector<64x4xi1>
    %58 = vector.broadcast %cst_38 : bf16 to vector<64x4xbf16>
    %59 = arith.select %57, %50, %58 : vector<64x4xi1>, vector<64x4xbf16>
    %c0_39 = arith.constant 0 : index
    %c0_40 = arith.constant 0 : index
    %c0_41 = arith.constant 0 : index
    %60 = vector.load %arg5[%c0_39, %c0_40, %c0_41] : memref<9x4x8xbf16, #tpu.memory_space<vmem>>, vector<1x4x8xbf16>
    %61 = vector.shape_cast %60 : vector<1x4x8xbf16> to vector<4x8xbf16>
    %cst_42 = arith.constant dense<0.000000e+00> : vector<64x8xf32>
    %62 = tpu.matmul %59, %61, %cst_42 {dimension_numbers = #tpu.dot_dimension_numbers<[1], [0], [0], [1], [0, 0, 1, 1], [], []>} : vector<64x4xbf16>, vector<4x8xbf16>, vector<64x8xf32> -> vector<64x8xf32>
    %c200 = arith.constant 200 : index
    %c0_43 = arith.constant 0 : index
    %63 = vector.load %arg11[%c200, %c0_43] : memref<384x4xbf16, #tpu.memory_space<vmem>>, vector<64x4xbf16>
    %c8_i32_44 = arith.constant 8 : i32
    %64 = vector.broadcast %c8_i32_44 : i32 to vector<64x1xi32>
    %65 = arith.cmpi sge, %48, %64 : vector<64x1xi32>
    %cst_45 = arith.constant 0.000000e+00 : bf16
    %66 = vector.shape_cast %65 : vector<64x1xi1> to vector<64x1xi1>
    %67 = vector.broadcast %66 : vector<64x1xi1> to vector<64x4xi1>
    %68 = vector.broadcast %cst_45 : bf16 to vector<64x4xbf16>
    %69 = arith.select %67, %63, %68 : vector<64x4xi1>, vector<64x4xbf16>
    %c1_46 = arith.constant 1 : index
    %c0_47 = arith.constant 0 : index
    %c0_48 = arith.constant 0 : index
    %70 = vector.load %arg5[%c1_46, %c0_47, %c0_48] : memref<9x4x8xbf16, #tpu.memory_space<vmem>>, vector<1x4x8xbf16>
    %71 = vector.shape_cast %70 : vector<1x4x8xbf16> to vector<4x8xbf16>
    %cst_49 = arith.constant dense<0.000000e+00> : vector<64x8xf32>
    %72 = tpu.matmul %69, %71, %cst_49 {dimension_numbers = #tpu.dot_dimension_numbers<[1], [0], [0], [1], [0, 0, 1, 1], [], []>} : vector<64x4xbf16>, vector<4x8xbf16>, vector<64x8xf32> -> vector<64x8xf32>
    %73 = arith.addf %62, %72 : vector<64x8xf32>
    %c296 = arith.constant 296 : index
    %c0_50 = arith.constant 0 : index
    %74 = vector.load %arg11[%c296, %c0_50] : memref<384x4xbf16, #tpu.memory_space<vmem>>, vector<64x4xbf16>
    %c8_i32_51 = arith.constant 8 : i32
    %75 = vector.broadcast %c8_i32_51 : i32 to vector<64x1xi32>
    %76 = arith.cmpi sge, %48, %75 : vector<64x1xi32>
    %cst_52 = arith.constant 0.000000e+00 : bf16
    %77 = vector.shape_cast %76 : vector<64x1xi1> to vector<64x1xi1>
    %78 = vector.broadcast %77 : vector<64x1xi1> to vector<64x4xi1>
    %79 = vector.broadcast %cst_52 : bf16 to vector<64x4xbf16>
    %80 = arith.select %78, %74, %79 : vector<64x4xi1>, vector<64x4xbf16>
    %c2_53 = arith.constant 2 : index
    %c0_54 = arith.constant 0 : index
    %c0_55 = arith.constant 0 : index
    %81 = vector.load %arg5[%c2_53, %c0_54, %c0_55] : memref<9x4x8xbf16, #tpu.memory_space<vmem>>, vector<1x4x8xbf16>
    %82 = vector.shape_cast %81 : vector<1x4x8xbf16> to vector<4x8xbf16>
    %cst_56 = arith.constant dense<0.000000e+00> : vector<64x8xf32>
    %83 = tpu.matmul %80, %82, %cst_56 {dimension_numbers = #tpu.dot_dimension_numbers<[1], [0], [0], [1], [0, 0, 1, 1], [], []>} : vector<64x4xbf16>, vector<4x8xbf16>, vector<64x8xf32> -> vector<64x8xf32>
    %84 = arith.addf %73, %83 : vector<64x8xf32>
    %c111 = arith.constant 111 : index
    %c0_57 = arith.constant 0 : index
    %85 = vector.load %arg11[%c111, %c0_57] : memref<384x4xbf16, #tpu.memory_space<vmem>>, vector<64x4xbf16>
    %c1_i32_58 = arith.constant 1 : i32
    %86 = vector.broadcast %c1_i32_58 : i32 to vector<64x1xi32>
    %87 = arith.cmpi sge, %49, %86 : vector<64x1xi32>
    %cst_59 = arith.constant 0.000000e+00 : bf16
    %88 = vector.shape_cast %87 : vector<64x1xi1> to vector<64x1xi1>
    %89 = vector.broadcast %88 : vector<64x1xi1> to vector<64x4xi1>
    %90 = vector.broadcast %cst_59 : bf16 to vector<64x4xbf16>
    %91 = arith.select %89, %85, %90 : vector<64x4xi1>, vector<64x4xbf16>
    %c3_60 = arith.constant 3 : index
    %c0_61 = arith.constant 0 : index
    %c0_62 = arith.constant 0 : index
    %92 = vector.load %arg5[%c3_60, %c0_61, %c0_62] : memref<9x4x8xbf16, #tpu.memory_space<vmem>>, vector<1x4x8xbf16>
    %93 = vector.shape_cast %92 : vector<1x4x8xbf16> to vector<4x8xbf16>
    %cst_63 = arith.constant dense<0.000000e+00> : vector<64x8xf32>
    %94 = tpu.matmul %91, %93, %cst_63 {dimension_numbers = #tpu.dot_dimension_numbers<[1], [0], [0], [1], [0, 0, 1, 1], [], []>} : vector<64x4xbf16>, vector<4x8xbf16>, vector<64x8xf32> -> vector<64x8xf32>
    %95 = arith.addf %84, %94 : vector<64x8xf32>
    %c16_64 = arith.constant 16 : index
    %c0_65 = arith.constant 0 : index
    %96 = vector.load %arg11[%c16_64, %c0_65] : memref<384x4xbf16, #tpu.memory_space<vmem>>, vector<64x4xbf16>
    %c4 = arith.constant 4 : index
    %c0_66 = arith.constant 0 : index
    %c0_67 = arith.constant 0 : index
    %97 = vector.load %arg5[%c4, %c0_66, %c0_67] : memref<9x4x8xbf16, #tpu.memory_space<vmem>>, vector<1x4x8xbf16>
    %98 = vector.shape_cast %97 : vector<1x4x8xbf16> to vector<4x8xbf16>
    %cst_68 = arith.constant dense<0.000000e+00> : vector<64x8xf32>
    %99 = tpu.matmul %96, %98, %cst_68 {dimension_numbers = #tpu.dot_dimension_numbers<[1], [0], [0], [1], [0, 0, 1, 1], [], []>} : vector<64x4xbf16>, vector<4x8xbf16>, vector<64x8xf32> -> vector<64x8xf32>
    %100 = arith.addf %95, %99 : vector<64x8xf32>
    %c112_69 = arith.constant 112 : index
    %c0_70 = arith.constant 0 : index
    %101 = vector.load %arg11[%c112_69, %c0_70] : memref<384x4xbf16, #tpu.memory_space<vmem>>, vector<64x4xbf16>
    %c5 = arith.constant 5 : index
    %c0_71 = arith.constant 0 : index
    %c0_72 = arith.constant 0 : index
    %102 = vector.load %arg5[%c5, %c0_71, %c0_72] : memref<9x4x8xbf16, #tpu.memory_space<vmem>>, vector<1x4x8xbf16>
    %103 = vector.shape_cast %102 : vector<1x4x8xbf16> to vector<4x8xbf16>
    %cst_73 = arith.constant dense<0.000000e+00> : vector<64x8xf32>
    %104 = tpu.matmul %101, %103, %cst_73 {dimension_numbers = #tpu.dot_dimension_numbers<[1], [0], [0], [1], [0, 0, 1, 1], [], []>} : vector<64x4xbf16>, vector<4x8xbf16>, vector<64x8xf32> -> vector<64x8xf32>
    %105 = arith.addf %100, %104 : vector<64x8xf32>
    %c303 = arith.constant 303 : index
    %c0_74 = arith.constant 0 : index
    %106 = vector.load %arg11[%c303, %c0_74] : memref<384x4xbf16, #tpu.memory_space<vmem>>, vector<64x4xbf16>
    %c1_i32_75 = arith.constant 1 : i32
    %107 = vector.broadcast %c1_i32_75 : i32 to vector<64x1xi32>
    %108 = arith.cmpi sge, %49, %107 : vector<64x1xi32>
    %cst_76 = arith.constant 0.000000e+00 : bf16
    %109 = vector.shape_cast %108 : vector<64x1xi1> to vector<64x1xi1>
    %110 = vector.broadcast %109 : vector<64x1xi1> to vector<64x4xi1>
    %111 = vector.broadcast %cst_76 : bf16 to vector<64x4xbf16>
    %112 = arith.select %110, %106, %111 : vector<64x4xi1>, vector<64x4xbf16>
    %c6 = arith.constant 6 : index
    %c0_77 = arith.constant 0 : index
    %c0_78 = arith.constant 0 : index
    %113 = vector.load %arg5[%c6, %c0_77, %c0_78] : memref<9x4x8xbf16, #tpu.memory_space<vmem>>, vector<1x4x8xbf16>
    %114 = vector.shape_cast %113 : vector<1x4x8xbf16> to vector<4x8xbf16>
    %cst_79 = arith.constant dense<0.000000e+00> : vector<64x8xf32>
    %115 = tpu.matmul %112, %114, %cst_79 {dimension_numbers = #tpu.dot_dimension_numbers<[1], [0], [0], [1], [0, 0, 1, 1], [], []>} : vector<64x4xbf16>, vector<4x8xbf16>, vector<64x8xf32> -> vector<64x8xf32>
    %116 = arith.addf %105, %115 : vector<64x8xf32>
    %c208_80 = arith.constant 208 : index
    %c0_81 = arith.constant 0 : index
    %117 = vector.load %arg11[%c208_80, %c0_81] : memref<384x4xbf16, #tpu.memory_space<vmem>>, vector<64x4xbf16>
    %c7 = arith.constant 7 : index
    %c0_82 = arith.constant 0 : index
    %c0_83 = arith.constant 0 : index
    %118 = vector.load %arg5[%c7, %c0_82, %c0_83] : memref<9x4x8xbf16, #tpu.memory_space<vmem>>, vector<1x4x8xbf16>
    %119 = vector.shape_cast %118 : vector<1x4x8xbf16> to vector<4x8xbf16>
    %cst_84 = arith.constant dense<0.000000e+00> : vector<64x8xf32>
    %120 = tpu.matmul %117, %119, %cst_84 {dimension_numbers = #tpu.dot_dimension_numbers<[1], [0], [0], [1], [0, 0, 1, 1], [], []>} : vector<64x4xbf16>, vector<4x8xbf16>, vector<64x8xf32> -> vector<64x8xf32>
    %121 = arith.addf %116, %120 : vector<64x8xf32>
    %c304_85 = arith.constant 304 : index
    %c0_86 = arith.constant 0 : index
    %122 = vector.load %arg11[%c304_85, %c0_86] : memref<384x4xbf16, #tpu.memory_space<vmem>>, vector<64x4xbf16>
    %c8 = arith.constant 8 : index
    %c0_87 = arith.constant 0 : index
    %c0_88 = arith.constant 0 : index
    %123 = vector.load %arg5[%c8, %c0_87, %c0_88] : memref<9x4x8xbf16, #tpu.memory_space<vmem>>, vector<1x4x8xbf16>
    %124 = vector.shape_cast %123 : vector<1x4x8xbf16> to vector<4x8xbf16>
    %cst_89 = arith.constant dense<0.000000e+00> : vector<64x8xf32>
    %125 = tpu.matmul %122, %124, %cst_89 {dimension_numbers = #tpu.dot_dimension_numbers<[1], [0], [0], [1], [0, 0, 1, 1], [], []>} : vector<64x4xbf16>, vector<4x8xbf16>, vector<64x8xf32> -> vector<64x8xf32>
    %126 = arith.addf %121, %125 : vector<64x8xf32>
    %c0_90 = arith.constant 0 : index
    %c0_91 = arith.constant 0 : index
    %127 = vector.load %arg6[%c0_90, %c0_91] : memref<1x8xf32, #tpu.memory_space<vmem>>, vector<1x8xf32>
    %128 = vector.broadcast %127 : vector<1x8xf32> to vector<64x8xf32>
    %129 = arith.addf %126, %128 : vector<64x8xf32>
    %cst_92 = arith.constant 0.000000e+00 : f32
    %130 = vector.broadcast %cst_92 : f32 to vector<64x8xf32>
    %131 = arith.maximumf %129, %130 : vector<64x8xf32>
    %132 = arith.truncf %131 : vector<64x8xf32> to vector<64x8xbf16>
    %c16_93 = arith.constant 16 : index
    %c0_94 = arith.constant 0 : index
    %133 = vector.load %arg12[%c16_93, %c0_94] : memref<96x8xbf16, #tpu.memory_space<vmem>>, vector<64x8xbf16>
    tpu.vector_store %arg12[%c16_93, %c0_94], %132 {strides = array<i32>} : memref<96x8xbf16, #tpu.memory_space<vmem>>, vector<64x8xbf16>,
    %c7_95 = arith.constant 7 : index
    %c0_96 = arith.constant 0 : index
    %134 = vector.load %arg12[%c7_95, %c0_96] : memref<96x8xbf16, #tpu.memory_space<vmem>>, vector<64x8xbf16>
    %c8_i32_97 = arith.constant 8 : i32
    %135 = vector.broadcast %c8_i32_97 : i32 to vector<64x1xi32>
    %136 = arith.cmpi sge, %48, %135 : vector<64x1xi32>
    %c1_i32_98 = arith.constant 1 : i32
    %137 = vector.broadcast %c1_i32_98 : i32 to vector<64x1xi32>
    %138 = arith.cmpi sge, %49, %137 : vector<64x1xi32>
    %139 = arith.andi %136, %138 : vector<64x1xi1>
    %cst_99 = arith.constant 0.000000e+00 : bf16
    %140 = vector.shape_cast %139 : vector<64x1xi1> to vector<64x1xi1>
    %141 = vector.broadcast %140 : vector<64x1xi1> to vector<64x8xi1>
    %142 = vector.broadcast %cst_99 : bf16 to vector<64x8xbf16>
    %143 = arith.select %141, %134, %142 : vector<64x8xi1>, vector<64x8xbf16>
    %c0_100 = arith.constant 0 : index
    %c0_101 = arith.constant 0 : index
    %c0_102 = arith.constant 0 : index
    %144 = vector.load %arg7[%c0_100, %c0_101, %c0_102] : memref<9x8x8xbf16, #tpu.memory_space<vmem>>, vector<1x8x8xbf16>
    %145 = vector.shape_cast %144 : vector<1x8x8xbf16> to vector<8x8xbf16>
    %cst_103 = arith.constant dense<0.000000e+00> : vector<64x8xf32>
    %146 = tpu.matmul %143, %145, %cst_103 {dimension_numbers = #tpu.dot_dimension_numbers<[1], [0], [0], [1], [0, 0, 1, 1], [], []>} : vector<64x8xbf16>, vector<8x8xbf16>, vector<64x8xf32> -> vector<64x8xf32>
    %c8_104 = arith.constant 8 : index
    %c0_105 = arith.constant 0 : index
    %147 = vector.load %arg12[%c8_104, %c0_105] : memref<96x8xbf16, #tpu.memory_space<vmem>>, vector<64x8xbf16>
    %c8_i32_106 = arith.constant 8 : i32
    %148 = vector.broadcast %c8_i32_106 : i32 to vector<64x1xi32>
    %149 = arith.cmpi sge, %48, %148 : vector<64x1xi32>
    %cst_107 = arith.constant 0.000000e+00 : bf16
    %150 = vector.shape_cast %149 : vector<64x1xi1> to vector<64x1xi1>
    %151 = vector.broadcast %150 : vector<64x1xi1> to vector<64x8xi1>
    %152 = vector.broadcast %cst_107 : bf16 to vector<64x8xbf16>
    %153 = arith.select %151, %147, %152 : vector<64x8xi1>, vector<64x8xbf16>
    %c1_108 = arith.constant 1 : index
    %c0_109 = arith.constant 0 : index
    %c0_110 = arith.constant 0 : index
    %154 = vector.load %arg7[%c1_108, %c0_109, %c0_110] : memref<9x8x8xbf16, #tpu.memory_space<vmem>>, vector<1x8x8xbf16>
    %155 = vector.shape_cast %154 : vector<1x8x8xbf16> to vector<8x8xbf16>
    %cst_111 = arith.constant dense<0.000000e+00> : vector<64x8xf32>
    %156 = tpu.matmul %153, %155, %cst_111 {dimension_numbers = #tpu.dot_dimension_numbers<[1], [0], [0], [1], [0, 0, 1, 1], [], []>} : vector<64x8xbf16>, vector<8x8xbf16>, vector<64x8xf32> -> vector<64x8xf32>
    %157 = arith.addf %146, %156 : vector<64x8xf32>
    %c9 = arith.constant 9 : index
    %c0_112 = arith.constant 0 : index
    %158 = vector.load %arg12[%c9, %c0_112] : memref<96x8xbf16, #tpu.memory_space<vmem>>, vector<64x8xbf16>
    %c8_i32_113 = arith.constant 8 : i32
    %159 = vector.broadcast %c8_i32_113 : i32 to vector<64x1xi32>
    %160 = arith.cmpi sge, %48, %159 : vector<64x1xi32>
    %c6_i32 = arith.constant 6 : i32
    %161 = vector.broadcast %c6_i32 : i32 to vector<64x1xi32>
    %162 = arith.cmpi sle, %49, %161 : vector<64x1xi32>
    %163 = arith.andi %160, %162 : vector<64x1xi1>
    %cst_114 = arith.constant 0.000000e+00 : bf16
    %164 = vector.shape_cast %163 : vector<64x1xi1> to vector<64x1xi1>
    %165 = vector.broadcast %164 : vector<64x1xi1> to vector<64x8xi1>
    %166 = vector.broadcast %cst_114 : bf16 to vector<64x8xbf16>
    %167 = arith.select %165, %158, %166 : vector<64x8xi1>, vector<64x8xbf16>
    %c2_115 = arith.constant 2 : index
    %c0_116 = arith.constant 0 : index
    %c0_117 = arith.constant 0 : index
    %168 = vector.load %arg7[%c2_115, %c0_116, %c0_117] : memref<9x8x8xbf16, #tpu.memory_space<vmem>>, vector<1x8x8xbf16>
    %169 = vector.shape_cast %168 : vector<1x8x8xbf16> to vector<8x8xbf16>
    %cst_118 = arith.constant dense<0.000000e+00> : vector<64x8xf32>
    %170 = tpu.matmul %167, %169, %cst_118 {dimension_numbers = #tpu.dot_dimension_numbers<[1], [0], [0], [1], [0, 0, 1, 1], [], []>} : vector<64x8xbf16>, vector<8x8xbf16>, vector<64x8xf32> -> vector<64x8xf32>
    %171 = arith.addf %157, %170 : vector<64x8xf32>
    %c15 = arith.constant 15 : index
    %c0_119 = arith.constant 0 : index
    %172 = vector.load %arg12[%c15, %c0_119] : memref<96x8xbf16, #tpu.memory_space<vmem>>, vector<64x8xbf16>
    %c1_i32_120 = arith.constant 1 : i32
    %173 = vector.broadcast %c1_i32_120 : i32 to vector<64x1xi32>
    %174 = arith.cmpi sge, %49, %173 : vector<64x1xi32>
    %cst_121 = arith.constant 0.000000e+00 : bf16
    %175 = vector.shape_cast %174 : vector<64x1xi1> to vector<64x1xi1>
    %176 = vector.broadcast %175 : vector<64x1xi1> to vector<64x8xi1>
    %177 = vector.broadcast %cst_121 : bf16 to vector<64x8xbf16>
    %178 = arith.select %176, %172, %177 : vector<64x8xi1>, vector<64x8xbf16>
    %c3_122 = arith.constant 3 : index
    %c0_123 = arith.constant 0 : index
    %c0_124 = arith.constant 0 : index
    %179 = vector.load %arg7[%c3_122, %c0_123, %c0_124] : memref<9x8x8xbf16, #tpu.memory_space<vmem>>, vector<1x8x8xbf16>
    %180 = vector.shape_cast %179 : vector<1x8x8xbf16> to vector<8x8xbf16>
    %cst_125 = arith.constant dense<0.000000e+00> : vector<64x8xf32>
    %181 = tpu.matmul %178, %180, %cst_125 {dimension_numbers = #tpu.dot_dimension_numbers<[1], [0], [0], [1], [0, 0, 1, 1], [], []>} : vector<64x8xbf16>, vector<8x8xbf16>, vector<64x8xf32> -> vector<64x8xf32>
    %182 = arith.addf %171, %181 : vector<64x8xf32>
    %c16_126 = arith.constant 16 : index
    %c0_127 = arith.constant 0 : index
    %183 = vector.load %arg12[%c16_126, %c0_127] : memref<96x8xbf16, #tpu.memory_space<vmem>>, vector<64x8xbf16>
    %c4_128 = arith.constant 4 : index
    %c0_129 = arith.constant 0 : index
    %c0_130 = arith.constant 0 : index
    %184 = vector.load %arg7[%c4_128, %c0_129, %c0_130] : memref<9x8x8xbf16, #tpu.memory_space<vmem>>, vector<1x8x8xbf16>
    %185 = vector.shape_cast %184 : vector<1x8x8xbf16> to vector<8x8xbf16>
    %cst_131 = arith.constant dense<0.000000e+00> : vector<64x8xf32>
    %186 = tpu.matmul %183, %185, %cst_131 {dimension_numbers = #tpu.dot_dimension_numbers<[1], [0], [0], [1], [0, 0, 1, 1], [], []>} : vector<64x8xbf16>, vector<8x8xbf16>, vector<64x8xf32> -> vector<64x8xf32>
    %187 = arith.addf %182, %186 : vector<64x8xf32>
    %c17 = arith.constant 17 : index
    %c0_132 = arith.constant 0 : index
    %188 = vector.load %arg12[%c17, %c0_132] : memref<96x8xbf16, #tpu.memory_space<vmem>>, vector<64x8xbf16>
    %c6_i32_133 = arith.constant 6 : i32
    %189 = vector.broadcast %c6_i32_133 : i32 to vector<64x1xi32>
    %190 = arith.cmpi sle, %49, %189 : vector<64x1xi32>
    %cst_134 = arith.constant 0.000000e+00 : bf16
    %191 = vector.shape_cast %190 : vector<64x1xi1> to vector<64x1xi1>
    %192 = vector.broadcast %191 : vector<64x1xi1> to vector<64x8xi1>
    %193 = vector.broadcast %cst_134 : bf16 to vector<64x8xbf16>
    %194 = arith.select %192, %188, %193 : vector<64x8xi1>, vector<64x8xbf16>
    %c5_135 = arith.constant 5 : index
    %c0_136 = arith.constant 0 : index
    %c0_137 = arith.constant 0 : index
    %195 = vector.load %arg7[%c5_135, %c0_136, %c0_137] : memref<9x8x8xbf16, #tpu.memory_space<vmem>>, vector<1x8x8xbf16>
    %196 = vector.shape_cast %195 : vector<1x8x8xbf16> to vector<8x8xbf16>
    %cst_138 = arith.constant dense<0.000000e+00> : vector<64x8xf32>
    %197 = tpu.matmul %194, %196, %cst_138 {dimension_numbers = #tpu.dot_dimension_numbers<[1], [0], [0], [1], [0, 0, 1, 1], [], []>} : vector<64x8xbf16>, vector<8x8xbf16>, vector<64x8xf32> -> vector<64x8xf32>
    %198 = arith.addf %187, %197 : vector<64x8xf32>
    %c23 = arith.constant 23 : index
    %c0_139 = arith.constant 0 : index
    %199 = vector.load %arg12[%c23, %c0_139] : memref<96x8xbf16, #tpu.memory_space<vmem>>, vector<64x8xbf16>
    %c56_i32 = arith.constant 56 : i32
    %200 = vector.broadcast %c56_i32 : i32 to vector<64x1xi32>
    %201 = arith.cmpi slt, %48, %200 : vector<64x1xi32>
    %c1_i32_140 = arith.constant 1 : i32
    %202 = vector.broadcast %c1_i32_140 : i32 to vector<64x1xi32>
    %203 = arith.cmpi sge, %49, %202 : vector<64x1xi32>
    %204 = arith.andi %201, %203 : vector<64x1xi1>
    %cst_141 = arith.constant 0.000000e+00 : bf16
    %205 = vector.shape_cast %204 : vector<64x1xi1> to vector<64x1xi1>
    %206 = vector.broadcast %205 : vector<64x1xi1> to vector<64x8xi1>
    %207 = vector.broadcast %cst_141 : bf16 to vector<64x8xbf16>
    %208 = arith.select %206, %199, %207 : vector<64x8xi1>, vector<64x8xbf16>
    %c6_142 = arith.constant 6 : index
    %c0_143 = arith.constant 0 : index
    %c0_144 = arith.constant 0 : index
    %209 = vector.load %arg7[%c6_142, %c0_143, %c0_144] : memref<9x8x8xbf16, #tpu.memory_space<vmem>>, vector<1x8x8xbf16>
    %210 = vector.shape_cast %209 : vector<1x8x8xbf16> to vector<8x8xbf16>
    %cst_145 = arith.constant dense<0.000000e+00> : vector<64x8xf32>
    %211 = tpu.matmul %208, %210, %cst_145 {dimension_numbers = #tpu.dot_dimension_numbers<[1], [0], [0], [1], [0, 0, 1, 1], [], []>} : vector<64x8xbf16>, vector<8x8xbf16>, vector<64x8xf32> -> vector<64x8xf32>
    %212 = arith.addf %198, %211 : vector<64x8xf32>
    %c24 = arith.constant 24 : index
    %c0_146 = arith.constant 0 : index
    %213 = vector.load %arg12[%c24, %c0_146] : memref<96x8xbf16, #tpu.memory_space<vmem>>, vector<64x8xbf16>
    %c56_i32_147 = arith.constant 56 : i32
    %214 = vector.broadcast %c56_i32_147 : i32 to vector<64x1xi32>
    %215 = arith.cmpi slt, %48, %214 : vector<64x1xi32>
    %cst_148 = arith.constant 0.000000e+00 : bf16
    %216 = vector.shape_cast %215 : vector<64x1xi1> to vector<64x1xi1>
    %217 = vector.broadcast %216 : vector<64x1xi1> to vector<64x8xi1>
    %218 = vector.broadcast %cst_148 : bf16 to vector<64x8xbf16>
    %219 = arith.select %217, %213, %218 : vector<64x8xi1>, vector<64x8xbf16>
    %c7_149 = arith.constant 7 : index
    %c0_150 = arith.constant 0 : index
    %c0_151 = arith.constant 0 : index
    %220 = vector.load %arg7[%c7_149, %c0_150, %c0_151] : memref<9x8x8xbf16, #tpu.memory_space<vmem>>, vector<1x8x8xbf16>
    %221 = vector.shape_cast %220 : vector<1x8x8xbf16> to vector<8x8xbf16>
    %cst_152 = arith.constant dense<0.000000e+00> : vector<64x8xf32>
    %222 = tpu.matmul %219, %221, %cst_152 {dimension_numbers = #tpu.dot_dimension_numbers<[1], [0], [0], [1], [0, 0, 1, 1], [], []>} : vector<64x8xbf16>, vector<8x8xbf16>, vector<64x8xf32> -> vector<64x8xf32>
    %223 = arith.addf %212, %222 : vector<64x8xf32>
    %c25 = arith.constant 25 : index
    %c0_153 = arith.constant 0 : index
    %224 = vector.load %arg12[%c25, %c0_153] : memref<96x8xbf16, #tpu.memory_space<vmem>>, vector<64x8xbf16>
    %c56_i32_154 = arith.constant 56 : i32
    %225 = vector.broadcast %c56_i32_154 : i32 to vector<64x1xi32>
    %226 = arith.cmpi slt, %48, %225 : vector<64x1xi32>
    %c6_i32_155 = arith.constant 6 : i32
    %227 = vector.broadcast %c6_i32_155 : i32 to vector<64x1xi32>
    %228 = arith.cmpi sle, %49, %227 : vector<64x1xi32>
    %229 = arith.andi %226, %228 : vector<64x1xi1>
    %cst_156 = arith.constant 0.000000e+00 : bf16
    %230 = vector.shape_cast %229 : vector<64x1xi1> to vector<64x1xi1>
    %231 = vector.broadcast %230 : vector<64x1xi1> to vector<64x8xi1>
    %232 = vector.broadcast %cst_156 : bf16 to vector<64x8xbf16>
    %233 = arith.select %231, %224, %232 : vector<64x8xi1>, vector<64x8xbf16>
    %c8_157 = arith.constant 8 : index
    %c0_158 = arith.constant 0 : index
    %c0_159 = arith.constant 0 : index
    %234 = vector.load %arg7[%c8_157, %c0_158, %c0_159] : memref<9x8x8xbf16, #tpu.memory_space<vmem>>, vector<1x8x8xbf16>
    %235 = vector.shape_cast %234 : vector<1x8x8xbf16> to vector<8x8xbf16>
    %cst_160 = arith.constant dense<0.000000e+00> : vector<64x8xf32>
    %236 = tpu.matmul %233, %235, %cst_160 {dimension_numbers = #tpu.dot_dimension_numbers<[1], [0], [0], [1], [0, 0, 1, 1], [], []>} : vector<64x8xbf16>, vector<8x8xbf16>, vector<64x8xf32> -> vector<64x8xf32>
    %237 = arith.addf %223, %236 : vector<64x8xf32>
    %c0_161 = arith.constant 0 : index
    %c0_162 = arith.constant 0 : index
    %c0_163 = arith.constant 0 : index
    %c0_164 = arith.constant 0 : index
    %238 = vector.load %arg1[%c0_161, %c0_162, %c0_163, %c0_164] : memref<1x4x64x4xf32, #tpu.memory_space<vmem>>, vector<1x1x64x4xf32>
    %239 = vector.shape_cast %238 : vector<1x1x64x4xf32> to vector<64x4xf32>
    %240 = arith.truncf %239 : vector<64x4xf32> to vector<64x4xbf16>
    %c0_165 = arith.constant 0 : index
    %c0_166 = arith.constant 0 : index
    %241 = vector.load %arg9[%c0_165, %c0_166] : memref<4x8xbf16, #tpu.memory_space<vmem>>, vector<4x8xbf16>
    %cst_167 = arith.constant dense<0.000000e+00> : vector<64x8xf32>
    %242 = tpu.matmul %240, %241, %cst_167 {dimension_numbers = #tpu.dot_dimension_numbers<[1], [0], [0], [1], [0, 0, 1, 1], [], []>} : vector<64x4xbf16>, vector<4x8xbf16>, vector<64x8xf32> -> vector<64x8xf32>
    %243 = arith.addf %237, %242 : vector<64x8xf32>
    %c0_168 = arith.constant 0 : index
    %c0_169 = arith.constant 0 : index
    %244 = vector.load %arg8[%c0_168, %c0_169] : memref<1x8xf32, #tpu.memory_space<vmem>>, vector<1x8xf32>
    %245 = vector.broadcast %244 : vector<1x8xf32> to vector<64x8xf32>
    %246 = arith.addf %243, %245 : vector<64x8xf32>
    %c0_170 = arith.constant 0 : index
    %c0_171 = arith.constant 0 : index
    %c0_172 = arith.constant 0 : index
    %247 = vector.load %arg10[%c0_170, %c0_171, %c0_172] : memref<1x64x8xf32, #tpu.memory_space<vmem>>, vector<1x64x8xf32>
    %248 = vector.shape_cast %247 : vector<1x64x8xf32> to vector<64x8xf32>
    %249 = vector.shape_cast %246 : vector<64x8xf32> to vector<1x64x8xf32>
    tpu.vector_store %arg10[%c0_170, %c0_171, %c0_172], %249 {strides = array<i32>} : memref<1x64x8xf32, #tpu.memory_space<vmem>>, vector<1x64x8xf32>,
    return
  }
  func.func @transform_0(%arg0: i32) -> (i32, i32, i32, i32) {
    %c0_i32 = arith.constant 0 : i32
    %c0_i32_0 = arith.constant 0 : i32
    %c0_i32_1 = arith.constant 0 : i32
    %c0_i32_2 = arith.constant 0 : i32
    return %arg0, %c0_i32, %c0_i32_0, %c0_i32_1 : i32, i32, i32, i32
  }
  func.func @transform_1(%arg0: i32) -> (i32, i32) {
    %c0_i32 = arith.constant 0 : i32
    %c0_i32_0 = arith.constant 0 : i32
    %c0_i32_1 = arith.constant 0 : i32
    return %c0_i32, %c0_i32_0 : i32, i32
  }
  func.func @transform_2(%arg0: i32) -> (i32, i32) {
    %c0_i32 = arith.constant 0 : i32
    %c0_i32_0 = arith.constant 0 : i32
    %c0_i32_1 = arith.constant 0 : i32
    return %c0_i32, %c0_i32_0 : i32, i32
  }
  func.func @transform_3(%arg0: i32) -> (i32, i32) {
    %c0_i32 = arith.constant 0 : i32
    %c0_i32_0 = arith.constant 0 : i32
    %c0_i32_1 = arith.constant 0 : i32
    return %c0_i32, %c0_i32_0 : i32, i32
  }
  func.func @transform_4(%arg0: i32) -> (i32, i32, i32) {
    %c0_i32 = arith.constant 0 : i32
    %c0_i32_0 = arith.constant 0 : i32
    %c0_i32_1 = arith.constant 0 : i32
    %c0_i32_2 = arith.constant 0 : i32
    return %c0_i32, %c0_i32_0, %c0_i32_1 : i32, i32, i32
  }
  func.func @transform_5(%arg0: i32) -> (i32, i32) {
    %c0_i32 = arith.constant 0 : i32
    %c0_i32_0 = arith.constant 0 : i32
    %c0_i32_1 = arith.constant 0 : i32
    return %c0_i32, %c0_i32_0 : i32, i32
  }
  func.func @transform_6(%arg0: i32) -> (i32, i32, i32) {
    %c0_i32 = arith.constant 0 : i32
    %c0_i32_0 = arith.constant 0 : i32
    %c0_i32_1 = arith.constant 0 : i32
    %c0_i32_2 = arith.constant 0 : i32
    return %c0_i32, %c0_i32_0, %c0_i32_1 : i32, i32, i32
  }
  func.func @transform_7(%arg0: i32) -> (i32, i32) {
    %c0_i32 = arith.constant 0 : i32
    %c0_i32_0 = arith.constant 0 : i32
    %c0_i32_1 = arith.constant 0 : i32
    return %c0_i32, %c0_i32_0 : i32, i32
  }
  func.func @transform_8(%arg0: i32) -> (i32, i32) {
    %c0_i32 = arith.constant 0 : i32
    %c0_i32_0 = arith.constant 0 : i32
    %c0_i32_1 = arith.constant 0 : i32
    return %c0_i32, %c0_i32_0 : i32, i32
  }
  func.func @transform_9(%arg0: i32) -> (i32, i32, i32) {
    %c0_i32 = arith.constant 0 : i32
    %c0_i32_0 = arith.constant 0 : i32
    %c0_i32_1 = arith.constant 0 : i32
    return %arg0, %c0_i32, %c0_i32_0 : i32, i32, i32
  }
}

</mosaic_0001>

<bundles_post_ra>
// kernel: wide_basic_forward.1
= control target key start
LH: loop header
LB: loop body
LE: loop exit
PB: predicated region body
PF: predicated region fallthrough
CT: control target
= control target key end

     0   :  { %s6414_s0 = inlined_call_operand.hbm [shape: f32[2,4,64,4], index: 0, kind: input, shape index: {}]   ;;  %s6415_s1 = inlined_call_operand.hbm [shape: s32[64,1], index: 1, kind: input, shape index: {}]   ;;  %s6416_s2 = inlined_call_operand.hbm [shape: f32[1,4], index: 2, kind: input, shape index: {}]   ;;  %s6417_s3 = inlined_call_operand.hbm [shape: f32[1,4], index: 3, kind: input, shape index: {}]   ;;  %s6418_s4 = inlined_call_operand.hbm [shape: bf16[9,4,8], index: 4, kind: input, shape index: {}]   ;;  %s6419_s5 = inlined_call_operand.hbm [shape: f32[1,8], index: 5, kind: input, shape index: {}]   ;;  %s6420_s6 = inlined_call_operand.hbm [shape: bf16[9,8,8], index: 6, kind: input, shape index: {}]   ;;  %s6421_s7 = inlined_call_operand.hbm [shape: f32[1,8], index: 7, kind: input, shape index: {}]   ;;  %s6422_s8 = inlined_call_operand.hbm [shape: bf16[4,8], index: 8, kind: input, shape index: {}]   ;;  %s6423_s9 = inlined_call_operand.hbm [shape: f32[2,64,8], index: 9, kind: output, shape index: {}]  }
   0x1   :  { %6446 = sst [smem:[#allocation27_spill]] %s6423_s9 }
   0x2   :  { %14 = vsyncpa [#allocation5], 0 }
   0x3   :  { %16 = vsyncpa [#allocation5 + $0x1], 0 }
   0x4   :  { %17 = vsyncpa [#allocation8], 0 }
   0x5   :  { %18 = vsyncpa [#allocation11], 0 }
   0x6   :  { %19 = vsyncpa [#allocation14], 0 }
   0x7   :  { %20 = vsyncpa [#allocation17], 0 }
   0x8   :  { %21 = vsyncpa [#allocation6], 0 }
   0x9   :  { %23 = vsyncpa [#allocation6 + $0x1], 0  ;;  %s5115_s30 = smov 0   ;;  %s5117_s10 = smov 0  }
   0xa   :  { %s5119_s11 = smov 0   ;;  %s5121_s12 = smov 0  }
   0xb LB: > { %s5044_s13 = smov [#allocation7]   ;;  %s5136_s15 = sadd.s32 4294967295, %s5042_s12   ;;  %s5042_s12 = sphi %s5121_s12, %s6536_s12   ;;  %s5038_s11 = sphi %s5119_s11, %s6535_s11   ;;  %s5034_s10 = sphi %s5117_s10, %s6534_s10   ;;  %s5030_s30 = sphi %s5115_s30, %s6533_s30  }
   0xc   : > { %s266_s14 = sshll.u32 %s5044_s13, 4  ;;  %p3940_p0 = scmp.ge.s32.totalorder %s5042_s12, 1  ;;  %s5141_s14 = int_to_ptr.vmem [resolvable:$true] %s266_s14 }
   0xd   : > { %p6426_p1 = scmp.eq.s32.totalorder %s5136_s15, 0  ;;  %p254_p2 = scmp.lt.s32.totalorder %s5042_s12, 3 }
   0xe   : > { %s5045_s17 = smov [#allocation10]   ;;  %s5046_s20 = smov [#allocation13]  }
   0xf   : > { %p5143_p3 = pnand %p3940_p0, %p254_p2  ;;  %s291_s18 = sshll.u32 %s5045_s17, 4  ;;  %s5156_s18 = int_to_ptr.vmem [resolvable:$true] %s291_s18 }
  0x10   : > { %s315_s21 = sshll.u32 %s5046_s20, 4  ;;  %s4706_s24 = scalar_lea.hbm %s6415_s1, 1024  ;;  %s5158_s21 = int_to_ptr.vmem [resolvable:$true] %s315_s21 }
  0x11   : > { %s6447_s16 = scalar_select %p5143_p3, 1, 0 }
  0x12   : > { %p4594_p5 = pneg %p5143_p3  ;;  %p4707_p7 = scmp.ne.s32.totalorder %s6415_s1, %s4706_s24 }
  0x13   : > { %p4713_p11 = scmp.lt.u32.totalorder %s4706_s24, %s6415_s1 }
  0x14   : > { %p5152_p6 = pnand %p4594_p5, %p6426_p1 }
  0x16   : > { %p5168_p8 = pneg %p5152_p6 }
  0x18   : > { %p4709_p9 = pnand %p5168_p8, %p4707_p7 }
  0x1a   : > { %p4710_p10 = pneg %p4709_p9 }
  0x1c   : > { %p4715_p12 = pnand %p4713_p11, %p4710_p10 }
  0x1e   : > { %4718 = shalt.err (!%p4715_p12)
}
  0x1f   : > { %s4719_s13 = scalar_lea.vmem %s5141_s14, 1024  ;;  %p4727_p5 = scmp.lt.s32.totalorder %s5141_s14, %s5141_s14 }
  0x20   : > { %p4720_p13 = scmp.ne.s32.totalorder %s5141_s14, %s4719_s13  ;;  %p4728_p4 = scmp.lt.s32.totalorder %s4719_s13, %s4719_s13 }
  0x22   : > { %p4722_p0 = pnand %p4720_p13, %p5168_p8  ;;  %p4729_p7 = por %p4728_p4, %p4727_p5 }
  0x24   : > { %p4723_p2 = pneg %p4722_p0 }
  0x26   : > { %p4730_p9 = pnand %p4729_p7, %p4723_p2 }
  0x28   : > { %4733 = shalt.err (!%p4730_p9)
}
  0x29   : > { %s6425_s17 = smov 128   ;;  %s6428_s20 = smov 8  }
  0x2a   : > { %4597 = dma.hbm_to_vmem [thread:$0]  (!%p5152_p6), %s6415_s1, 1024, %s5141_s14, [#allocation8], %s6425_s17, %s6425_s17, %s6428_s20  }
  0x2b   : > { %s4734_s26 = scalar_lea.hbm %s6417_s3, 16 }
  0x2c   : > { %p4735_p4 = scmp.ne.s32.totalorder %s6417_s3, %s4734_s26  ;;  %p4741_p12 = scmp.lt.u32.totalorder %s4734_s26, %s6417_s3 }
  0x2e   : > { %p4737_p10 = pnand %p4735_p4, %p5168_p8 }
  0x30   : > { %p4738_p11 = pneg %p4737_p10 }
  0x32   : > { %p4743_p13 = pnand %p4741_p12, %p4738_p11 }
  0x34   : > { %4746 = shalt.err (!%p4743_p13)
}
  0x35   : > { %s4747_s14 = scalar_lea.vmem %s5156_s18, 16  ;;  %s4754_s22 = scalar_lea.vmem %s5156_s18, 32 }
  0x36   : > { %p4748_p0 = scmp.ne.s32.totalorder %s5156_s18, %s4747_s14  ;;  %p4755_p7 = scmp.lt.s32.totalorder %s5156_s18, %s5156_s18 }
  0x37   : > { %p4756_p9 = scmp.lt.s32.totalorder %s4754_s22, %s4747_s14 }
  0x38   : > { %p4750_p2 = pnand %p4748_p0, %p5168_p8 }
  0x39   : > { %p4757_p4 = por %p4756_p9, %p4755_p7 }
  0x3a   : > { %p4751_p5 = pneg %p4750_p2 }
  0x3c   : > { %p4758_p10 = pnand %p4757_p4, %p4751_p5 }
  0x3e   : > { %4761 = shalt.err (!%p4758_p10)
}
  0x3f   : > { %4603 = dma.hbm_to_vmem [thread:$0]  (!%p5152_p6), %s6417_s3, 16, %s5156_s18, [#allocation11]  }
  0x40   : > { %s4762_s26 = scalar_lea.hbm %s6419_s5, 16 }
  0x41   : > { %p4763_p11 = scmp.ne.s32.totalorder %s6419_s5, %s4762_s26  ;;  %p4769_p0 = scmp.lt.u32.totalorder %s4762_s26, %s6419_s5 }
  0x43   : > { %p4765_p12 = pnand %p4763_p11, %p5168_p8 }
  0x45   : > { %p4766_p13 = pneg %p4765_p12 }
  0x47   : > { %p4771_p2 = pnand %p4769_p0, %p4766_p13 }
  0x49   : > { %4774 = shalt.err (!%p4771_p2)
}
  0x4a   : > { %s4775_s18 = scalar_lea.vmem %s5158_s21, 16  ;;  %s4782_s22 = scalar_lea.vmem %s5158_s21, 32 }
  0x4b   : > { %p4776_p5 = scmp.ne.s32.totalorder %s5158_s21, %s4775_s18  ;;  %p4783_p4 = scmp.lt.s32.totalorder %s5158_s21, %s5158_s21 }
  0x4c   : > { %p4784_p10 = scmp.lt.s32.totalorder %s4782_s22, %s4775_s18 }
  0x4d   : > { %p4778_p7 = pnand %p4776_p5, %p5168_p8 }
  0x4e   : > { %p4785_p11 = por %p4784_p10, %p4783_p4 }
  0x4f   : > { %p4779_p9 = pneg %p4778_p7 }
  0x51   : > { %p4786_p12 = pnand %p4785_p11, %p4779_p9 }
  0x53   : > { %4789 = shalt.err (!%p4786_p12)
}
  0x54   : > { %4609 = dma.hbm_to_vmem [thread:$0]  (!%p5152_p6), %s6419_s5, 16, %s5158_s21, [#allocation14]  }
  0x55   : > { %s5049_s24 = smov [#allocation16]   ;;  %s5050_s26 = smov [#allocation9]  }
  0x56   : > { %s339_s25 = sshll.u32 %s5049_s24, 4  ;;  %s280_s28 = sshll.u32 %s5050_s26, 4  ;;  %s340_s25 = int_to_ptr.vmem [resolvable:$true] %s339_s25  ;;  %s281_s28 = int_to_ptr.vmem [resolvable:$true] %s280_s28 }
  0x57   : > { %s4790_s14 = scalar_lea.hbm %s6421_s7, 16 }
  0x58   : > { %p4791_p13 = scmp.ne.s32.totalorder %s6421_s7, %s4790_s14  ;;  %p4797_p5 = scmp.lt.u32.totalorder %s4790_s14, %s6421_s7 }
  0x5a   : > { %p4793_p0 = pnand %p4791_p13, %p5168_p8 }
  0x5c   : > { %p4794_p2 = pneg %p4793_p0 }
  0x5e   : > { %p4799_p7 = pnand %p4797_p5, %p4794_p2 }
  0x60   : > { %4802 = shalt.err (!%p4799_p7)
}
  0x61   : > { %s4803_s21 = scalar_lea.vmem %s340_s25, 16  ;;  %s4810_s23 = scalar_lea.vmem %s340_s25, 32 }
  0x62   : > { %p4804_p9 = scmp.ne.s32.totalorder %s340_s25, %s4803_s21  ;;  %p4811_p11 = scmp.lt.s32.totalorder %s340_s25, %s340_s25 }
  0x63   : > { %p4812_p12 = scmp.lt.s32.totalorder %s4810_s23, %s4803_s21 }
  0x64   : > { %p4806_p4 = pnand %p4804_p9, %p5168_p8 }
  0x65   : > { %p4813_p1 = por %p4812_p12, %p4811_p11 }
  0x66   : > { %p4807_p10 = pneg %p4806_p4 }
  0x68   : > { %p4814_p3 = pnand %p4813_p1, %p4807_p10 }
  0x6a   : > { %4817 = shalt.err (!%p4814_p3)
}
  0x6b   : > { %4615 = dma.hbm_to_vmem [thread:$0]  (!%p5152_p6), %s6421_s7, 16, %s340_s25, [#allocation17]  }
  0x6c   : > { %s4818_s13 = scalar_lea.hbm %s6416_s2, 16 }
  0x6d   : > { %p4819_p13 = scmp.ne.s32.totalorder %s6416_s2, %s4818_s13  ;;  %p4825_p3 = scmp.lt.u32.totalorder %s4818_s13, %s6416_s2 }
  0x6f   : > { %p4821_p0 = pnand %p4819_p13, %p5168_p8 }
  0x71   : > { %p4822_p1 = pneg %p4821_p0 }
  0x73   : > { %p4827_p2 = pnand %p4825_p3, %p4822_p1 }
  0x75   : > { %4830 = shalt.err (!%p4827_p2)
}
  0x76   : > { %s4831_s21 = scalar_lea.vmem %s281_s28, 16  ;;  %s4838_s25 = scalar_lea.vmem %s281_s28, 32 }
  0x77   : > { %p4832_p5 = scmp.ne.s32.totalorder %s281_s28, %s4831_s21  ;;  %p4839_p4 = scmp.lt.s32.totalorder %s281_s28, %s281_s28 }
  0x78   : > { %p4840_p10 = scmp.lt.s32.totalorder %s4838_s25, %s4831_s21 }
  0x79   : > { %p4834_p7 = pnand %p4832_p5, %p5168_p8 }
  0x7a   : > { %p4841_p11 = por %p4840_p10, %p4839_p4 }
  0x7b   : > { %p4835_p9 = pneg %p4834_p7 }
  0x7d   : > { %p4842_p12 = pnand %p4841_p11, %p4835_p9 }
  0x7f   : > { %4845 = shalt.err (!%p4842_p12)
}
  0x80   : > { %4600 = dma.hbm_to_vmem [thread:$0]  (!%p5152_p6), %s6416_s2, 16, %s281_s28, [#allocation8]  }
  0x81   : > { %s5051_s26 = smov [#allocation12]   ;;  %s4846_s14 = scalar_lea.hbm %s6418_s4, 288 }
  0x82   : > { %s301_s17 = sshll.u32 %s5051_s26, 4  ;;  %p4847_p13 = scmp.ne.s32.totalorder %s6418_s4, %s4846_s14  ;;  %s302_s17 = int_to_ptr.vmem [resolvable:$true] %s301_s17 }
  0x83   : > { %p4853_p3 = scmp.lt.u32.totalorder %s4846_s14, %s6418_s4 }
  0x84   : > { %p4849_p0 = pnand %p4847_p13, %p5168_p8 }
  0x86   : > { %p4850_p1 = pneg %p4849_p0 }
  0x88   : > { %p4855_p2 = pnand %p4853_p3, %p4850_p1 }
  0x8a   : > { %4858 = shalt.err (!%p4855_p2)
}
  0x8b   : > { %s4859_s28 = scalar_lea.vmem %s302_s17, 288  ;;  %p4867_p4 = scmp.lt.s32.totalorder %s302_s17, %s302_s17 }
  0x8c   : > { %p4860_p5 = scmp.ne.s32.totalorder %s302_s17, %s4859_s28  ;;  %p4868_p10 = scmp.lt.s32.totalorder %s4859_s28, %s4859_s28 }
  0x8e   : > { %p4862_p7 = pnand %p4860_p5, %p5168_p8  ;;  %p4869_p11 = por %p4868_p10, %p4867_p4 }
  0x90   : > { %p4863_p9 = pneg %p4862_p7 }
  0x92   : > { %p4870_p12 = pnand %p4869_p11, %p4863_p9 }
  0x94   : > { %4873 = shalt.err (!%p4870_p12)
}
  0x95   : > { %s5052_s25 = smov 32   ;;  %s5053_s23 = smov 2  }
  0x96   : > { %4606 = dma.hbm_to_vmem [thread:$0]  (!%p5152_p6), %s6418_s4, 288, %s302_s17, [#allocation11], %s5052_s25, %s5052_s25, %s5053_s23  }
  0x97   : > { %s5054_s29 = smov [#allocation15]   ;;  %s4874_s22 = scalar_lea.hbm %s6420_s6, 576 }
  0x98   : > { %s325_s13 = sshll.u32 %s5054_s29, 4  ;;  %p4875_p13 = scmp.ne.s32.totalorder %s6420_s6, %s4874_s22  ;;  %s326_s13 = int_to_ptr.vmem [resolvable:$true] %s325_s13 }
  0x99   : > { %p4881_p3 = scmp.lt.u32.totalorder %s4874_s22, %s6420_s6 }
  0x9a   : > { %p4877_p0 = pnand %p4875_p13, %p5168_p8 }
  0x9c   : > { %p4878_p1 = pneg %p4877_p0 }
  0x9e   : > { %p4883_p2 = pnand %p4881_p3, %p4878_p1 }
  0xa0   : > { %4886 = shalt.err (!%p4883_p2)
}
  0xa1   : > { %s4887_s17 = scalar_lea.vmem %s326_s13, 576  ;;  %p4895_p4 = scmp.lt.s32.totalorder %s326_s13, %s326_s13 }
  0xa2   : > { %p4888_p5 = scmp.ne.s32.totalorder %s326_s13, %s4887_s17  ;;  %p4896_p10 = scmp.lt.s32.totalorder %s4887_s17, %s4887_s17 }
  0xa4   : > { %p4890_p7 = pnand %p4888_p5, %p5168_p8  ;;  %p4897_p11 = por %p4896_p10, %p4895_p4 }
  0xa6   : > { %p4891_p9 = pneg %p4890_p7 }
  0xa8   : > { %p4898_p12 = pnand %p4897_p11, %p4891_p9 }
  0xaa   : > { %4901 = shalt.err (!%p4898_p12)
}
  0xab   : > { %s5055_s25 = smov 64   ;;  %s5056_s23 = smov 4  }
  0xac   : > { %4612 = dma.hbm_to_vmem [thread:$0]  (!%p5152_p6), %s6420_s6, 576, %s326_s13, [#allocation14], %s5055_s25, %s5055_s25, %s5056_s23  }
  0xad   : > { %s5057_s26 = smov [#allocation18]   ;;  %s4902_s22 = scalar_lea.hbm %s6422_s8, 32 }
  0xae   : > { %s350_s29 = sshll.u32 %s5057_s26, 4  ;;  %p4903_p13 = scmp.ne.s32.totalorder %s6422_s8, %s4902_s22  ;;  %s351_s29 = int_to_ptr.vmem [resolvable:$true] %s350_s29 }
  0xaf   : > { %p4909_p3 = scmp.lt.u32.totalorder %s4902_s22, %s6422_s8 }
  0xb0   : > { %p4905_p0 = pnand %p4903_p13, %p5168_p8 }
  0xb2   : > { %p4906_p1 = pneg %p4905_p0 }
  0xb4   : > { %p4911_p2 = pnand %p4909_p3, %p4906_p1 }
  0xb6   : > { %4914 = shalt.err (!%p4911_p2)
}
  0xb7   : > { %s4915_s13 = scalar_lea.vmem %s351_s29, 32  ;;  %p4923_p4 = scmp.lt.s32.totalorder %s351_s29, %s351_s29 }
  0xb8   : > { %p4916_p5 = scmp.ne.s32.totalorder %s351_s29, %s4915_s13  ;;  %p4924_p10 = scmp.lt.s32.totalorder %s4915_s13, %s4915_s13 }
  0xba   : > { %p4918_p7 = pnand %p4916_p5, %p5168_p8  ;;  %p4925_p11 = por %p4924_p10, %p4923_p4 }
  0xbc   : > { %p4919_p9 = pneg %p4918_p7 }
  0xbe   : > { %p4926_p12 = pnand %p4925_p11, %p4919_p9 }
  0xc0   : > { %4929 = shalt.err (!%p4926_p12)
}
  0xc1   : > { %4618 = dma.hbm_to_vmem [thread:$0]  (!%p5152_p6), %s6422_s8, 32, %s351_s29, [#allocation17]  }
  0xc2   : > { %s3939_s27 = sadd.s32 4294967294, %s5042_s12   ;;  %s5332_s19 = sadd.s32 1, %s5042_s12  }
  0xc3   : > { %s33_s20 = ssub.s32 %s5042_s12, %s5332_s19  ;;  %s36_s24 = sadd.s32 1, %s5038_s11 }
  0xc4   : > { %p34_p8 = scmp.eq.s32.totalorder %s33_s20, 0  ;;  %p43_p13 = scmp.ne.s32.totalorder %s5038_s11, %s5034_s10 }
  0xc5   : > { %p44_p0 = scmp.eq.s32.totalorder %s5042_s12, 0  ;;  %p49_p1 = scmp.ne.s32.totalorder %s5034_s10, %s5030_s30 }
  0xc6   : > { %s5343_s26 = scalar_select %p34_p8, %s5038_s11, %s36_s24  }
  0xc7   : > { %p5345_p3 = por %p44_p0, %p43_p13  ;;  %p6451_p2 = scmp.eq.s32.totalorder %s5136_s15, 0 }
  0xc8   : > { %p241_p5 = scmp.eq.s32.totalorder %s5136_s15, 1  ;;  %p247_p7 = scmp.eq.s32.totalorder %s3939_s27, 1 }
  0xc9   : > { %p5351_p6 = por %p6451_p2, %p49_p1  ;;  %p4635_p9 = scmp.lt.s32.totalorder %s5042_s12, 2 }
  0xca   : > { %s361_s18 = sand.u32 1, %s5038_s11   ;;  %p5358_p4 = por %p241_p5, %p43_p13 }
  0xcb   : > { %p5362_p10 = por %p247_p7, %p49_p1  ;;  %s3950_s21 = sshll.u32 %s361_s18, 8 }
  0xcc   : > { %s6453_s22 = scalar_select %p5358_p4, 1, 0 }
  0xcd   : > { %s6454_s9 = scalar_select %p5362_p10, 1, 0 }
  0xce   : > { %s4113_s28 = sshll.u32 %s5042_s12, 12  ;;  %s365_s23 = scalar_lea.vmem [#allocation4], %s3950_s21 }
  0xcf   : > { %s5370_s25 = scalar_lea.hbm %s6414_s0, %s4113_s28  ;;  %s372_s27 = sshll.u32 %s365_s23, 4  ;;  %s5372_s27 = int_to_ptr.vmem [resolvable:$true] %s372_s27 }
  0xd0   : > { %p5376_p11 = pnand %p4635_p9, %p5345_p3  ;;  %s5380_s24 = scalar_lea.sflag [#allocation5], %s361_s18 }
  0xd1   : > { %s4930_s17 = scalar_lea.hbm %s5370_s25, 4096  ;;  %s4935_s14 = scalar_lea.hbm %s6414_s0, 8192 }
  0xd2   : > { %p4931_p12 = scmp.ne.s32.totalorder %s5370_s25, %s4930_s17  ;;  %p4932_p8 = pneg %p5376_p11 }
  0xd3   : > { %p4936_p1 = scmp.lt.u32.totalorder %s5370_s25, %s6414_s0  ;;  %p4937_p3 = scmp.lt.u32.totalorder %s4935_s14, %s4930_s17 }
  0xd4   : > { %p4933_p13 = pnand %p4932_p8, %p4931_p12  ;;  %p4939_p5 = scmp.lt.u32.totalorder %s4930_s17, %s5370_s25 }
  0xd5   : > { %p4938_p2 = por %p4937_p3, %p4936_p1 }
  0xd6   : > { %p4934_p0 = pneg %p4933_p13 }
  0xd7   : > { %p4940_p7 = por %p4939_p5, %p4938_p2 }
  0xd9   : > { %p4941_p9 = pnand %p4940_p7, %p4934_p0 }
  0xdb   : > { %4944 = shalt.err (!%p4941_p9)
}
  0xdc   : > { %s4945_s18 = scalar_lea.vmem %s5372_s27, 4096  ;;  %s5058_s21 = smov [#allocation4]  }
  0xdd   : > { %p4946_p12 = scmp.ne.s32.totalorder %s5372_s27, %s4945_s18  ;;  %s4950_s28 = sshll.u32 %s5058_s21, 4  ;;  %s4951_s28 = int_to_ptr.vmem [resolvable:$false] %s4950_s28 }
  0xde   : > { %s4952_s13 = scalar_lea.vmem %s4951_s28, 8192  ;;  %p4953_p4 = scmp.lt.s32.totalorder %s5372_s27, %s4951_s28 }
  0xdf   : > { %p4948_p13 = pnand %p4946_p12, %p4932_p8  ;;  %p4954_p1 = scmp.lt.s32.totalorder %s4952_s13, %s4945_s18 }
  0xe1   : > { %p4949_p10 = pneg %p4948_p13  ;;  %p4955_p3 = por %p4954_p1, %p4953_p4 }
  0xe3   : > { %p4956_p2 = pnand %p4955_p3, %p4949_p10 }
  0xe5   : > { %4959 = shalt.err (!%p4956_p2)
}
  0xe6   : > { %s6456_s17 = smov 8   ;;  %s6457_s14 = smov 128  }
  0xe7   : > { %4622 = dma.hbm_to_vmem [thread:$0]  (!%p5376_p11), %s5370_s25, 4096, %s5372_s27, %s5380_s24, %s6457_s14, %s6457_s14, %s6456_s17  }
  0xe8   : > { %p6458_p8 = scmp.ne.s32.totalorder %s6447_s16, 0 }
  0xea   : > { %384 = sbr.rel (%p6458_p8) target bundleno = 1151 (0x47f), region = 56 }
  0xf1   : > { %s5414_s23 = sand.u32 1, %s5034_s10  }
  0xf2   : > { %s3954_s18 = sshll.u32 %s5414_s23, 8  ;;  %s387_s21 = scalar_lea.sflag [#allocation5], %s5414_s23 }
  0xf3   : > { %s5418_s28 = scalar_lea.vmem [#allocation4], %s3954_s18 }
  0xf4   : > { %5005 = dma.done.wait (%p5351_p6), %s387_s21, 4096  }
  0xf5   : > { %5007 = vsyncadd (%p5351_p6), %s387_s21, 4294963200  ;;  %p6459_p4 = scmp.eq.s32.totalorder %s5136_s15, 0 }
  0xf7   : > { %5009 = dma.done.wait (%p6459_p4), [#allocation8], 1040   ;;  %p6460_p10 = pmov %p6459_p4 }
  0xf8   : > { %p6461_p11 = pmov %p6459_p4 }
  0xf9   : > { %5011 = vsyncadd (%p6460_p10), [#allocation8], 4294966256 }
  0xfa   : > { %5013 = dma.done.wait (%p6461_p11), [#allocation11], 304   ;;  %p6462_p0 = pmov %p6459_p4 }
  0xfc   : > { %5015 = vsyncadd (%p6462_p0), [#allocation11], 4294966992  ;;  %p6463_p5 = pmov %p6462_p0 }
  0xfd   : > { %p6464_p7 = pmov %p6462_p0 }
  0xfe   : > { %5017 = dma.done.wait (%p6463_p5), [#allocation14], 592  }
  0xff   : > { %5019 = vsyncadd (%p6464_p7), [#allocation14], 4294966704  ;;  %p6465_p6 = pmov %p6462_p0 }
 0x100   : > { %p6466_p9 = pmov %p6462_p0 }
 0x101   : > { %5021 = dma.done.wait (%p6465_p6), [#allocation17], 48  }
 0x102   : > { %5023 = vsyncadd (%p6466_p9), [#allocation17], 4294967248  ;;  %v6441_v0 = vmov 0   ;;  %v5443_v1 = vld [vmem:[#allocation7 + $0x10] sm:$0xff]  ;;  %v5445_v2 = vld [vmem:[#allocation7 + $0x8] sm:$0xff]  ;;  %vm6434_vm8 = vcmask 31744  }
 0x103   : > { %4696 = vset.pattern.permute.xlu0 %v6441_v0  ;;  %4697 = vset.pattern.permute.xlu1 %v6441_v0  ;;  %v5447_v3 = vld [vmem:[#allocation7 + $0x18] sm:$0xff]  ;;  %vm712_vm0 = vcmp.ge.s32.totalorder %v5443_v1, 1  ;;  %vm711_vm1 = vcmp.ge.s32.totalorder %v5445_v2, 1  ;;  %v5452_v4 = vld [vmem:[#allocation7 + $0x20] sm:$0xff]  ;;  %v5461_v7 = vld [vmem:[#allocation7 + $0x28] sm:$0xff]  ;;  %vm6435_vm9 = vcmask 1041408  }
 0x104   : > { %735 = vperm.xlu0 %4696, %v6441_v0   ;;  %vm713_vm2 = vcmp.ge.s32.totalorder %v5447_v3, 1  ;;  %v5455_v5 = vsel %vm712_vm0, 1, %v6441_v0  ;;  %v5458_v6 = vsel %vm711_vm1, 1, %v6441_v0  ;;  %vm714_vm3 = vcmp.ge.s32.totalorder %v5452_v4, 1  ;;  %v5463_v8 = vld [vmem:[#allocation7 + $0x30] sm:$0xff]  ;;  %v5467_v9 = vld [vmem:[#allocation7 + $0x38] sm:$0xff] }
 0x105   : > { %741 = vperm.xlu1 %4697, %v5455_v5   ;;  %v5469_v10 = vld [vmem:[#allocation7] sm:$0xff]  ;;  %v5472_v11 = vsel %vm713_vm2, 1, %v6441_v0  ;;  %v5475_v12 = vsel %vm714_vm3, 1, %v6441_v0  ;;  %vm715_vm4 = vcmp.ge.s32.totalorder %v5461_v7, 1  ;;  %vm716_vm5 = vcmp.ge.s32.totalorder %v5463_v8, 1  ;;  %v3977_v15 = vld [vmem:[%s5418_s28 + $0x88] sm:$0xff] }
 0x106   : > { %vm717_vm6 = vcmp.ge.s32.totalorder %v5467_v9, 1  ;;  %vm710_vm7 = vcmp.ge.s32.totalorder %v5469_v10, 1  ;;  %v5483_v13 = vld [vmem:[#allocation9] ss:$0 sm:$0xff]  ;;  %v5488_v16 = vsel %vm715_vm4, 1, %v6441_v0  ;;  %v5491_v17 = vsel %vm716_vm5, 1, %v6441_v0 }
 0x107   : > { %v3976_v14 = vld [vmem:[%s5418_s28 + $0x80] sm:$0xff]  ;;  %v3988_v18 = vld [vmem:[%s5418_s28 + $0xd0] sm:$0xff]  ;;  %v3989_v19 = vld [vmem:[%s5418_s28 + $0xd8] sm:$0xff]  ;;  %v5496_v20 = vsel %vm717_vm6, 1, %v6441_v0  ;;  %v5499_v21 = vsel %vm710_vm7, 1, %v6441_v0  ;;  %v587_v27 = vmul.f32 %v5483_v13, %v3977_v15  ;;  %vm5060_vm10 = vmmov 0  }
 0x108   : > { %738 = vperm.xlu0 %4696, %v5458_v6   ;;  %v643_v22 = vmul.f32 %v5483_v13, %v3988_v18  ;;  %v644_v23 = vmul.f32 %v5483_v13, %v3989_v19  ;;  %v5503_v24 = vld [vmem:[#allocation10] ss:$0 sm:$0xff]  ;;  %v3978_v25 = vld [vmem:[%s5418_s28 + $0x90] sm:$0xff]  ;;  %v586_v26 = vmul.f32 %v5483_v13, %v3976_v14  ;;  %v3993_v31 = vld [vmem:[%s5418_s28 + $0xf8] sm:$0xff]  ;;  %vm5061_vm12 = vmmov 1   ;;  %s3963_s16 = sshll.u32 %s5414_s23, 6 }
 0x109   : > { %744 = vperm.xlu1 %4697, %v5472_v11   ;;  %v3992_v30 = vld [vmem:[%s5418_s28 + $0xf0] sm:$0xff]  ;;  %v588_v32 = vmul.f32 %v5483_v13, %v3978_v25  ;;  %v902_v33 = vld [vmem:[#allocation12 + $0x2] sm:$0x3]  ;;  %v648_v35 = vmul.f32 %v5483_v13, %v3993_v31  ;;  %vm862_vm11 = vmpackc.low %vm5060_vm10, %vm5060_vm10  ;;  %v602_v40 = vadd.f32 %v5503_v24, %v587_v27  ;;  %v6467_v57 = vmov 0  ;;  %s456_s29 = scalar_lea.vmem [#allocation19], %s3963_s16  ;;  %s4114_s25 = sshll.u32 %s5136_s15, 10 }
 0x10a   : > { %v658_v28 = vadd.f32 %v5503_v24, %v643_v22  ;;  %v659_v29 = vadd.f32 %v5503_v24, %v644_v23  ;;  %v647_v34 = vmul.f32 %v5483_v13, %v3992_v30  ;;  %v601_v36 = vadd.f32 %v5503_v24, %v586_v26  ;;  %4538 = vmatprep.subr.msk.bf16.mxu0 %vm6435_vm9, %v902_v33  ;;  %vm863_vm13 = vmpackc.low %vm5061_vm12, %vm5061_vm12  ;;  %v3979_v45 = vld [vmem:[%s5418_s28 + $0x98] sm:$0xff]  ;;  %v841_v52 = vld [vmem:[#allocation2 + $0x60] sm:$0xf0]  ;;  %s3790_s27 = sshll.u32 %s456_s29, 4  ;;  %s6529_s13 = sld [smem:[#allocation27_spill]]  ;;  %s6367_s27 = int_to_ptr.vmem [resolvable:$true] %s3790_s27 }
 0x10b   : > { %v932_v39 = vsel %vm6435_vm9, %v902_v33, 0  ;;  %v663_v42 = vadd.f32 %v5503_v24, %v648_v35  ;;  %v870_v44 = vsel %vm862_vm11, 65537, %v6441_v0  ;;  %v610_v47 = vmax.f32 %v602_v40, 0.0  ;;  %v3980_v54 = vld [vmem:[%s5418_s28 + $0xa0] sm:$0xff]  ;;  %v3981_v55 = vld [vmem:[%s5418_s28 + $0xa8] sm:$0xff]  ;;  %v3982_v59 = vld [vmem:[%s5418_s28 + $0xb0] sm:$0xff] }
 0x10c   : > { %747 = vperm.xlu0 %4696, %v5475_v12   ;;  %v666_v37 = vmax.f32 %v658_v28, 0.0  ;;  %v667_v38 = vmax.f32 %v659_v29, 0.0  ;;  %4211 = vmatpush3.bf16.msra.mxu0 %v932_v39  ;;  %v662_v41 = vadd.f32 %v5503_v24, %v647_v34  ;;  %v609_v43 = vmax.f32 %v601_v36, 0.0  ;;  %v3983_v60 = vld [vmem:[%s5418_s28 + $0xb8] sm:$0xff]  ;;  %v3986_v61 = vld [vmem:[%s5418_s28 + $0xc0] sm:$0xff]  ;;  %v3987_v15 = vld [vmem:[%s5418_s28 + $0xc8] sm:$0xff] }
 0x10d   : > { %750 = vperm.xlu1 %4697, %v5488_v16   ;;  %v871_v48 = vsel %vm863_vm13, 65537, %v6441_v0  ;;  %v4000_v49 = vcombine.low %v870_v44, %v870_v44  ;;  %v671_v51 = vmax.f32 %v663_v42, 0.0  ;;  %v589_v58 = vmul.f32 %v5483_v13, %v3979_v45  ;;  %v3990_v25 = vld [vmem:[%s5418_s28 + $0xe0] sm:$0xff]  ;;  %v3991_v34 = vld [vmem:[%s5418_s28 + $0xe8] sm:$0xff]  ;;  %v3968_v45 = vld [vmem:[%s5418_s28 + $0x50] sm:$0xff]  ;;  %s3777_s15 = scalar_lea.sflag [#allocation6], %s5414_s23 }
 0x10e   : > { %v673_v46 = vpack.c.bf16 %v667_v38, %v666_v37  ;;  %v670_v50 = vmax.f32 %v662_v41, 0.0  ;;  %v4001_v53 = vcombine.low %v871_v48, %v871_v48  ;;  %v617_v56 = vpack.c.bf16 %v610_v47, %v609_v43  ;;  %v3664_v63 = vld [vmem:[#allocation18] sm:$0x3]  ;;  %s4960_s14 = scalar_lea.vmem %s6367_s27, 1024  ;;  %p6530_p13 = scmp.ne.s32.totalorder %s6453_s22, 0 }
 0x10f   : > { %vm5531_vm14 = vcmp.ne.s16.totalorder %v4000_v49, 0  ;;  %v603_v14 = vadd.f32 %v5503_v24, %v588_v32  ;;  %vm908_vm0 = vcmask 1043456   ;;  %v604_v19 = vadd.f32 %v5503_v24, %v589_v58  ;;  %p4961_p12 = scmp.ne.s32.totalorder %s6367_s27, %s4960_s14  ;;  %s5062_s18 = smov [#allocation19]  }
 0x110   : > { %753 = vperm.xlu0 %4696, %v5491_v17   ;;  %677 = vst.msk [vmem:[#allocation2 + $0xa0] sm:$0xff] %vm6434_vm8, %v673_v46  ;;  %v6468_v57 = vsel %vm5531_vm14, 4294967295, %v6467_v57  ;;  %v675_v62 = vpack.c.bf16 %v671_v51, %v670_v50  ;;  %vm5539_vm15 = vcmp.ne.s16.totalorder %v4001_v53, 0  ;;  %621 = vst.msk [vmem:[#allocation2 + $0x68] sm:$0xff] %vm6434_vm8, %v617_v56  ;;  %v896_v18 = vsel %vm5531_vm14, %v841_v52, 0  ;;  %v3969_v46 = vld [vmem:[%s5418_s28 + $0x58] sm:$0xff]  ;;  %s6365_s17 = scalar_lea.hbm %s6529_s13, %s4114_s25 }
 0x111   : > { %756 = vperm.xlu1 %4697, %v5496_v20   ;;  %6469 = vst [vmem:[#allocation26_spill] sm:$0xff] %v6468_v57  ;;  %v590_v22 = vmul.f32 %v5483_v13, %v3980_v54  ;;  %v591_v23 = vmul.f32 %v5483_v13, %v3981_v55  ;;  %v611_v26 = vmax.f32 %v603_v14, 0.0  ;;  %v592_v27 = vmul.f32 %v5483_v13, %v3982_v59  ;;  %p4962_p1 = pnand %p4961_p12, %p6530_p13  ;;  %s4964_s21 = sshll.u32 %s5062_s18, 4  ;;  %s4965_s21 = int_to_ptr.vmem [resolvable:$false] %s4964_s21 }
 0x112   : > { %679 = vst.msk [vmem:[#allocation2 + $0xb0] sm:$0xff] %vm6434_vm8, %v675_v62  ;;  %v593_v28 = vmul.f32 %v5483_v13, %v3983_v60  ;;  %v641_v29 = vmul.f32 %v5483_v13, %v3986_v61  ;;  %v612_v30 = vmax.f32 %v604_v19, 0.0  ;;  %v642_v33 = vmul.f32 %v5483_v13, %v3987_v15  ;;  %v840_v15 = vld [vmem:[#allocation12] sm:$0x3]  ;;  %p4967_p2 = scmp.lt.s32.totalorder %s6367_s27, %s4965_s21 }
 0x113   : > { %v605_v31 = vadd.f32 %v5503_v24, %v590_v22  ;;  %v606_v32 = vadd.f32 %v5503_v24, %v591_v23  ;;  %v607_v35 = vadd.f32 %v5503_v24, %v592_v27  ;;  %v645_v38 = vmul.f32 %v5483_v13, %v3990_v25  ;;  %4539 = vmatprep.subr.msk.bf16.mxu0 %vm6435_vm9, %v840_v15  ;;  %p4963_p3 = pneg %p4962_p1 }
 0x114   : > { %1248 = vperm.xlu0 %4696, %v5499_v21   ;;  %v608_v36 = vadd.f32 %v5503_v24, %v593_v28  ;;  %v656_v37 = vadd.f32 %v5503_v24, %v641_v29  ;;  %v618_v39 = vpack.c.bf16 %v612_v30, %v611_v26  ;;  %v657_v42 = vadd.f32 %v5503_v24, %v642_v33  ;;  %v3972_v29 = vld [vmem:[%s5418_s28 + $0x70] sm:$0xff]  ;;  %v3973_v30 = vld [vmem:[%s5418_s28 + $0x78] sm:$0xff] }
 0x115   : > { %1251 = vperm.xlu1 %4697, %v5458_v6   ;;  %v613_v40 = vmax.f32 %v605_v31, 0.0  ;;  %v614_v41 = vmax.f32 %v606_v32, 0.0  ;;  %v615_v43 = vmax.f32 %v607_v35, 0.0  ;;  %v646_v48 = vmul.f32 %v5483_v13, %v3991_v34  ;;  %v3966_v35 = vld [vmem:[%s5418_s28 + $0x40] sm:$0xff] }
 0x116   : > { %v616_v44 = vmax.f32 %v608_v36, 0.0  ;;  %v664_v47 = vmax.f32 %v656_v37, 0.0  ;;  %622 = vst.msk [vmem:[#allocation2 + $0x70] sm:$0xff] %vm6434_vm8, %v618_v39  ;;  %v533_v50 = vmul.f32 %v5483_v13, %v3968_v45  ;;  %v534_v51 = vmul.f32 %v5483_v13, %v3969_v46  ;;  %v3967_v36 = vld [vmem:[%s5418_s28 + $0x48] sm:$0xff] }
 0x117   : > { %v619_v49 = vpack.c.bf16 %v614_v41, %v613_v40  ;;  %v665_v52 = vmax.f32 %v657_v42, 0.0  ;;  %v5575_v53 = vld [vmem:[#allocation2 + $0x68] sm:$0xff]  ;;  %v909_v54 = vrot.slane %v896_v18, 4  ;;  %v660_v56 = vadd.f32 %v5503_v24, %v645_v38 }
 0x118   : > { %1254 = vperm.xlu0 %4696, %v5455_v5   ;;  %v620_v55 = vpack.c.bf16 %v616_v44, %v615_v43  ;;  %v661_v58 = vadd.f32 %v5503_v24, %v646_v48  ;;  %v897_v59 = vsel %vm5539_vm15, %v5575_v53, 0  ;;  %v548_v60 = vadd.f32 %v5503_v24, %v533_v50 }
 0x119   : > { %1257 = vperm.xlu1 %4697, %v5472_v11   ;;  %623 = vst.msk [vmem:[#allocation2 + $0x78] sm:$0xff] %vm6434_vm8, %v619_v49  ;;  %v549_v61 = vadd.f32 %v5503_v24, %v534_v51  ;;  %v672_v62 = vpack.c.bf16 %v665_v52, %v664_v47  ;;  %v910_v14 = vrot.slane %v897_v59, 4  ;;  %v668_v18 = vmax.f32 %v660_v56, 0.0 }
 0x11a   : > { %624 = vst.msk [vmem:[#allocation2 + $0x80] sm:$0xff] %vm6434_vm8, %v620_v55  ;;  %v669_v19 = vmax.f32 %v661_v58, 0.0  ;;  %vm2246_vm1 = vcmp.le.s32.totalorder %v5445_v2, 6  ;;  %vm2247_vm2 = vcmp.le.s32.totalorder %v5443_v1, 6  ;;  %v556_v22 = vmax.f32 %v548_v60, 0.0 }
 0x11b   : > { %v557_v23 = vmax.f32 %v549_v61, 0.0  ;;  %676 = vst.msk [vmem:[#allocation2 + $0x98] sm:$0xff] %vm6434_vm8, %v672_v62  ;;  %vm2248_vm3 = vcmp.le.s32.totalorder %v5447_v3, 6  ;;  %vm2249_vm4 = vcmp.le.s32.totalorder %v5452_v4, 6  ;;  %v911_v25 = vsel %vm908_vm0, %v909_v54, %v910_v14  ;;  %v5658_v62 = vld [vmem:[#allocation12 + $0x4] sm:$0x3] }
 0x11c   : > { %1260 = vperm.xlu0 %4696, %v5475_v12   ;;  %v674_v26 = vpack.c.bf16 %v669_v19, %v668_v18  ;;  %v5598_v2 = vsel %vm2246_vm1, 1, %v6441_v0  ;;  %v5601_v27 = vsel %vm2247_vm2, 1, %v6441_v0  ;;  %4212 = vmatprep.mubr.msk.bf16.mxu0 %vm6434_vm8, %v911_v25  ;;  %v5608_v4 = vsel %vm2248_vm3, 1, %v6441_v0 }
 0x11d   : > { %1263 = vperm.xlu1 %4697, %v5488_v16   ;;  %v563_v1 = vpack.c.bf16 %v557_v23, %v556_v22  ;;  %v5604_v3 = vld [vmem:[#allocation2 + $0x70] sm:$0xff]  ;;  %vm2250_vm5 = vcmp.le.s32.totalorder %v5461_v7, 6  ;;  %v537_v33 = vmul.f32 %v5483_v13, %v3972_v29  ;;  %v538_v34 = vmul.f32 %v5483_v13, %v3973_v30 }
 0x11e   : > { %678 = vst.msk [vmem:[#allocation2 + $0xa8] sm:$0xff] %vm6434_vm8, %v674_v26  ;;  %v898_v28 = vsel %vm5539_vm15, %v5604_v3, 0  ;;  %v1057_v37 = vsel %vm6435_vm9, %v840_v15, 0  ;;  %v531_v40 = vmul.f32 %v5483_v13, %v3966_v35  ;;  %v532_v41 = vmul.f32 %v5483_v13, %v3967_v36  ;;  %v465_v35 = vld [vmem:[%s5418_s28 + $0x28] sm:$0xff] }
 0x11f   : > { %567 = vst.msk [vmem:[#allocation2 + $0x40] sm:$0xff] %vm6434_vm8, %v563_v1  ;;  %v912_v31 = vrot.slane %v898_v28, 4  ;;  %v552_v45 = vadd.f32 %v5503_v24, %v537_v33  ;;  %vm2251_vm6 = vcmp.le.s32.totalorder %v5463_v8, 6  ;;  %v553_v46 = vadd.f32 %v5503_v24, %v538_v34  ;;  %v464_v34 = vld [vmem:[%s5418_s28 + $0x20] sm:$0xff] }
 0x120   : > { %1266 = vperm.xlu0 %4696, %v5491_v17   ;;  %v5620_v32 = vld [vmem:[#allocation2 + $0x78] sm:$0xff]  ;;  %v546_v47 = vadd.f32 %v5503_v24, %v531_v40  ;;  %v547_v48 = vadd.f32 %v5503_v24, %v532_v41  ;;  %v2266_v55 = vsel %vm2250_vm5, 1, %v6441_v0  ;;  %v2267_v56 = vsel %vm2251_vm6, 1, %v6441_v0 }
 0x121   : > { %1269 = vperm.xlu1 %4697, %v5496_v20   ;;  %v5611_v20 = vsel %vm2249_vm4, 1, %v6441_v0  ;;  %v899_v38 = vsel %vm5539_vm15, %v5620_v32, 0  ;;  %v845_v39 = vld [vmem:[#allocation2 + $0x80] sm:$0xf]  ;;  %v913_v42 = vsel %vm908_vm0, %v910_v14, %v912_v31  ;;  %v560_v51 = vmax.f32 %v552_v45, 0.0 }
 0x122   : > { %v914_v43 = vrot.slane %v899_v38, 4  ;;  %v900_v44 = vsel %vm5539_vm15, %v845_v39, 0  ;;  %4213 = vmatmul.mubr.msk.bf16.vlgmr.msra.gmra.mrb[0].mxu0 %vm6434_vm8, %v913_v42  ;;  %v561_v52 = vmax.f32 %v553_v46, 0.0  ;;  %v554_v54 = vmax.f32 %v546_v47, 0.0  ;;  %v466_v38 = vld [vmem:[%s5418_s28 + $0x30] sm:$0xff]  ;;  %v467_v39 = vld [vmem:[%s5418_s28 + $0x38] sm:$0xff] }
 0x123   : > { %4221 = vmatpush3.bf16.msra.mxu0 %v1057_v37  ;;  %v916_v50 = vrot.slane %v900_v44, 4  ;;  %v555_v8 = vmax.f32 %v547_v48, 0.0  ;;  %vm2252_vm7 = vcmp.le.s32.totalorder %v5467_v9, 6  ;;  %vm2245_vm10 = vcmp.le.s32.totalorder %v5469_v10, 6  ;;  %v3970_v9 = vld [vmem:[%s5418_s28 + $0x60] sm:$0xff]  ;;  %v3971_v10 = vld [vmem:[%s5418_s28 + $0x68] sm:$0xff] }
 0x124   : > { %2270 = vperm.xlu0 %4696, %v6441_v0   ;;  %v915_v49 = vsel %vm908_vm0, %v912_v31, %v914_v43  ;;  %v565_v58 = vpack.c.bf16 %v561_v52, %v560_v51  ;;  %v2268_v7 = vsel %vm2252_vm7, 1, %v6441_v0  ;;  %v2736_v61 = vsel %vm2245_vm10, 1, %v6441_v0  ;;  %4540 = vmatprep.subr.msk.bf16.mxu0 %vm6435_vm9, %v5658_v62 }
 0x125   : > { %2273 = vperm.xlu1 %4697, %v5598_v2   ;;  %4216 = vmatprep.mubr.msk.bf16.mxu0 %vm6434_vm8, %v915_v49  ;;  %v562_v59 = vpack.c.bf16 %v555_v8, %v554_v54  ;;  %v917_v60 = vsel %vm908_vm0, %v914_v43, %v916_v50  ;;  %v535_v14 = vmul.f32 %v5483_v13, %v3970_v9 }
 0x126   : > { %569 = vst.msk [vmem:[#allocation2 + $0x50] sm:$0xff] %vm6434_vm8, %v565_v58  ;;  %v536_v15 = vmul.f32 %v5483_v13, %v3971_v10 }
 0x127   : > { %566 = vst.msk [vmem:[#allocation2 + $0x38] sm:$0xff] %vm6434_vm8, %v562_v59  ;;  %v550_v18 = vadd.f32 %v5503_v24, %v535_v14 }
 0x128   : > { %2276 = vperm.xlu0 %4696, %v5601_v27   ;;  %v551_v19 = vadd.f32 %v5503_v24, %v536_v15 }
 0x129   : > { %2279 = vperm.xlu1 %4697, %v5608_v4   ;;  %v558_v22 = vmax.f32 %v550_v18, 0.0 }
 0x12a   : > { %4217 = vmatmul.mubr.msk.bf16.gmra.mrb[4].mxu0 %vm6434_vm8, %v917_v60  ;;  %v559_v23 = vmax.f32 %v551_v19, 0.0 }
 0x12c   : > { %2282 = vperm.xlu0 %4696, %v5611_v20   ;;  %v564_v25 = vpack.c.bf16 %v559_v23, %v558_v22 }
 0x12d   : > { %2285 = vperm.xlu1 %4697, %v2266_v55  }
 0x12e   : > { %568 = vst.msk [vmem:[#allocation2 + $0x48] sm:$0xff] %vm6434_vm8, %v564_v25 }
 0x130   : > { %2288 = vperm.xlu0 %4696, %v2267_v56  }
 0x131   : > { %2291 = vperm.xlu1 %4697, %v2268_v7  }
 0x134   : > { %2745 = vperm.xlu0 %4696, %v2736_v61  }
 0x135   : > { %2748 = vperm.xlu1 %4697, %v5598_v2  }
 0x138   : > { %2751 = vperm.xlu0 %4696, %v5601_v27  }
 0x139   : > { %2754 = vperm.xlu1 %4697, %v5608_v4  }
 0x13c   : > { %2757 = vperm.xlu0 %4696, %v5611_v20  }
 0x13d   : > { %2760 = vperm.xlu1 %4697, %v2266_v55  }
 0x140   : > { %2763 = vperm.xlu0 %4696, %v2267_v56  }
 0x141   : > { %2766 = vperm.xlu1 %4697, %v2268_v7  }
 0x144   : > { %2998 = vperm.xlu0 %4696, %v5499_v21   ;;  %v462_v21 = vld [vmem:[%s5418_s28 + $0x10] sm:$0xff] }
 0x145   : > { %3001 = vperm.xlu1 %4697, %v5458_v6   ;;  %v461_v6 = vld [vmem:[%s5418_s28 + $0x8] sm:$0xff] }
 0x148   : > { %3004 = vperm.xlu0 %4696, %v5455_v5   ;;  %v460_v5 = vld [vmem:[%s5418_s28] sm:$0xff] }
 0x149   : > { %3007 = vperm.xlu1 %4697, %v5472_v11   ;;  %v3964_v11 = vld [vmem:[#allocation9] ss:$0 sm:$0xff] }
 0x14a   : > { %v475_v13 = vmul.f32 %v3964_v11, %v460_v5  ;;  %v477_v24 = vmul.f32 %v3964_v11, %v462_v21  ;;  %v479_v36 = vmul.f32 %v3964_v11, %v464_v34  ;;  %v480_v37 = vmul.f32 %v3964_v11, %v465_v35 }
 0x14b   : > { %v481_v40 = vmul.f32 %v3964_v11, %v466_v38  ;;  %v482_v41 = vmul.f32 %v3964_v11, %v467_v39  ;;  %v5722_v39 = vld [vmem:[#allocation2 + $0xa0] sm:$0xff] }
 0x14c   : > { %3010 = vperm.xlu0 %4696, %v5475_v12   ;;  %v476_v12 = vmul.f32 %v3964_v11, %v461_v6 }
 0x14d   : > { %3013 = vperm.xlu1 %4697, %v5488_v16   ;;  %v463_v16 = vld [vmem:[%s5418_s28 + $0x18] sm:$0xff] }
 0x14e   : > { %v478_v26 = vmul.f32 %v3964_v11, %v463_v16 }
 0x150   : > { %3016 = vperm.xlu0 %4696, %v5491_v17   ;;  %v3965_v17 = vld [vmem:[#allocation10] ss:$0 sm:$0xff] }
 0x151   : > { %3019 = vperm.xlu1 %4697, %v6441_v0   ;;  %v490_v1 = vadd.f32 %v3965_v17, %v475_v13  ;;  %v494_v42 = vadd.f32 %v3965_v17, %v479_v36  ;;  %v495_v43 = vadd.f32 %v3965_v17, %v480_v37  ;;  %v496_v44 = vadd.f32 %v3965_v17, %v481_v40 }
 0x152   : > { %v497_v45 = vadd.f32 %v3965_v17, %v482_v41 }
 0x153   : > { %v502_v46 = vmax.f32 %v494_v42, 0.0  ;;  %v503_v47 = vmax.f32 %v495_v43, 0.0  ;;  %v504_v48 = vmax.f32 %v496_v44, 0.0 }
 0x154   : > { %3414 = vperm.xlu0 %4696, %v2736_v61   ;;  %v505_v49 = vmax.f32 %v497_v45, 0.0 }
 0x155   : > { %3417 = vperm.xlu1 %4697, %v5598_v2   ;;  %v491_v2 = vadd.f32 %v3965_v17, %v476_v12  ;;  %v508_v50 = vpack.c.bf16 %v503_v47, %v502_v46 }
 0x156   : > { %v509_v51 = vpack.c.bf16 %v505_v49, %v504_v48 }
 0x157   : > { %v499_v28 = vmax.f32 %v491_v2, 0.0  ;;  %513 = vst.msk [vmem:[#allocation2 + $0x18] sm:$0xff] %vm6434_vm8, %v508_v50 }
 0x158   : > { %3420 = vperm.xlu0 %4696, %v5601_v27   ;;  %v492_v27 = vadd.f32 %v3965_v17, %v477_v24  ;;  %514 = vst.msk [vmem:[#allocation2 + $0x20] sm:$0xff] %vm6434_vm8, %v509_v51 }
 0x159   : > { %3423 = vperm.xlu1 %4697, %v5608_v4   ;;  %v493_v4 = vadd.f32 %v3965_v17, %v478_v26 }
 0x15a   : > { %v500_v29 = vmax.f32 %v492_v27, 0.0 }
 0x15b   : > { %v501_v30 = vmax.f32 %v493_v4, 0.0 }
 0x15c   : > { %3426 = vperm.xlu0 %4696, %v5611_v20   ;;  %v498_v20 = vmax.f32 %v490_v1, 0.0  ;;  %v697_v1 = vld [vmem:[#allocation2 + $0x90] sm:$0xf8] }
 0x15d   : > { %3429 = vperm.xlu1 %4697, %v2266_v55   ;;  %v507_v33 = vpack.c.bf16 %v501_v30, %v500_v29 }
 0x15e   : > { %v506_v31 = vpack.c.bf16 %v499_v28, %v498_v20 }
 0x15f   : > { %512 = vst.msk [vmem:[#allocation2 + $0x10] sm:$0xff] %vm6434_vm8, %v507_v33 }
 0x160   : > { %3432 = vperm.xlu0 %4696, %v2267_v56   ;;  %511 = vst.msk [vmem:[#allocation2 + $0x8] sm:$0xff] %vm6434_vm8, %v506_v31  ;;  %v5714_v31 = vld [vmem:[#allocation2 + $0x98] sm:$0xff] }
 0x161   : > { %3435 = vperm.xlu1 %4697, %v6441_v0  }
 0x183   : > { %v736_v52 = vpop.permute.xlu0 %735 }
 0x184   : > { %vm758_vm11 = vcmp.eq.s32.totalorder %v736_v52, 1  ;;  %v742_v54 = vpop.permute.xlu1 %741 }
 0x185   : > { %vm766_vm12 = vmpackc.low %vm758_vm11, %vm758_vm11  ;;  %vm760_vm13 = vcmp.eq.s32.totalorder %v742_v54, 1 }
 0x186   : > { %v774_v55 = vsel %vm766_vm12, 65537, %v6441_v0  ;;  %vm768_vm3 = vmpackc.low %vm760_vm13, %vm760_vm13 }
 0x187   : > { %v739_v8 = vpop.permute.xlu0 %738  ;;  %v776_v7 = vsel %vm768_vm3, 65537, %v6441_v0 }
 0x188   : > { %vm759_vm1 = vcmp.eq.s32.totalorder %v739_v8, 1  ;;  %v745_v58 = vpop.permute.xlu1 %744 }
 0x189   : > { %vm767_vm2 = vmpackc.low %vm759_vm1, %vm759_vm1  ;;  %vm761_vm4 = vcmp.eq.s32.totalorder %v745_v58, 1  ;;  %vm6432_vm1 = vsmask.f32 3328 }
 0x18a   : > { %v775_v56 = vsel %vm767_vm2, 65537, %v6441_v0  ;;  %vm769_vm6 = vmpackc.low %vm761_vm4, %vm761_vm4 }
 0x18b   : > { %v748_v59 = vpop.permute.xlu0 %747  ;;  %v3996_v60 = vcombine.low %v774_v55, %v775_v56  ;;  %v777_v10 = vsel %vm769_vm6, 65537, %v6441_v0 }
 0x18c   : > { %vm762_vm5 = vcmp.eq.s32.totalorder %v748_v59, 1  ;;  %v3997_v14 = vcombine.low %v776_v7, %v777_v10  ;;  %v751_v15 = vpop.permute.xlu1 %750 }
 0x18d   : > { %v796_v61 = vshrl.u32 %v3996_v60, 16  ;;  %v799_v9 = vshll.u32 %v3996_v60, 16  ;;  %vm770_vm7 = vmpackc.low %vm762_vm5, %vm762_vm5  ;;  %vm763_vm10 = vcmp.eq.s32.totalorder %v751_v15, 1 }
 0x18e   : > { %v804_v23 = vshrl.u32 %v3997_v14, 16  ;;  %v807_v25 = vshll.u32 %v3997_v14, 16  ;;  %vm771_vm12 = vmpackc.low %vm763_vm10, %vm763_vm10  ;;  %v778_v6 = vsel %vm770_vm7, 65537, %v6441_v0 }
 0x18f   : > { %v754_v18 = vpop.permute.xlu0 %753  ;;  %v798_v19 = vrot.slane %v796_v61, 4  ;;  %v801_v22 = vrot.slane %v799_v9, 5  ;;  %v779_v11 = vsel %vm771_vm12, 65537, %v6441_v0  ;;  %v5738_v9 = vld [vmem:[#allocation2 + $0xa8] sm:$0xff] }
 0x190   : > { %vm764_vm11 = vcmp.eq.s32.totalorder %v754_v18, 1  ;;  %v806_v13 = vrot.slane %v804_v23, 4  ;;  %v809_v12 = vrot.slane %v807_v25, 5  ;;  %v3998_v21 = vcombine.low %v778_v6, %v779_v11  ;;  %v757_v16 = vpop.permute.xlu1 %756 }
 0x191   : > { %v5703_v5 = vor.u32 %v801_v22, %v798_v19  ;;  %vm772_vm13 = vmpackc.low %vm764_vm11, %vm764_vm11  ;;  %vm765_vm2 = vcmp.eq.s32.totalorder %v757_v16, 1  ;;  %v1159_v23 = vsel %vm6435_vm9, %v5658_v62, 0  ;;  %v1128_v22 = vsel %vm5539_vm15, %v5738_v9, 0 }
 0x192   : > { %v810_v17 = vor.u32 %v809_v12, %v806_v13  ;;  %v813_v24 = vshrl.u32 %v3998_v21, 16  ;;  %vm773_vm3 = vmpackc.low %vm765_vm2, %vm765_vm2  ;;  %v816_v2 = vshll.u32 %v3998_v21, 16  ;;  %v780_v27 = vsel %vm772_vm13, 65537, %v6441_v0  ;;  %v5753_v21 = vld [vmem:[#allocation2 + $0xb0] sm:$0xf] }
 0x193   : > { %v1249_v26 = vpop.permute.xlu0 %1248  ;;  %vm830_vm4 = vcmp.ne.s16.totalorder %v5703_v5, 0  ;;  %v781_v4 = vsel %vm773_vm3, 65537, %v6441_v0 }
 0x194   : > { %v5712_v20 = vsel %vm6432_vm1, %v5703_v5, %v810_v17  ;;  %v815_v28 = vrot.slane %v813_v24, 4  ;;  %v3999_v29 = vcombine.low %v780_v27, %v781_v4  ;;  %v1252_v30 = vpop.permute.xlu1 %1251  ;;  %v818_v33 = vrot.slane %v816_v2, 5 }
 0x195   : > { %vm6431_vm5 = vcmp.ne.s16.totalorder %v5712_v20, 0  ;;  %v835_v34 = vsel %vm830_vm4, %v697_v1, 0  ;;  %vm1272_vm7 = vcmp.eq.s32.totalorder %v1252_v30, 1  ;;  %vm1271_vm10 = vcmp.eq.s32.totalorder %v1249_v26, 1  ;;  %v1124_v30 = vld [vmem:[#allocation2 + $0x90] sm:$0xf0] }
 0x196   : > { %v822_v35 = vshrl.u32 %v3999_v29, 16  ;;  %v825_v36 = vshll.u32 %v3999_v29, 16  ;;  %v819_v37 = vor.u32 %v818_v33, %v815_v28  ;;  %v836_v38 = vsel %vm6431_vm5, %v5714_v31, 0  ;;  %vm1280_vm12 = vmpackc.low %vm1272_vm7, %vm1272_vm7 }
 0x197   : > { %v1255_v42 = vpop.permute.xlu0 %1254  ;;  %v1001_v45 = vshrl.u32 %v835_v34, 16  ;;  %v1004_v46 = vshll.u32 %v835_v34, 16  ;;  %v1009_v48 = vshrl.u32 %v836_v38, 16  ;;  %v1012_v54 = vshll.u32 %v836_v38, 16  ;;  %vm1279_vm2 = vmpackc.low %vm1271_vm10, %vm1271_vm10 }
 0x198   : > { %v824_v40 = vrot.slane %v822_v35, 4  ;;  %v827_v41 = vrot.slane %v825_v36, 5  ;;  %v1258_v43 = vpop.permute.xlu1 %1257  ;;  %v5725_v44 = vsel %vm6432_vm1, %v810_v17, %v819_v37  ;;  %vm1273_vm3 = vcmp.eq.s32.totalorder %v1255_v42, 1  ;;  %v5758_v17 = vld [vmem:[#allocation12 + $0x6] sm:$0x3] }
 0x199   : > { %vm6430_vm6 = vcmp.ne.s16.totalorder %v5725_v44, 0  ;;  %v1003_v55 = vrot.slane %v1001_v45, 3  ;;  %v1006_v56 = vrot.slane %v1004_v46, 4  ;;  %vm1274_vm11 = vcmp.eq.s32.totalorder %v1258_v43, 1 }
 0x19a   : > { %v5728_v47 = vor.u32 %v827_v41, %v824_v40  ;;  %v837_v49 = vsel %vm6430_vm6, %v5722_v39, 0  ;;  %v1011_v7 = vrot.slane %v1009_v48, 3  ;;  %v1014_v61 = vrot.slane %v1012_v54, 4  ;;  %vm1282_vm6 = vmpackc.low %vm1274_vm11, %vm1274_vm11 }
 0x19b   : > { %v1018_v50 = vshrl.u32 %v837_v49, 16  ;;  %v1021_v51 = vshll.u32 %v837_v49, 16  ;;  %v1261_v60 = vpop.permute.xlu0 %1260  ;;  %vm999_vm5 = vsmask.f32 4352  ;;  %v1288_v14 = vsel %vm1280_vm12, 65537, %v6441_v0 }
 0x19c   : > { %v1264_v52 = vpop.permute.xlu1 %1263  ;;  %v5735_v8 = vsel %vm6432_vm1, %v819_v37, %v5728_v47  ;;  %v1007_v15 = vor.u32 %v1006_v56, %v1003_v55  ;;  %v1015_v18 = vor.u32 %v1014_v61, %v1011_v7  ;;  %vm5741_vm1 = vmpackc.low %vm1273_vm3, %vm1273_vm3  ;;  %v1287_v6 = vsel %vm1279_vm2, 65537, %v6441_v0 }
 0x19d   : > { %v1020_v58 = vrot.slane %v1018_v50, 3  ;;  %v1023_v59 = vrot.slane %v1021_v51, 4  ;;  %vm6433_vm13 = vcmp.ne.s16.totalorder %v5735_v8, 0  ;;  %vm1276_vm7 = vcmp.eq.s32.totalorder %v1264_v52, 1 }
 0x19e   : > { %v838_v25 = vsel %vm6433_vm13, %v5738_v9, 0  ;;  %v1290_v11 = vsel %vm1282_vm6, 65537, %v6441_v0  ;;  %vm1275_vm10 = vcmp.eq.s32.totalorder %v1261_v60, 1  ;;  %v1016_v12 = vsel %vm999_vm5, %v1007_v15, %v1015_v18  ;;  %vm1284_vm6 = vmpackc.low %vm1276_vm7, %vm1276_vm7 }
 0x19f   : > { %v1024_v10 = vor.u32 %v1023_v59, %v1020_v58  ;;  %v1267_v13 = vpop.permute.xlu0 %1266  ;;  %vm834_vm11 = vcmp.ne.s16.totalorder %v5728_v47, 0  ;;  %v4017_v16 = vcombine.low %v1287_v6, %v1288_v14  ;;  %4222 = vmatprep.mubr.msk.bf16.mxu0 %vm6434_vm8, %v1016_v12  ;;  %v1289_v24 = vsel %vm5741_vm1, 65537, %v6441_v0  ;;  %vm1283_vm2 = vmpackc.low %vm1275_vm10, %vm1275_vm10 }
 0x1a0   : > { %v1270_v19 = vpop.permute.xlu1 %1269  ;;  %v1027_v26 = vshrl.u32 %v838_v25, 16  ;;  %v4018_v1 = vcombine.low %v1289_v24, %v1290_v11  ;;  %vm1277_vm3 = vcmp.eq.s32.totalorder %v1267_v13, 1  ;;  %v839_v2 = vsel %vm834_vm11, %v5753_v21, 0  ;;  %v5798_v11 = vld [vmem:[#allocation2 + $0x38] sm:$0xff] }
 0x1a1   : > { %vm1278_vm12 = vcmp.eq.s32.totalorder %v1270_v19, 1  ;;  %v1025_v62 = vsel %vm999_vm5, %v1015_v18, %v1024_v10  ;;  %v1030_v27 = vshll.u32 %v838_v25, 16  ;;  %v1309_v4 = vshll.u32 %v4017_v16, 16  ;;  %vm1285_vm1 = vmpackc.low %vm1277_vm3, %vm1277_vm3 }
 0x1a2   : > { %4223 = vmatmul.mubr.msk.bf16.vlgmr.msra.gmra.mrb[0].mxu0 %vm6434_vm8, %v1025_v62  ;;  %vm1286_vm13 = vmpackc.low %vm1278_vm12, %vm1278_vm12  ;;  %v1292_v28 = vsel %vm1284_vm6, 65537, %v6441_v0  ;;  %v1029_v29 = vrot.slane %v1027_v26, 3  ;;  %v1316_v33 = vshll.u32 %v4018_v1, 16  ;;  %v1291_v34 = vsel %vm1283_vm2, 65537, %v6441_v0 }
 0x1a3   : > { %4231 = vmatpush3.bf16.msra.mxu0 %v1159_v23  ;;  %v1294_v35 = vsel %vm1286_vm13, 65537, %v6441_v0  ;;  %v1036_v36 = vshrl.u32 %v839_v2, 16  ;;  %v4019_v37 = vcombine.low %v1291_v34, %v1292_v28  ;;  %v1032_v38 = vrot.slane %v1030_v27, 4 }
 0x1a4   : > { %4541 = vmatprep.subr.msk.bf16.mxu0 %vm6435_vm9, %v5758_v17  ;;  %v5774_v40 = vrot.slane %v1309_v4, 1  ;;  %v1293_v41 = vsel %vm1285_vm1, 65537, %v6441_v0  ;;  %v1125_v42 = vsel %vm5531_vm14, %v1124_v30, 0  ;;  %v1126_v43 = vsel %vm5539_vm15, %v5714_v31, 0 }
 0x1a5   : > { %vm6436_vm7 = vsmask.f32 7424  ;;  %v4020_v45 = vcombine.low %v1293_v41, %v1294_v35  ;;  %v1033_v46 = vor.u32 %v1032_v38, %v1029_v29  ;;  %v1312_v48 = vshrl.u32 %v4017_v16, 16  ;;  %v1481_v35 = vld [vmem:[#allocation12 + $0x8] sm:$0x3] }
 0x1a6   : > { %v1318_v49 = vrot.slane %v1316_v33, 1  ;;  %v1038_v50 = vrot.slane %v1036_v36, 3  ;;  %v1039_v51 = vshll.u32 %v839_v2, 16  ;;  %v1324_v52 = vshll.u32 %v4019_v37, 16  ;;  %v5811_v2 = vld [vmem:[#allocation2 + $0x40] sm:$0xff]  ;;  %v5824_v36 = vld [vmem:[#allocation2 + $0x48] sm:$0xff] }
 0x1a7   : > { %v1034_v54 = vsel %vm999_vm5, %v1024_v10, %v1033_v46  ;;  %v1137_v55 = vrot.slane %v1125_v42, 4  ;;  %v1138_v56 = vrot.slane %v1126_v43, 4  ;;  %v1314_v58 = vor.u32 %v1312_v48, %v5774_v40  ;;  %v5837_v48 = vld [vmem:[#allocation2 + $0x50] sm:$0xff] }
 0x1a8   : > { %4226 = vmatprep.mubr.msk.bf16.mxu0 %vm6434_vm8, %v1034_v54  ;;  %v1041_v59 = vrot.slane %v1039_v51, 4  ;;  %v1332_v60 = vshll.u32 %v4020_v45, 16  ;;  %v1320_v14 = vshrl.u32 %v4018_v1, 16  ;;  %v1326_v15 = vrot.slane %v1324_v52, 1  ;;  %v1234_v1 = vld [vmem:[#allocation2 + $0x30] sm:$0x80] }
 0x1a9   : > { %v5786_v7 = vsel %vm6436_vm7, %v1314_v58, %v1318_v49  ;;  %v1139_v18 = vsel %vm908_vm0, %v1137_v55, %v1138_v56  ;;  %v1127_v10 = vsel %vm5539_vm15, %v5722_v39, 0  ;;  %v1328_v25 = vshrl.u32 %v4019_v37, 16 }
 0x1aa   : > { %v1042_v61 = vor.u32 %v1041_v59, %v1038_v50  ;;  %v1322_v23 = vor.u32 %v1320_v14, %v1318_v49  ;;  %vm6445_vm13 = vcmp.ne.s16.totalorder %v5786_v7, 0  ;;  %v1334_v6 = vrot.slane %v1332_v60, 1 }
 0x1ab   : > { %v1140_v13 = vrot.slane %v1127_v10, 4  ;;  %v1330_v16 = vor.u32 %v1328_v25, %v1326_v15  ;;  %v1142_v62 = vrot.slane %v1128_v22, 4  ;;  %v1345_v24 = vsel %vm6445_vm13, %v5798_v11, 0 }
 0x1ac   : > { %v1043_v19 = vsel %vm999_vm5, %v1033_v46, %v1042_v61  ;;  %v5802_v12 = vsel %vm6436_vm7, %v1322_v23, %v1326_v15  ;;  %vm6444_vm10 = vcmp.ne.s16.totalorder %v5774_v40, 0  ;;  %v1401_v4 = vsel %vm6435_vm9, %v5758_v17, 0 }
 0x1ad   : > { %4227 = vmatmul.mubr.msk.bf16.gmra.mrb[4].mxu0 %vm6434_vm8, %v1043_v19  ;;  %v5809_v26 = vsel %vm6436_vm7, %v1330_v16, %v1334_v6  ;;  %vm6440_vm12 = vcmp.ne.s16.totalorder %v5802_v12, 0  ;;  %v1141_v27 = vsel %vm908_vm0, %v1138_v56, %v1140_v13  ;;  %v1143_v28 = vsel %vm908_vm0, %v1140_v13, %v1142_v62  ;;  %v1571_v19 = vld [vmem:[#allocation12 + $0xa] sm:$0x3]  ;;  %v1477_v16 = vld [vmem:[#allocation2 + $0x10] sm:$0xff] }
 0x1ae   : > { %4232 = vmatprep.mubr.msk.bf16.mxu0 %vm6434_vm8, %v1139_v18  ;;  %v1129_v29 = vsel %vm5539_vm15, %v5753_v21, 0  ;;  %v1357_v30 = vshrl.u32 %v1345_v24, 16  ;;  %v1336_v33 = vshrl.u32 %v4020_v45, 16  ;;  %vm6439_vm6 = vcmp.ne.s16.totalorder %v5809_v26, 0 }
 0x1af   : > { %v1344_v34 = vsel %vm6444_vm10, %v1234_v1, 0  ;;  %v1346_v17 = vsel %vm6440_vm12, %v5811_v2, 0  ;;  %v1144_v21 = vrot.slane %v1129_v29, 4  ;;  %v1360_v42 = vshll.u32 %v1345_v24, 16  ;;  %v1478_v24 = vld [vmem:[#allocation2 + $0x18] sm:$0xff] }
 0x1b0   : > { %v5830_v37 = vor.u32 %v1336_v33, %v1334_v6  ;;  %v1359_v38 = vrot.slane %v1357_v30, 7  ;;  %v1353_v41 = vshrl.u32 %v1344_v34, 16  ;;  %v1347_v43 = vsel %vm6439_vm6, %v5824_v36, 0  ;;  %v1476_v6 = vld [vmem:[#allocation2 + $0x8] sm:$0xff]  ;;  %v1668_v1 = vld [vmem:[#allocation12 + $0xc] sm:$0x3] }
 0x1b1   : > { %v1365_v45 = vshrl.u32 %v1346_v17, 16  ;;  %v1145_v49 = vsel %vm908_vm0, %v1142_v62, %v1144_v21  ;;  %vm6438_vm3 = vsmask.f32 256  ;;  %v1373_v50 = vshrl.u32 %v1347_v43, 16  ;;  %v1795_v34 = vld [vmem:[#allocation12 + $0xe] sm:$0x3] }
 0x1b2   : > { %v1362_v46 = vor.u32 %v1360_v42, %v1359_v38  ;;  %vm6437_vm2 = vcmp.ne.s16.totalorder %v5830_v37, 0  ;;  %v1355_v51 = vrot.slane %v1353_v41, 7  ;;  %v1368_v58 = vshll.u32 %v1346_v17, 16 }
 0x1b3   : > { %v1367_v52 = vrot.slane %v1365_v45, 7  ;;  %v1348_v54 = vsel %vm6437_vm2, %v5837_v48, 0  ;;  %v1375_v56 = vrot.slane %v1373_v50, 7  ;;  %v1376_v59 = vshll.u32 %v1347_v43, 16  ;;  %v1661_v45 = vld [vmem:[#allocation2 + $0xb0] sm:$0xff] }
 0x1b4   : > { %v1363_v55 = vsel %vm6438_vm3, %v1355_v51, %v1362_v46  ;;  %v1381_v61 = vshrl.u32 %v1348_v54, 16  ;;  %v1495_v15 = vsel %vm6435_vm9, %v1481_v35, 0  ;;  %v1384_v23 = vshll.u32 %v1348_v54, 16 }
 0x1b5   : > { %4233 = vmatmul.mubr.msk.bf16.vlgmr.msra.gmra.mrb[0].mxu0 %vm6434_vm8, %v1141_v27  ;;  %v1370_v60 = vor.u32 %v1368_v58, %v1367_v52  ;;  %v1378_v14 = vor.u32 %v1376_v59, %v1375_v56  ;;  %v1585_v62 = vsel %vm6435_vm9, %v1571_v19, 0  ;;  %v1479_v27 = vld [vmem:[#allocation2 + $0x20] sm:$0xff]  ;;  %v1718_v30 = vsel %vm6435_vm9, %v1668_v1, 0 }
 0x1b6   : > { %4241 = vmatpush3.bf16.msra.mxu0 %v1401_v4  ;;  %4236 = vmatprep.mubr.msk.bf16.mxu0 %vm6434_vm8, %v1143_v28  ;;  %v1383_v10 = vrot.slane %v1381_v61, 7  ;;  %v1663_v4 = vsel %vm6445_vm13, %v5714_v31, 0  ;;  %v1660_v28 = vld [vmem:[#allocation2 + $0x90] sm:$0x80]  ;;  %v1665_v17 = vsel %vm6439_vm6, %v5738_v9, 0  ;;  %v1809_v58 = vsel %vm6435_vm9, %v1795_v34, 0 }
 0x1b7   : > { %4542 = vmatprep.subr.msk.bf16.mxu0 %vm6435_vm9, %v1481_v35  ;;  %v1371_v18 = vsel %vm6438_vm3, %v1359_v38, %v1370_v60  ;;  %v1379_v22 = vsel %vm6438_vm3, %v1367_v52, %v1378_v14  ;;  %v1674_v29 = vshrl.u32 %v1663_v4, 16  ;;  %v1662_v33 = vsel %vm6444_vm10, %v1660_v28, 0  ;;  %v1885_v61 = vld [vmem:[#allocation12 + $0x10] sm:$0x3] }
 0x1b8   : > { %v1386_v25 = vor.u32 %v1384_v23, %v1383_v10  ;;  %v1664_v35 = vsel %vm6440_vm12, %v5722_v39, 0  ;;  %v1670_v21 = vshrl.u32 %v1662_v33, 16  ;;  %v1677_v38 = vshll.u32 %v1663_v4, 16 }
 0x1b9   : > { %v1682_v41 = vshrl.u32 %v1664_v35, 16  ;;  %v1690_v43 = vshrl.u32 %v1665_v17, 16  ;;  %v1685_v51 = vshll.u32 %v1664_v35, 16  ;;  %v1693_v52 = vshll.u32 %v1665_v17, 16 }
 0x1ba   : > { %v1387_v13 = vsel %vm6438_vm3, %v1375_v56, %v1386_v25  ;;  %v1672_v46 = vrot.slane %v1670_v21, 7  ;;  %v1899_v10 = vsel %vm6435_vm9, %v1885_v61, 0  ;;  %v4045_v21 = vld [vmem:[#allocation13] ss:$0 sm:$0xff] }
 0x1bb   : > { %v1692_v50 = vrot.slane %v1690_v43, 7 }
 0x1bd   : > { %4237 = vmatmul.mubr.msk.bf16.gmra.mrb[4].mxu0 %vm6434_vm8, %v1145_v49  ;;  %v1684_v49 = vrot.slane %v1682_v41, 7  ;;  %v1695_v56 = vor.u32 %v1693_v52, %v1692_v50 }
 0x1be   : > { %4242 = vmatprep.mubr.msk.bf16.mxu0 %vm6434_vm8, %v1363_v55 }
 0x1bf   : > { %v1687_v54 = vor.u32 %v1685_v51, %v1684_v49 }
 0x1c5   : > { %4243 = vmatmul.mubr.msk.bf16.vlgmr.msra.gmra.mrb[0].mxu0 %vm6434_vm8, %v1371_v18 }
 0x1c6   : > { %4251 = vmatpush3.bf16.msra.mxu0 %v1495_v15  ;;  %4246 = vmatprep.mubr.msk.bf16.mxu0 %vm6434_vm8, %v1379_v22 }
 0x1c7   : > { %4543 = vmatprep.subr.msk.bf16.mxu0 %vm6435_vm9, %v1571_v19  ;;  %v1793_v19 = vld [vmem:[#allocation2 + $0x80] sm:$0xff] }
 0x1cd   : > { %4247 = vmatmul.mubr.msk.bf16.gmra.mrb[4].mxu0 %vm6434_vm8, %v1387_v13 }
 0x1ce   : > { %4252 = vmatprep.mubr.msk.bf16.mxu0 %vm6434_vm8, %v1476_v6 }
 0x1d5   : > { %4253 = vmatmul.mubr.msk.bf16.vlgmr.msra.gmra.mrb[0].mxu0 %vm6434_vm8, %v1477_v16 }
 0x1d6   : > { %4261 = vmatpush3.bf16.msra.mxu0 %v1585_v62  ;;  %4256 = vmatprep.mubr.msk.bf16.mxu0 %vm6434_vm8, %v1478_v24 }
 0x1d7   : > { %4544 = vmatprep.subr.msk.bf16.mxu0 %vm6435_vm9, %v1668_v1 }
 0x1dd   : > { %4257 = vmatmul.mubr.msk.bf16.gmra.mrb[4].mxu0 %vm6434_vm8, %v1479_v27 }
 0x1de   : > { %4262 = vmatprep.mubr.msk.bf16.mxu0 %vm6434_vm8, %v5798_v11  ;;  %v1676_v11 = vrot.slane %v1674_v29, 7 }
 0x1e0   : > { %v1679_v42 = vor.u32 %v1677_v38, %v1676_v11  ;;  %v1688_v59 = vsel %vm6438_vm3, %v1676_v11, %v1687_v54 }
 0x1e5   : > { %4263 = vmatmul.mubr.msk.bf16.vlgmr.msra.gmra.mrb[0].mxu0 %vm6434_vm8, %v5811_v2  ;;  %v1666_v2 = vsel %vm6437_vm2, %v1661_v45, 0 }
 0x1e6   : > { %4271 = vmatpush3.bf16.msra.mxu0 %v1718_v30  ;;  %4266 = vmatprep.mubr.msk.bf16.mxu0 %vm6434_vm8, %v5824_v36  ;;  %v1680_v36 = vsel %vm6438_vm3, %v1672_v46, %v1679_v42  ;;  %v1698_v55 = vshrl.u32 %v1666_v2, 16  ;;  %v1701_v14 = vshll.u32 %v1666_v2, 16 }
 0x1e7   : > { %4545 = vmatprep.subr.msk.bf16.mxu0 %vm6435_vm9, %v1795_v34 }
 0x1e8   : > { %v1700_v60 = vrot.slane %v1698_v55, 7 }
 0x1ea   : > { %v1703_v15 = vor.u32 %v1701_v14, %v1700_v60 }
 0x1ec   : > { %v1704_v18 = vsel %vm6438_vm3, %v1692_v50, %v1703_v15 }
 0x1ed   : > { %4267 = vmatmul.mubr.msk.bf16.gmra.mrb[4].mxu0 %vm6434_vm8, %v5837_v48  ;;  %v1696_v48 = vsel %vm6438_vm3, %v1684_v49, %v1695_v56 }
 0x1ee   : > { %4272 = vmatprep.mubr.msk.bf16.mxu0 %vm6434_vm8, %v1680_v36 }
 0x1f5   : > { %4273 = vmatmul.mubr.msk.bf16.vlgmr.msra.gmra.mrb[0].mxu0 %vm6434_vm8, %v1688_v59 }
 0x1f6   : > { %4281 = vmatpush3.bf16.msra.mxu0 %v1809_v58  ;;  %4276 = vmatprep.mubr.msk.bf16.mxu0 %vm6434_vm8, %v1696_v48 }
 0x1f7   : > { %4546 = vmatprep.subr.msk.bf16.mxu0 %vm6435_vm9, %v1885_v61 }
 0x1fd   : > { %4277 = vmatmul.mubr.msk.bf16.gmra.mrb[4].mxu0 %vm6434_vm8, %v1704_v18 }
 0x1fe   : > { %4282 = vmatprep.mubr.msk.bf16.mxu0 %vm6434_vm8, %v5575_v53  ;;  %v2024_v53 = vld [vmem:[#allocation15 + $0x4] sm:$0xf] }
 0x1ff   : > { %4548 = vmatprep.subr.msk.bf16.mxu1 %vm908_vm0, %v2024_v53 }
 0x205   : > { %4283 = vmatmul.mubr.msk.bf16.vlgmr.msra.gmra.mrb[0].mxu0 %vm6434_vm8, %v5604_v3  ;;  %v2053_v3 = vsel %vm908_vm0, %v2024_v53, 0 }
 0x206   : > { %4291 = vmatpush3.bf16.msra.mxu0 %v1899_v10  ;;  %4286 = vmatprep.mubr.msk.bf16.mxu0 %vm6434_vm8, %v5620_v32  ;;  %v5912_v32 = vld [vmem:[#allocation15] sm:$0xf] }
 0x207   : > { %4547 = vmatprep.subr.msk.bf16.mxu0 %vm908_vm0, %v2024_v53  ;;  %4401 = vmatpush3.bf16.msra.mxu1 %v2053_v3 }
 0x208   : > { %4549 = vmatprep.subr.msk.bf16.mxu1 %vm908_vm0, %v5912_v32 }
 0x20d   : > { %4287 = vmatmul.mubr.msk.bf16.gmra.mrb[4].mxu0 %vm6434_vm8, %v1793_v19 }
 0x20e   : > { %4292 = vmatprep.mubr.msk.bf16.mxu0 %vm6434_vm8, %v5714_v31  ;;  %v2274_v31 = vpop.permute.xlu1 %2273 }
 0x20f   : > { %vm2294_vm1 = vcmp.eq.s32.totalorder %v2274_v31, 1 }
 0x210   : > { %vm2302_vm7 = vmpackc.low %vm2294_vm1, %vm2294_vm1 }
 0x211   : > { %v2310_v38 = vsel %vm2302_vm7, 65537, %v6441_v0 }
 0x212   : > { %v2280_v22 = vpop.permute.xlu1 %2279 }
 0x213   : > { %vm2296_vm9 = vcmp.eq.s32.totalorder %v2280_v22, 1 }
 0x214   : > { %vm2304_vm6 = vmpackc.low %vm2296_vm9, %vm2296_vm9 }
 0x215   : > { %4293 = vmatmul.mubr.msk.bf16.vlgmr.msra.gmra.mrb[0].mxu0 %vm6434_vm8, %v5722_v39  ;;  %v2271_v39 = vpop.permute.xlu0 %2270  ;;  %v2312_v49 = vsel %vm2304_vm6, 65537, %v6441_v0 }
 0x216   : > { %4296 = vmatprep.mubr.msk.bf16.mxu0 %vm6434_vm8, %v5738_v9  ;;  %4301 = vmatpush3.bf16.msra.mxu0 %v2053_v3  ;;  %v2286_v23 = vpop.permute.xlu1 %2285 }
 0x217   : > { %vm2298_vm1 = vcmp.eq.s32.totalorder %v2286_v23, 1 }
 0x218   : > { %vm2306_vm9 = vmpackc.low %vm2298_vm1, %vm2298_vm1 }
 0x219   : > { %v2277_v9 = vpop.permute.xlu0 %2276 }
 0x21a   : > { %v2292_v6 = vpop.permute.xlu1 %2291  ;;  %vm2295_vm3 = vcmp.eq.s32.totalorder %v2277_v9, 1 }
 0x21b   : > { %vm2303_vm12 = vmpackc.low %vm2295_vm3, %vm2295_vm3  ;;  %vm2300_vm7 = vcmp.eq.s32.totalorder %v2292_v6, 1 }
 0x21c   : > { %v2311_v55 = vsel %vm2303_vm12, 65537, %v6441_v0  ;;  %vm5962_vm12 = vmpackc.low %vm2300_vm7, %vm2300_vm7 }
 0x21d   : > { %4297 = vmatmul.mubr.msk.bf16.gmra.mrb[4].mxu0 %vm6434_vm8, %v1661_v45  ;;  %v2283_v25 = vpop.permute.xlu0 %2282  ;;  %vm2293_vm8 = vcmp.eq.s32.totalorder %v2271_v39, 1  ;;  %v4055_v58 = vcombine.low %v2311_v55, %v2312_v49  ;;  %v2314_v39 = vsel %vm2306_vm9, 65537, %v6441_v0  ;;  %v2006_v49 = vld [vmem:[#allocation3] sm:$0xf8]  ;;  %vm6479_vm9 = vcmp.ne.s16.totalorder %v5725_v44, 0 }
 0x21e   : > { %v5918_v16 = vpop.permute.xlu1 %2748  ;;  %vm2301_vm2 = vmpackc.low %vm2293_vm8, %vm2293_vm8  ;;  %vm2297_vm8 = vcmp.eq.s32.totalorder %v2283_v25, 1 }
 0x21f   : > { %v2309_v46 = vsel %vm2301_vm2, 65537, %v6441_v0  ;;  %vm2001_vm2 = vcmask 64512   ;;  %vm5957_vm3 = vmpackc.low %vm2297_vm8, %vm2297_vm8  ;;  %v2338_v31 = vshrl.u32 %v4055_v58, 16  ;;  %v2341_v6 = vshll.u32 %v4055_v58, 16 }
 0x220   : > { %v4054_v50 = vcombine.low %v2309_v46, %v2310_v38 }
 0x221   : > { %v5916_v13 = vpop.permute.xlu0 %2288 }
 0x222   : > { %v5922_v24 = vpop.permute.xlu1 %2754  ;;  %v2330_v14 = vshrl.u32 %v4054_v50, 16  ;;  %vm2299_vm6 = vcmp.eq.s32.totalorder %v5916_v13, 1  ;;  %v2333_v10 = vshll.u32 %v4054_v50, 16  ;;  %v2316_v50 = vsel %vm5962_vm12, 65537, %v6441_v0 }
 0x223   : > { %vm2307_vm1 = vmpackc.low %vm2299_vm6, %vm2299_vm6  ;;  %vm6480_vm12 = vcmp.ne.s16.totalorder %v5735_v8, 0 }
 0x224   : > { %v2315_v55 = vsel %vm2307_vm1, 65537, %v6441_v0 }
 0x225   : > { %v5920_v62 = vpop.permute.xlu0 %2745 }
 0x226   : > { %v5926_v27 = vpop.permute.xlu1 %2760 }
 0x229   : > { %v5924_v1 = vpop.permute.xlu0 %2751 }
 0x22a   : > { %v5930_v28 = vpop.permute.xlu1 %2766 }
 0x22d   : > { %v5928_v4 = vpop.permute.xlu0 %2757 }
 0x22e   : > { %v5934_v30 = vpop.permute.xlu1 %3001 }
 0x231   : > { %v5932_v29 = vpop.permute.xlu0 %2763 }
 0x232   : > { %v5938_v34 = vpop.permute.xlu1 %3007 }
 0x235   : > { %v5936_v33 = vpop.permute.xlu0 %2998 }
 0x236   : > { %v5942_v11 = vpop.permute.xlu1 %3013 }
 0x239   : > { %v5940_v35 = vpop.permute.xlu0 %3004 }
 0x23a   : > { %v5947_v42 = vpop.permute.xlu1 %3019 }
 0x23d   : > { %v5944_v17 = vpop.permute.xlu0 %3010 }
 0x23e   : > { %v5955_v15 = vpop.permute.xlu1 %3417 }
 0x241   : > { %v5951_v51 = vpop.permute.xlu0 %3016 }
 0x245   : > { %v5966_v9 = vpop.permute.xlu0 %3414 }
 0x249   : > { %v3421_v19 = vpop.permute.xlu0 %3420 }
 0x24a   : > { %vm3439_vm7 = vcmp.eq.s32.totalorder %v3421_v19, 1 }
 0x24b   : > { %vm6036_vm1 = vmpackc.low %vm3439_vm7, %vm3439_vm7 }
 0x2e8   : > { %v4294_v41 = vpop.f32.mrb[0].mxu0 }
 0x2e9   : > { %v1983_v43 = vadd.f32 %v4294_v41, %v4045_v21  ;;  %v1935_v45 = vpop.f32.mrb[1].mxu0  ;;  %v2332_v41 = vrot.slane %v2330_v14, 3 }
 0x2ea   : > { %v1981_v2 = vadd.f32 %v4045_v21, %v1935_v45  ;;  %v4295_v36 = vpop.f32.mrb[2].mxu0 }
 0x2eb   : > { %v1984_v52 = vadd.f32 %v4295_v36, %v4045_v21  ;;  %v1938_v54 = vpop.f32.mrb[3].mxu0  ;;  %v1991_v59 = vmax.f32 %v1983_v43, 0.0  ;;  %v2313_v43 = vsel %vm5957_vm3, 65537, %v6441_v0 }
 0x2ec   : > { %v1982_v56 = vadd.f32 %v4045_v21, %v1938_v54  ;;  %v1989_v61 = vmax.f32 %v1981_v2, 0.0  ;;  %v2335_v2 = vrot.slane %v2333_v10, 4  ;;  %v4056_v36 = vcombine.low %v2313_v43, %v2314_v39 }
 0x2ed   : > { %v1992_v60 = vmax.f32 %v1984_v52, 0.0  ;;  %v2340_v54 = vrot.slane %v2338_v31, 3  ;;  %v4057_v10 = vcombine.low %v2315_v55, %v2316_v50 }
 0x2ee   : > { %v1990_v48 = vmax.f32 %v1982_v56, 0.0  ;;  %v5977_v56 = vpop.permute.xlu1 %3423  ;;  %v2347_v22 = vshrl.u32 %v4056_v36, 16 }
 0x2ef   : > { %v1998_v18 = vpack.c.bf16 %v1992_v60, %v1991_v59  ;;  %v5979_v60 = vld [vmem:[#allocation3] sm:$0xf0]  ;;  %v2359_v50 = vshll.u32 %v4057_v10, 16  ;;  %vm3440_vm6 = vcmp.eq.s32.totalorder %v5977_v56, 1 }
 0x2f0   : > { %v1997_v53 = vpack.c.bf16 %v1990_v48, %v1989_v61  ;;  %v4298_v3 = vpop.f32.mrb[4].mxu0  ;;  %v2343_v61 = vrot.slane %v2341_v6, 4 }
 0x2f1   : > { %2003 = vst.msk [vmem:[#allocation3 + $0x10] sm:$0xff] %vm2001_vm2, %v1998_v18  ;;  %v1987_v23 = vadd.f32 %v4298_v3, %v4045_v21  ;;  %v1951_v25 = vpop.f32.mrb[5].mxu0  ;;  %v2018_v18 = vsel %vm5531_vm14, %v5979_v60, 0  ;;  %v5986_v3 = vor.u32 %v2335_v2, %v2332_v41 }
 0x2f2   : > { %2002 = vst.msk [vmem:[#allocation3 + $0x8] sm:$0xff] %vm2001_vm2, %v1997_v53  ;;  %v1985_v13 = vadd.f32 %v4045_v21, %v1951_v25  ;;  %v4299_v38 = vpop.f32.mrb[6].mxu0  ;;  %v2030_v6 = vrot.slane %v2018_v18, 4 }
 0x2f3   : > { %v1988_v45 = vadd.f32 %v4299_v38, %v4045_v21  ;;  %v1954_v46 = vpop.f32.mrb[7].mxu0  ;;  %v1995_v58 = vmax.f32 %v1987_v23, 0.0  ;;  %v2350_v23 = vshll.u32 %v4056_v36, 16  ;;  %v5996_v38 = vor.u32 %v2343_v61, %v2340_v54 }
 0x2f4   : > { %v1986_v52 = vadd.f32 %v4045_v21, %v1954_v46  ;;  %v1993_v48 = vmax.f32 %v1985_v13, 0.0  ;;  %v2011_v21 = vsel %vm830_vm4, %v2006_v49, 0  ;;  %vm6478_vm4 = vcmp.ne.s16.totalorder %v5712_v20, 0  ;;  %v3430_v46 = vpop.permute.xlu1 %3429 }
 0x2f5   : > { %v1996_v59 = vmax.f32 %v1988_v45, 0.0  ;;  %v2356_v45 = vshrl.u32 %v4057_v10, 16  ;;  %vm2364_vm8 = vcmp.ne.s16.totalorder %v5986_v3, 0  ;;  %v2349_v61 = vrot.slane %v2347_v22, 3 }
 0x2f6   : > { %v1994_v14 = vmax.f32 %v1986_v52, 0.0  ;;  %v3427_v52 = vpop.permute.xlu0 %3426  ;;  %vm3442_vm3 = vcmp.eq.s32.totalorder %v3430_v46, 1 }
 0x2f7   : > { %v2000_v53 = vpack.c.bf16 %v1996_v59, %v1995_v58  ;;  %v2121_v58 = vshrl.u32 %v2011_v21, 16  ;;  %v2124_v59 = vshll.u32 %v2011_v21, 16  ;;  %v2358_v18 = vrot.slane %v2356_v45, 3  ;;  %vm6058_vm10 = vmpackc.low %vm3442_vm3, %vm3442_vm3 }
 0x2f8   : > { %v1999_v31 = vpack.c.bf16 %v1994_v14, %v1993_v48  ;;  %v5988_v39 = vld [vmem:[#allocation3 + $0x10] sm:$0xff]  ;;  %v2352_v48 = vrot.slane %v2350_v23, 4  ;;  %v2345_v14 = vsel %vm999_vm5, %v5986_v3, %v5996_v38  ;;  %v2361_v21 = vrot.slane %v2359_v50, 4  ;;  %v3436_v22 = vpop.permute.xlu1 %3435 }
 0x2f9   : > { %2005 = vst.msk [vmem:[#allocation3 + $0x20] sm:$0xff] %vm2001_vm2, %v2000_v53  ;;  %v5991_v25 = vld [vmem:[#allocation3 + $0x8] sm:$0xff]  ;;  %v2020_v13 = vsel %vm5539_vm15, %v5988_v39, 0  ;;  %v2013_v20 = vsel %vm6479_vm9, %v5988_v39, 0  ;;  %vm3444_vm9 = vcmp.eq.s32.totalorder %v3436_v22, 1  ;;  %vm2365_vm7 = vcmp.ne.s16.totalorder %v2345_v14, 0 }
 0x2fa   : > { %2004 = vst.msk [vmem:[#allocation3 + $0x18] sm:$0xff] %vm2001_vm2, %v1999_v31  ;;  %v2019_v5 = vsel %vm5539_vm15, %v5991_v25, 0  ;;  %v6002_v41 = vrot.slane %v2020_v13, 4  ;;  %v2012_v43 = vsel %vm6478_vm4, %v5991_v25, 0  ;;  %v2126_v13 = vrot.slane %v2124_v59, 4  ;;  %vm6064_vm13 = vmpackc.low %vm3444_vm9, %vm3444_vm9 }
 0x2fb   : > { %v2031_v49 = vrot.slane %v2019_v5, 4  ;;  %v2129_v2 = vshrl.u32 %v2012_v43, 16  ;;  %v2132_v36 = vshll.u32 %v2012_v43, 16  ;;  %v2138_v5 = vshrl.u32 %v2013_v20, 16 }
 0x2fc   : > { %v2353_v57 = vor.u32 %v2352_v48, %v2349_v61  ;;  %vm3441_vm4 = vcmp.eq.s32.totalorder %v3427_v52, 1  ;;  %v2177_v48 = vsel %vm908_vm0, %v5912_v32, 0  ;;  %v2370_v47 = vsel %vm2365_vm7, %v5991_v25, 0 }
 0x2fd   : > { %v2032_v54 = vsel %vm908_vm0, %v2030_v6, %v2031_v49  ;;  %v2034_v55 = vsel %vm908_vm0, %v2031_v49, %v6002_v41  ;;  %v2131_v10 = vrot.slane %v2129_v2, 3  ;;  %v2134_v53 = vrot.slane %v2132_v36, 4  ;;  %v3433_v36 = vpop.permute.xlu0 %3432  ;;  %vm3449_vm3 = vmpackc.low %vm3441_vm4, %vm3441_vm4 }
 0x2fe   : > { %4302 = vmatprep.mubr.msk.bf16.mxu0 %vm2001_vm2, %v2032_v54  ;;  %v2123_v6 = vrot.slane %v2121_v58, 3  ;;  %v2141_v49 = vshll.u32 %v2013_v20, 16  ;;  %v6032_v58 = vor.u32 %v2361_v21, %v2358_v18  ;;  %v2375_v18 = vld [vmem:[#allocation15 + $0x8] sm:$0xf]  ;;  %v2516_v21 = vld [vmem:[#allocation15 + $0xc] sm:$0xf] }
 0x2ff   : > { %4303 = vmatmul.mubr.msk.bf16.vlgmr.msra.gmra.mrb[8].mxu0 %vm2001_vm2, %v2034_v55  ;;  %v2135_v54 = vor.u32 %v2134_v53, %v2131_v10  ;;  %v2140_v10 = vrot.slane %v2138_v5, 3  ;;  %vm6490_vm4 = vsmask.f32 3328  ;;  %vm6491_vm9 = vcmp.ne.s16.totalorder %v5786_v7, 0 }
 0x300   : > { %v2010_v31 = vld [vmem:[#allocation3 + $0x20] sm:$0xf]  ;;  %v2127_v20 = vor.u32 %v2126_v13, %v2123_v6  ;;  %v2143_v53 = vrot.slane %v2141_v49, 4  ;;  %v2354_v6 = vsel %vm999_vm5, %v5996_v38, %v2353_v57  ;;  %v2363_v13 = vsel %vm999_vm5, %v2353_v57, %v6032_v58 }
 0x301   : > { %v6020_v23 = vld [vmem:[#allocation3 + $0x18] sm:$0xff]  ;;  %v2022_v44 = vsel %vm5539_vm15, %v2010_v31, 0  ;;  %v2015_v32 = vsel %vm834_vm11, %v2010_v31, 0  ;;  %v6489_v31 = vmov 0   ;;  %v2369_v38 = vsel %vm2364_vm8, %v5979_v60, 0 }
 0x302   : > { %v2021_v43 = vsel %vm5539_vm15, %v6020_v23, 0  ;;  %v2037_v45 = vrot.slane %v2022_v44, 4  ;;  %v2014_v2 = vsel %vm6480_vm12, %v6020_v23, 0  ;;  %vm6043_vm12 = vmpackc.low %vm3440_vm6, %vm3440_vm6  ;;  %vm3443_vm6 = vcmp.eq.s32.totalorder %v3433_v36, 1 }
 0x303   : > { %v6030_v50 = vrot.slane %v2021_v43, 4  ;;  %v2147_v55 = vshrl.u32 %v2014_v2, 16  ;;  %v2150_v0 = vshll.u32 %v2014_v2, 16  ;;  %v2136_v46 = vsel %vm999_vm5, %v2127_v20, %v2135_v54  ;;  %vm3451_vm11 = vmpackc.low %vm3443_vm6, %vm3443_vm6 }
 0x304   : > { %v3455_v5 = vsel %vm6036_vm1, 65537, %v6489_v31  ;;  %v3458_v57 = vsel %vm6058_vm10, 65537, %v6489_v31  ;;  %v3460_v52 = vsel %vm6064_vm13, 65537, %v6489_v31  ;;  %v2144_v14 = vor.u32 %v2143_v53, %v2140_v10 }
 0x305   : > { %v6050_v61 = vsel %vm908_vm0, %v6002_v41, %v6030_v50  ;;  %v2038_v19 = vsel %vm908_vm0, %v6030_v50, %v2037_v45  ;;  %v2149_v22 = vrot.slane %v2147_v55, 3  ;;  %v2152_v44 = vrot.slane %v2150_v0, 4 }
 0x306   : > { %4306 = vmatprep.mubr.msk.bf16.mxu1 %vm2001_vm2, %v6050_v61  ;;  %v3456_v0 = vsel %vm6043_vm12, 65537, %v6489_v31  ;;  %v2156_v43 = vshrl.u32 %v2015_v32, 16  ;;  %v2159_v45 = vshll.u32 %v2015_v32, 16  ;;  %v3457_v49 = vsel %vm3449_vm3, 65537, %v6489_v31 }
 0x307   : > { %4307 = vmatmul.mubr.msk.bf16.vlgmr.msra.gmra.mrb[0].mxu1 %vm2001_vm2, %v2038_v19  ;;  %v2153_v2 = vor.u32 %v2152_v44, %v2149_v22  ;;  %v2385_v55 = vshrl.u32 %v2370_v47, 16  ;;  %v2388_v36 = vshll.u32 %v2370_v47, 16  ;;  %vm2366_vm10 = vcmp.ne.s16.totalorder %v2354_v6, 0 }
 0x308   : > { %4311 = vmatpush3.bf16.msra.mxu1 %v2177_v48  ;;  %4312 = vmatprep.mubr.msk.bf16.mxu1 %vm2001_vm2, %v2136_v46  ;;  %v4096_v59 = vcombine.low %v3455_v5, %v3456_v0  ;;  %v4097_v8 = vcombine.low %v3457_v49, %v3458_v57  ;;  %v3459_v3 = vsel %vm3451_vm11, 65537, %v6489_v31  ;;  %v2433_v19 = vsel %vm908_vm0, %v2375_v18, 0 }
 0x309   : > { %4550 = vmatprep.subr.msk.bf16.mxu1 %vm908_vm0, %v2375_v18  ;;  %v4098_v60 = vcombine.low %v3459_v3, %v3460_v52  ;;  %v2377_v48 = vshrl.u32 %v2369_v38, 16  ;;  %v2380_v20 = vshll.u32 %v2369_v38, 16  ;;  %vm2367_vm8 = vcmp.ne.s16.totalorder %v2363_v13, 0  ;;  %v2244_v3 = vld [vmem:[#allocation3 + $0x20] sm:$0x1f] }
 0x30a   : > { %v2145_v56 = vsel %vm999_vm5, %v2135_v54, %v2144_v14  ;;  %v2158_v10 = vrot.slane %v2156_v43, 3  ;;  %v2161_v53 = vrot.slane %v2159_v45, 4  ;;  %v2154_v32 = vsel %vm999_vm5, %v2144_v14, %v2153_v2 }
 0x30b   : > { %v2387_v46 = vrot.slane %v2385_v55, 4  ;;  %v2390_v22 = vrot.slane %v2388_v36, 5  ;;  %v2371_v44 = vsel %vm2366_vm10, %v5988_v39, 0  ;;  %v3482_v47 = vshrl.u32 %v4096_v59, 16  ;;  %vm6493_vm10 = vmmov %vm6490_vm4 }
 0x30c   : > { %v3491_v5 = vshrl.u32 %v4097_v8, 16  ;;  %v3494_v18 = vshll.u32 %v4097_v8, 16  ;;  %v2372_v54 = vsel %vm2367_vm8, %v6020_v23, 0  ;;  %v3500_v13 = vshrl.u32 %v4098_v60, 16 }
 0x30d   : > { %v3503_v0 = vshll.u32 %v4098_v60, 16  ;;  %v2379_v57 = vrot.slane %v2377_v48, 4  ;;  %v2382_v38 = vrot.slane %v2380_v20, 5  ;;  %v3485_v52 = vshll.u32 %v4096_v59, 16 }
 0x30e   : > { %v2162_v14 = vor.u32 %v2161_v53, %v2158_v10  ;;  %v2394_v43 = vshrl.u32 %v2371_v44, 16  ;;  %v2397_v45 = vshll.u32 %v2371_v44, 16  ;;  %v2391_v6 = vor.u32 %v2390_v22, %v2387_v46 }
 0x30f   : > { %4313 = vmatmul.mubr.msk.bf16.vlgmr.msra.gmra.mrb[4].mxu1 %vm2001_vm2, %v2145_v56  ;;  %v2403_v49 = vshrl.u32 %v2372_v54, 16  ;;  %v2406_v55 = vshll.u32 %v2372_v54, 16  ;;  %vm2368_vm13 = vcmp.ne.s16.totalorder %v6032_v58, 0  ;;  %vm2768_vm1 = vcmp.eq.s32.totalorder %v5920_v62, 1  ;;  %v2508_v58 = vld [vmem:[#allocation3] sm:$0x80] }
 0x310   : > { %4321 = vmatpush3.bf16.msra.mxu1 %v2433_v19  ;;  %4316 = vmatprep.mubr.msk.bf16.mxu1 %vm2001_vm2, %v2154_v32  ;;  %v3484_v36 = vrot.slane %v3482_v47, 3  ;;  %v3493_v8 = vrot.slane %v3491_v5, 3  ;;  %v3496_v19 = vrot.slane %v3494_v18, 4  ;;  %v3502_v60 = vrot.slane %v3500_v13, 3  ;;  %vm2776_vm12 = vmpackc.low %vm2768_vm1, %vm2768_vm1 }
 0x311   : > { %4551 = vmatprep.subr.msk.bf16.mxu1 %vm908_vm0, %v2516_v21  ;;  %v3505_v48 = vrot.slane %v3503_v0, 4  ;;  %v2383_v20 = vor.u32 %v2382_v38, %v2379_v57  ;;  %v3487_v56 = vrot.slane %v3485_v52, 4  ;;  %v2163_v59 = vsel %vm999_vm5, %v2153_v2, %v2162_v14  ;;  %vm6495_vm1 = vmmov %vm6490_vm4 }
 0x312   : > { %v2396_v10 = vrot.slane %v2394_v43, 4  ;;  %v2399_v53 = vrot.slane %v2397_v45, 5  ;;  %v2405_v46 = vrot.slane %v2403_v49, 4  ;;  %v2408_v22 = vrot.slane %v2406_v55, 5  ;;  %v6139_v55 = vld [vmem:[#allocation15 + $0x10] sm:$0xf] }
 0x313   : > { %v2392_v32 = vsel %vm6490_vm4, %v2383_v20, %v2391_v6  ;;  %v2373_v44 = vsel %vm2368_vm13, %v2244_v3, 0  ;;  %v2511_v47 = vsel %vm6491_vm9, %v5991_v25, 0  ;;  %vm2769_vm7 = vcmp.eq.s32.totalorder %v5918_v16, 1  ;;  %v6150_v3 = vld [vmem:[#allocation3 + $0x20] sm:$0xff] }
 0x314   : > { %v3497_v2 = vor.u32 %v3496_v19, %v3493_v8  ;;  %v6125_v5 = vor.u32 %v3505_v48, %v3502_v60  ;;  %v2400_v18 = vor.u32 %v2399_v53, %v2396_v10  ;;  %v2412_v54 = vshrl.u32 %v2373_v44, 16  ;;  %vm2777_vm6 = vmpackc.low %vm2769_vm7, %vm2769_vm7 }
 0x315   : > { %v2415_v13 = vshll.u32 %v2373_v44, 16  ;;  %v6127_v0 = vor.u32 %v3487_v56, %v3484_v36  ;;  %v2409_v57 = vor.u32 %v2408_v22, %v2405_v46  ;;  %v2522_v38 = vshrl.u32 %v2511_v47, 16 }
 0x316   : > { %v2784_v7 = vsel %vm2776_vm12, 65537, %v6489_v31  ;;  %vm2770_vm3 = vcmp.eq.s32.totalorder %v5924_v1, 1  ;;  %v3507_v16 = vsel %vm999_vm5, %v3497_v2, %v6125_v5  ;;  %v2566_v52 = vsel %vm908_vm0, %v2516_v21, 0 }
 0x317   : > { %4317 = vmatmul.mubr.msk.bf16.gmra.mrb[0].mxu1 %vm2001_vm2, %v2163_v59  ;;  %v3498_v62 = vsel %vm999_vm5, %v6127_v0, %v3497_v2  ;;  %vm6492_vm11 = vcmp.ne.s16.totalorder %v5774_v40, 0  ;;  %v2401_v43 = vsel %vm6493_vm10, %v2391_v6, %v2400_v18  ;;  %v2414_v45 = vrot.slane %v2412_v54, 4 }
 0x318   : > { %4322 = vmatprep.mubr.msk.bf16.mxu1 %vm2001_vm2, %v2392_v32  ;;  %v2510_v14 = vsel %vm6492_vm11, %v2508_v58, 0  ;;  %v2417_v49 = vrot.slane %v2415_v13, 5  ;;  %vm6494_vm8 = vcmp.ne.s16.totalorder %v5802_v12, 0  ;;  %v2785_v8 = vsel %vm2777_vm6, 65537, %v6489_v31  ;;  %vm6170_vm11 = vmpackc.low %vm2770_vm3, %vm2770_vm3 }
 0x319   : > { %v2512_v36 = vsel %vm6494_vm8, %v5988_v39, 0  ;;  %vm2771_vm13 = vcmp.eq.s32.totalorder %v5922_v24, 1  ;;  %v2410_v21 = vsel %vm6495_vm1, %v2400_v18, %v2409_v57  ;;  %v6148_v40 = vrot.slane %v2522_v38, 7 }
 0x31a   : > { %vm2773_vm4 = vcmp.eq.s32.totalorder %v5926_v27, 1  ;;  %vm3510_vm9 = vcmp.ne.s16.totalorder %v3498_v62, 0  ;;  %v2518_v12 = vshrl.u32 %v2510_v14, 16  ;;  %vm6496_vm12 = vcmp.ne.s16.totalorder %v5809_v26, 0  ;;  %vm2779_vm6 = vmpackc.low %vm2771_vm13, %vm2771_vm13 }
 0x31b   : > { %v2513_v6 = vsel %vm6496_vm12, %v6020_v23, 0  ;;  %vm3511_vm7 = vcmp.ne.s16.totalorder %v3507_v16, 0  ;;  %v2525_v19 = vshll.u32 %v2511_v47, 16  ;;  %v2530_v60 = vshrl.u32 %v2512_v36, 16  ;;  %vm2781_vm8 = vmpackc.low %vm2773_vm4, %vm2773_vm4 }
 0x31c   : > { %v3515_v48 = vsel %vm3510_vm9, %v6020_v23, 0  ;;  %v2418_v20 = vor.u32 %v2417_v49, %v2414_v45  ;;  %v3516_v10 = vsel %vm3511_vm7, %v6150_v3, 0  ;;  %v2538_v53 = vshrl.u32 %v2513_v6, 16 }
 0x31d   : > { %v3538_v56 = vshrl.u32 %v3515_v48, 16  ;;  %v3541_v59 = vshll.u32 %v3515_v48, 16  ;;  %v2527_v26 = vor.u32 %v2525_v19, %v6148_v40  ;;  %v3547_v32 = vshrl.u32 %v3516_v10, 16  ;;  %v2846_v48 = vld [vmem:[#allocation15 + $0x14] sm:$0xf] }
 0x31e   : > { %v3550_v46 = vshll.u32 %v3516_v10, 16  ;;  %v6165_v22 = vcombine.low %v2784_v7, %v2785_v8  ;;  %vm2772_vm10 = vcmp.eq.s32.totalorder %v5928_v4, 1  ;;  %v2787_v2 = vsel %vm2779_vm6, 65537, %v6489_v31  ;;  %vm6501_vm6 = vmmov %vm6495_vm1 }
 0x31f   : > { %4323 = vmatmul.mubr.msk.bf16.vlgmr.msra.gmra.mrb[4].mxu1 %vm2001_vm2, %v2401_v43  ;;  %v3540_v24 = vrot.slane %v3538_v56, 4  ;;  %v3543_v47 = vrot.slane %v3541_v59, 5  ;;  %v2520_v18 = vrot.slane %v2518_v12, 7  ;;  %v3549_v54 = vrot.slane %v3547_v32, 4  ;;  %vm2780_vm3 = vmpackc.low %vm2772_vm10, %vm2772_vm10 }
 0x320   : > { %4331 = vmatpush3.bf16.msra.mxu1 %v2566_v52  ;;  %4326 = vmatprep.mubr.msk.bf16.mxu1 %vm2001_vm2, %v2410_v21  ;;  %v3552_v13 = vrot.slane %v3550_v46, 5  ;;  %vm2775_vm13 = vcmp.eq.s32.totalorder %v5930_v28, 1  ;;  %v2419_v1 = vsel %vm6495_vm1, %v2409_v57, %v2418_v20  ;;  %v2532_v58 = vrot.slane %v2530_v60, 7 }
 0x321   : > { %4552 = vmatprep.subr.msk.bf16.mxu1 %vm908_vm0, %v6139_v55  ;;  %v6181_v38 = vor.u32 %v3543_v47, %v3540_v24  ;;  %vm6499_vm9 = vsmask.f32 256  ;;  %v6185_v7 = vrot.slane %v2538_v53, 7  ;;  %vm6500_vm4 = vcmp.ne.s16.totalorder %v5830_v37, 0 }
 0x322   : > { %v2528_v4 = vsel %vm6499_vm9, %v2520_v18, %v2527_v26  ;;  %v2514_v27 = vsel %vm6500_vm4, %v6150_v3, 0  ;;  %v6190_v62 = vor.u32 %v3552_v13, %v3549_v54  ;;  %v2786_v57 = vsel %vm6170_vm11, 65537, %v6489_v31  ;;  %vm2783_vm11 = vmpackc.low %vm2775_vm13, %vm2775_vm13 }
 0x323   : > { %v2789_v16 = vsel %vm2781_vm8, 65537, %v6489_v31  ;;  %vm3024_vm12 = vcmp.eq.s32.totalorder %v5938_v34, 1  ;;  %v2533_v52 = vshll.u32 %v2512_v36, 16  ;;  %v4071_v14 = vcombine.low %v2786_v57, %v2787_v2 }
 0x324   : > { %vm2774_vm7 = vcmp.eq.s32.totalorder %v5932_v29, 1  ;;  %v2541_v43 = vshll.u32 %v2513_v6, 16  ;;  %v6202_v37 = vsel %vm6501_vm6, %v6181_v38, %v6190_v62  ;;  %v2788_v45 = vsel %vm2780_vm3, 65537, %v6489_v31  ;;  %vm3032_vm1 = vmpackc.low %vm3024_vm12, %vm3024_vm12 }
 0x325   : > { %vm3023_vm10 = vcmp.eq.s32.totalorder %v5940_v35, 1  ;;  %v2535_v34 = vor.u32 %v2533_v52, %v2532_v58  ;;  %v2546_v49 = vshrl.u32 %v2514_v27, 16  ;;  %v2805_v36 = vshrl.u32 %v6165_v22, 16  ;;  %vm6212_vm9 = vmpackc.low %vm2774_vm7, %vm2774_vm7 }
 0x326   : > { %v4072_v8 = vcombine.low %v2788_v45, %v2789_v16  ;;  %vm3022_vm8 = vcmp.eq.s32.totalorder %v5934_v30, 1  ;;  %v2543_v29 = vor.u32 %v2541_v43, %v6185_v7  ;;  %v2812_v12 = vshrl.u32 %v4071_v14, 16  ;;  %vm3031_vm13 = vmpackc.low %vm3023_vm10, %vm3023_vm10 }
 0x327   : > { %4327 = vmatmul.mubr.msk.bf16.gmra.mrb[0].mxu1 %vm2001_vm2, %v2419_v1  ;;  %vm3021_vm3 = vcmp.eq.s32.totalorder %v5936_v33, 1  ;;  %v2656_v28 = vsel %vm908_vm0, %v6139_v55, 0  ;;  %v2791_v35 = vsel %vm2783_vm11, 65537, %v6489_v31  ;;  %vm6220_vm4 = vmpackc.low %vm3022_vm8, %vm3022_vm8  ;;  %v3040_v30 = vsel %vm3032_vm1, 65537, %v6489_v31 }
 0x328   : > { %4332 = vmatprep.mubr.msk.bf16.mxu1 %vm2001_vm2, %v2528_v4  ;;  %vm6506_vm12 = vsmask.f32 256  ;;  %v2548_v60 = vrot.slane %v2546_v49, 7  ;;  %v2807_v20 = vrot.slane %v2805_v36, 7  ;;  %v2820_v56 = vshrl.u32 %v4072_v8, 16  ;;  %vm3029_vm6 = vmpackc.low %vm3021_vm3, %vm3021_vm3 }
 0x329   : > { %v2536_v19 = vsel %vm6506_vm12, %v6148_v40, %v2535_v34  ;;  %vm6507_vm7 = vmmov %vm6506_vm12  ;;  %v2808_v55 = vshll.u32 %v6165_v22, 16  ;;  %v2790_v59 = vsel %vm6212_vm9, 65537, %v6489_v31  ;;  %v3039_v10 = vsel %vm3031_vm13, 65537, %v6489_v31 }
 0x32a   : > { %v2544_v33 = vsel %vm6507_vm7, %v2532_v58, %v2543_v29  ;;  %v2549_v40 = vshll.u32 %v2514_v27, 16  ;;  %v4073_v26 = vcombine.low %v2790_v59, %v2791_v35  ;;  %v3038_v53 = vsel %vm6220_vm4, 65537, %v6489_v31  ;;  %vm6508_vm4 = vmmov %vm6507_vm7 }
 0x32b   : > { %v4079_v32 = vcombine.low %v3039_v10, %v3040_v30  ;;  %vm3026_vm11 = vcmp.eq.s32.totalorder %v5942_v11, 1  ;;  %v2814_v46 = vrot.slane %v2812_v12, 7  ;;  %vm3028_vm10 = vcmp.eq.s32.totalorder %v5947_v42, 1 }
 0x32c   : > { %v2551_v22 = vor.u32 %v2549_v40, %v2548_v60  ;;  %v2810_v44 = vor.u32 %v2808_v55, %v2807_v20  ;;  %v2822_v24 = vrot.slane %v2820_v56, 7  ;;  %v3037_v47 = vsel %vm3029_vm6, 65537, %v6489_v31  ;;  %vm3034_vm1 = vmpackc.low %vm3026_vm11, %vm3026_vm11  ;;  %v3103_v56 = vld [vmem:[#allocation15 + $0x18] sm:$0xf] }
 0x32d   : > { %vm3025_vm8 = vcmp.eq.s32.totalorder %v5944_v17, 1  ;;  %v2815_v2 = vshll.u32 %v4071_v14, 16  ;;  %v4078_v18 = vcombine.low %v3037_v47, %v3038_v53  ;;  %vm3027_vm9 = vcmp.eq.s32.totalorder %v5951_v51, 1  ;;  %vm3036_vm3 = vmpackc.low %vm3028_vm10, %vm3028_vm10 }
 0x32e   : > { %v2823_v54 = vshll.u32 %v4072_v8, 16  ;;  %v2828_v13 = vshrl.u32 %v4073_v26, 16  ;;  %v3066_v11 = vshrl.u32 %v4079_v32, 16  ;;  %v3069_v58 = vshll.u32 %v4079_v32, 16  ;;  %vm3033_vm13 = vmpackc.low %vm3025_vm8, %vm3025_vm8 }
 0x32f   : > { %4333 = vmatmul.mubr.msk.bf16.vlgmr.msra.gmra.mrb[4].mxu1 %vm2001_vm2, %v2536_v19  ;;  %v2817_v1 = vor.u32 %v2815_v2, %v2814_v46  ;;  %v2552_v42 = vsel %vm6508_vm4, %v6185_v7, %v2551_v22  ;;  %vm2835_vm12 = vcmp.ne.s16.totalorder %v2810_v44, 0  ;;  %v3042_v27 = vsel %vm3034_vm1, 65537, %v6489_v31  ;;  %vm3035_vm7 = vmpackc.low %vm3027_vm9, %vm3027_vm9 }
 0x330   : > { %4341 = vmatpush3.bf16.msra.mxu1 %v2656_v28  ;;  %4336 = vmatprep.mubr.msk.bf16.mxu1 %vm2001_vm2, %v2544_v33  ;;  %v2825_v4 = vor.u32 %v2823_v54, %v2822_v24  ;;  %v3058_v17 = vshrl.u32 %v4078_v18, 16  ;;  %v3061_v57 = vshll.u32 %v4078_v18, 16  ;;  %v3044_v51 = vsel %vm3036_vm3, 65537, %v6489_v31  ;;  %vm6509_vm6 = vmmov %vm6508_vm4  ;;  %v2971_v18 = vld [vmem:[#allocation3 + $0x8] sm:$0xf8] }
 0x331   : > { %4553 = vmatprep.subr.msk.bf16.mxu1 %vm908_vm0, %v2846_v48  ;;  %v2840_v16 = vsel %vm2835_vm12, %v5991_v25, 0  ;;  %v6252_v52 = vrot.slane %v2828_v13, 7  ;;  %v3068_v14 = vrot.slane %v3066_v11, 4  ;;  %v3041_v7 = vsel %vm3033_vm13, 65537, %v6489_v31  ;;  %vm6510_vm11 = vmmov %vm6508_vm4 }
 0x332   : > { %v3071_v43 = vrot.slane %v3069_v58, 5  ;;  %v4080_v45 = vcombine.low %v3041_v7, %v3042_v27  ;;  %v3043_v34 = vsel %vm3035_vm7, 65537, %v6489_v31  ;;  %v2818_v49 = vsel %vm6509_vm6, %v2807_v20, %v2817_v1  ;;  %vm6512_vm9 = vmmov %vm6508_vm4  ;;  %v2735_v27 = vld [vmem:[#allocation3 + $0x28] sm:$0x1] }
 0x333   : > { %v2831_v36 = vshll.u32 %v4073_v26, 16  ;;  %v4081_v8 = vcombine.low %v3043_v34, %v3044_v51  ;;  %v2850_v29 = vshll.u32 %v2840_v16, 16  ;;  %v2826_v21 = vsel %vm6510_vm11, %v2814_v46, %v2825_v4 }
 0x334   : > { %v3060_v12 = vrot.slane %v3058_v17, 4  ;;  %v3063_v28 = vrot.slane %v3061_v57, 5  ;;  %v2896_v35 = vsel %vm908_vm0, %v2846_v48, 0  ;;  %vm2836_vm10 = vcmp.ne.s16.totalorder %v2818_v49, 0 }
 0x335   : > { %v3072_v6 = vor.u32 %v3071_v43, %v3068_v14  ;;  %v3075_v30 = vshrl.u32 %v4080_v45, 16  ;;  %v3078_v19 = vshll.u32 %v4080_v45, 16  ;;  %v2841_v60 = vsel %vm2836_vm10, %v5988_v39, 0 }
 0x336   : > { %vm2837_vm8 = vcmp.ne.s16.totalorder %v2826_v21, 0  ;;  %v3084_v20 = vshrl.u32 %v4081_v8, 16  ;;  %v3087_v33 = vshll.u32 %v4081_v8, 16  ;;  %v2852_v55 = vrot.slane %v2850_v29, 1 }
 0x337   : > { %4337 = vmatmul.mubr.msk.bf16.gmra.mrb[0].mxu1 %vm2001_vm2, %v2552_v42  ;;  %v3064_v59 = vor.u32 %v3063_v28, %v3060_v12  ;;  %v2842_v48 = vsel %vm2837_vm8, %v6020_v23, 0  ;;  %v2848_v10 = vshrl.u32 %v2840_v16, 16  ;;  %v2855_v40 = vshll.u32 %v2841_v60, 16 }
 0x338   : > { %4342 = vmatprep.mubr.msk.bf16.mxu1 %vm2001_vm2, %v5991_v25  ;;  %v2833_v25 = vor.u32 %v2831_v36, %v6252_v52  ;;  %vm6511_vm1 = vsmask.f32 3328  ;;  %v3077_v53 = vrot.slane %v3075_v30, 4  ;;  %v3080_v32 = vrot.slane %v3078_v19, 5 }
 0x339   : > { %v3073_v26 = vsel %vm6511_vm1, %v3064_v59, %v3072_v6  ;;  %v3086_v22 = vrot.slane %v3084_v20, 4  ;;  %v3089_v44 = vrot.slane %v3087_v33, 5  ;;  %v2853_v47 = vor.u32 %v2852_v55, %v2848_v10  ;;  %vm6514_vm6 = vmmov %vm6511_vm1 }
 0x33a   : > { %v2834_v46 = vsel %vm6512_vm9, %v2822_v24, %v2833_v25  ;;  %v2863_v2 = vshll.u32 %v2842_v48, 16  ;;  %v2857_v54 = vrot.slane %v2855_v40, 1  ;;  %vm3092_vm13 = vcmp.ne.s16.totalorder %v3064_v59, 0  ;;  %vm6515_vm11 = vmmov %vm6511_vm1  ;;  %v3293_v25 = vld [vmem:[#allocation15 + $0x1c] sm:$0xf] }
 0x33b   : > { %vm2838_vm3 = vcmp.ne.s16.totalorder %v2834_v46, 0  ;;  %vm3093_vm4 = vcmp.ne.s16.totalorder %v3073_v26, 0  ;;  %v3081_v13 = vor.u32 %v3080_v32, %v3077_v53  ;;  %v6270_v1 = vor.u32 %v3089_v44, %v3086_v22  ;;  %v2972_v46 = vld [vmem:[#allocation3 + $0x28] sm:$0xf] }
 0x33c   : > { %v2843_v11 = vsel %vm2838_vm3, %v6150_v3, 0  ;;  %vm6513_vm12 = vsmask.f32 7424  ;;  %v2865_v24 = vrot.slane %v2863_v2, 1  ;;  %v3097_v42 = vsel %vm3092_vm13, %v2971_v18, 0 }
 0x33d   : > { %v2858_v58 = vsel %vm6513_vm12, %v2853_v47, %v2857_v54  ;;  %v3098_v4 = vsel %vm3093_vm4, %v5988_v39, 0  ;;  %vm2839_vm7 = vcmp.ne.s16.totalorder %v6252_v52, 0  ;;  %v2867_v17 = vshrl.u32 %v2842_v48, 16  ;;  %vm6516_vm3 = vmmov %vm6513_vm12 }
 0x33e   : > { %v2871_v57 = vshll.u32 %v2843_v11, 16  ;;  %v3082_v51 = vsel %vm6514_vm6, %v3072_v6, %v3081_v13  ;;  %v2859_v16 = vshrl.u32 %v2841_v60, 16  ;;  %v3105_v14 = vshrl.u32 %v3097_v42, 16  ;;  %vm6517_vm4 = vmmov %vm6516_vm3 }
 0x33f   : > { %4343 = vmatmul.mubr.msk.bf16.vlgmr.msra.gmra.mrb[4].mxu1 %vm2001_vm2, %v5988_v39  ;;  %v3108_v7 = vshll.u32 %v3097_v42, 16  ;;  %v3091_v43 = vsel %vm6515_vm11, %v3081_v13, %v6270_v1  ;;  %v2869_v45 = vor.u32 %v2867_v17, %v2865_v24  ;;  %v3113_v34 = vshrl.u32 %v3098_v4, 16  ;;  %vm6518_vm6 = vmmov %vm6516_vm3 }
 0x340   : > { %4351 = vmatpush3.bf16.msra.mxu1 %v2896_v35  ;;  %4346 = vmatprep.mubr.msk.bf16.mxu1 %vm2001_vm2, %v6020_v23  ;;  %v3116_v49 = vshll.u32 %v3098_v4, 16  ;;  %v2844_v36 = vsel %vm2839_vm7, %v2735_v27, 0  ;;  %vm3438_vm10 = vcmp.eq.s32.totalorder %v5955_v15, 1  ;;  %v2861_v8 = vor.u32 %v2859_v16, %v2857_v54  ;;  %v3236_v4 = vld [vmem:[#allocation3 + $0x8] sm:$0xf0] }
 0x341   : > { %4554 = vmatprep.subr.msk.bf16.mxu1 %vm908_vm0, %v3103_v56  ;;  %vm3094_vm8 = vcmp.ne.s16.totalorder %v3082_v51, 0  ;;  %vm3437_vm1 = vcmp.eq.s32.totalorder %v5966_v9, 1  ;;  %v3161_v52 = vsel %vm908_vm0, %v3103_v56, 0  ;;  %v2873_v29 = vrot.slane %v2871_v57, 1  ;;  %vm3446_vm13 = vmpackc.low %vm3438_vm10, %vm3438_vm10  ;;  %v3519_v51 = vld [vmem:[#allocation15 + $0x20] sm:$0xf] }
 0x342   : > { %vm3095_vm9 = vcmp.ne.s16.totalorder %v3091_v43, 0  ;;  %v2866_v21 = vsel %vm6516_vm3, %v2861_v8, %v2865_v24  ;;  %v3107_v12 = vrot.slane %v3105_v14, 3  ;;  %v3110_v28 = vrot.slane %v3108_v7, 4  ;;  %vm3445_vm12 = vmpackc.low %vm3437_vm1, %vm3437_vm1 }
 0x343   : > { %v2874_v35 = vsel %vm6517_vm4, %v2869_v45, %v2873_v29  ;;  %v3115_v6 = vrot.slane %v3113_v34, 3  ;;  %v3118_v15 = vrot.slane %v3116_v49, 4  ;;  %v3099_v30 = vsel %vm3094_vm8, %v6020_v23, 0 }
 0x344   : > { %v2875_v19 = vshrl.u32 %v2843_v11, 16  ;;  %v2879_v60 = vshll.u32 %v2844_v36, 16  ;;  %v3100_v56 = vsel %vm3095_vm9, %v6150_v3, 0  ;;  %v3454_v20 = vsel %vm3446_vm13, 65537, %v6489_v31 }
 0x345   : > { %v3122_v55 = vshrl.u32 %v3099_v30, 16  ;;  %v3125_v59 = vshll.u32 %v3099_v30, 16  ;;  %v3111_v48 = vor.u32 %v3110_v28, %v3107_v12  ;;  %v3119_v23 = vor.u32 %v3118_v15, %v3115_v6 }
 0x346   : > { %v2877_v33 = vor.u32 %v2875_v19, %v2873_v29  ;;  %v3131_v10 = vshrl.u32 %v3100_v56, 16  ;;  %v3134_v40 = vshll.u32 %v3100_v56, 16  ;;  %v3453_v26 = vsel %vm3445_vm12, 65537, %v6489_v31 }
 0x347   : > { %4347 = vmatmul.mubr.msk.bf16.gmra.mrb[0].mxu1 %vm2001_vm2, %v6150_v3  ;;  %v2881_v53 = vrot.slane %v2879_v60, 1  ;;  %v4095_v32 = vcombine.low %v3453_v26, %v3454_v20  ;;  %vm3096_vm7 = vcmp.ne.s16.totalorder %v6270_v1, 0  ;;  %v3124_v22 = vrot.slane %v3122_v55, 3 }
 0x348   : > { %4352 = vmatprep.mubr.msk.bf16.mxu1 %vm2001_vm2, %v2858_v58  ;;  %v3127_v44 = vrot.slane %v3125_v59, 4  ;;  %v3120_v47 = vsel %vm999_vm5, %v3111_v48, %v3119_v23  ;;  %v3133_v2 = vrot.slane %v3131_v10, 3  ;;  %v3136_v18 = vrot.slane %v3134_v40, 4 }
 0x349   : > { %v2882_v9 = vsel %vm6518_vm6, %v2877_v33, %v2881_v53  ;;  %v3101_v54 = vsel %vm3096_vm7, %v2972_v46, 0  ;;  %v3474_v13 = vshrl.u32 %v4095_v32, 16  ;;  %v3477_v31 = vshll.u32 %v4095_v32, 16 }
 0x34a   : > { %v3128_v11 = vor.u32 %v3127_v44, %v3124_v22  ;;  %v3137_v58 = vor.u32 %v3136_v18, %v3133_v2  ;;  %v3140_v24 = vshrl.u32 %v3101_v54, 16  ;;  %v3143_v42 = vshll.u32 %v3101_v54, 16  ;;  %v4703_v18 = vld [vmem:[%s5418_s28 + $0x28] sm:$0xff] }
 0x34b   : > { %v3321_v1 = vsel %vm908_vm0, %v3293_v25, 0  ;;  %v3476_v27 = vrot.slane %v3474_v13, 3  ;;  %v3479_v17 = vrot.slane %v3477_v31, 4  ;;  %v3287_v43 = vsel %vm5539_vm15, %v3236_v4, 0  ;;  %v4704_v13 = vld [vmem:[%s5418_s28 + $0x30] sm:$0xff]  ;;  %v4705_v31 = vld [vmem:[%s5418_s28 + $0x38] sm:$0xff] }
 0x34c   : > { %v3129_v57 = vsel %vm999_vm5, %v3119_v23, %v3128_v11  ;;  %v3138_v16 = vsel %vm999_vm5, %v3128_v11, %v3137_v58  ;;  %v3142_v14 = vrot.slane %v3140_v24, 3  ;;  %v3145_v7 = vrot.slane %v3143_v42, 4 }
 0x34d   : > { %v3480_v45 = vor.u32 %v3479_v17, %v3476_v27  ;;  %v3299_v34 = vrot.slane %v3287_v43, 4  ;;  %v3290_v29 = vsel %vm5539_vm15, %v6150_v3, 0  ;;  %v3577_v15 = vsel %vm908_vm0, %v3519_v51, 0 }
 0x34e   : > { %v3146_v36 = vor.u32 %v3145_v7, %v3142_v14  ;;  %v3291_v19 = vsel %vm5531_vm14, %v2972_v46, 0  ;;  %vm6520_vm15 = vcmask 1041408   ;;  %vm6521_vm14 = vsmask.f32 3328  ;;  %v4698_v46 = vld [vmem:[%s5418_s28] sm:$0xff] }
 0x34f   : > { %4353 = vmatmul.mubr.msk.bf16.vlgmr.msra.gmra.mrb[4].mxu1 %vm2001_vm2, %v2866_v21  ;;  %v3489_v49 = vsel %vm999_vm5, %v3480_v45, %v6127_v0  ;;  %vm3508_vm11 = vcmp.ne.s16.totalorder %v3480_v45, 0  ;;  %v3304_v0 = vrot.slane %v3290_v29, 4  ;;  %v3306_v20 = vrot.slane %v3291_v19, 4  ;;  %vm6522_vm8 = vmmov %vm6520_vm15 }
 0x350   : > { %4361 = vmatpush3.bf16.msra.mxu1 %v3161_v52  ;;  %4356 = vmatprep.mubr.msk.bf16.mxu1 %vm2001_vm2, %v2874_v35  ;;  %v3147_v8 = vsel %vm999_vm5, %v3137_v58, %v3146_v36  ;;  %vm3509_vm10 = vcmp.ne.s16.totalorder %v3489_v49, 0  ;;  %v3301_v52 = vsel %vm908_vm0, %v3299_v34, %v6002_v41  ;;  %v3513_v21 = vsel %vm3508_vm11, %v3236_v4, 0  ;;  %vm6523_vm1 = vmmov %vm6521_vm14  ;;  %v4107_v4 = vld [vmem:[#allocation16] ss:$0 sm:$0xff] }
 0x351   : > { %4555 = vmatprep.subr.msk.bf16.mxu1 %vm908_vm0, %v3293_v25  ;;  %v3514_v12 = vsel %vm3509_vm10, %v5988_v39, 0  ;;  %v3521_v28 = vshrl.u32 %v3513_v21, 16  ;;  %v3524_v25 = vshll.u32 %v3513_v21, 16  ;;  %v3305_v30 = vsel %vm908_vm0, %v6030_v50, %v3304_v0  ;;  %v3396_v50 = vld [vmem:[#allocation3 + $0x28] sm:$0x1f] }
 0x352   : > { %v3529_v35 = vshrl.u32 %v3514_v12, 16  ;;  %v3532_v6 = vshll.u32 %v3514_v12, 16  ;;  %vm3512_vm5 = vcmp.ne.s16.totalorder %v6125_v5, 0  ;;  %v3307_v59 = vsel %vm908_vm0, %v3304_v0, %v3306_v20 }
 0x353   : > { %v3523_v3 = vrot.slane %v3521_v28, 4  ;;  %v3526_v60 = vrot.slane %v3524_v25, 5  ;;  %v3517_v48 = vsel %vm3512_vm5, %v3396_v50, 0  ;;  %v3678_v40 = vsel %vm6522_vm8, %v3664_v63, 0 }
 0x354   : > { %v3531_v39 = vrot.slane %v3529_v35, 4  ;;  %v3534_v56 = vrot.slane %v3532_v6, 5  ;;  %v3556_v23 = vshrl.u32 %v3517_v48, 16  ;;  %v3559_v10 = vshll.u32 %v3517_v48, 16 }
 0x355   : > { %v3527_v33 = vor.u32 %v3526_v60, %v3523_v3  ;;  %vm6525_vm9 = vcmask 31744   ;;  %v3663_v11 = vpack.c.bf16 %v4705_v31, %v4704_v13 }
 0x356   : > { %v3535_v55 = vor.u32 %v3534_v56, %v3531_v39  ;;  %v3558_v26 = vrot.slane %v3556_v23, 4  ;;  %v3561_v53 = vrot.slane %v3559_v10, 5  ;;  %vm6526_vm3 = vmmov %vm6525_vm9 }
 0x357   : > { %4357 = vmatmul.mubr.msk.bf16.gmra.mrb[0].mxu1 %vm2001_vm2, %v2882_v9  ;;  %v4699_v9 = vld [vmem:[%s5418_s28 + $0x8] sm:$0xff]  ;;  %vm6527_vm13 = vmmov %vm6526_vm3 }
 0x358   : > { %4362 = vmatprep.mubr.msk.bf16.mxu1 %vm2001_vm2, %v3120_v47  ;;  %v3545_v5 = vsel %vm6523_vm1, %v3535_v55, %v6181_v38  ;;  %v3562_v32 = vor.u32 %v3561_v53, %v3558_v26  ;;  %v3660_v22 = vpack.c.bf16 %v4699_v9, %v4698_v46  ;;  %v4700_v38 = vld [vmem:[%s5418_s28 + $0x10] sm:$0xff]  ;;  %v4701_v47 = vld [vmem:[%s5418_s28 + $0x18] sm:$0xff]  ;;  %vm6528_vm4 = vmmov %vm6526_vm3 }
 0x359   : > { %v3661_v2 = vpack.c.bf16 %v4701_v47, %v4700_v38 }
 0x35f   : > { %4363 = vmatmul.mubr.msk.bf16.vlgmr.msra.gmra.mrb[4].mxu1 %vm2001_vm2, %v3129_v57 }
 0x360   : > { %4371 = vmatpush3.bf16.msra.mxu1 %v3321_v1  ;;  %4366 = vmatprep.mubr.msk.bf16.mxu1 %vm2001_vm2, %v3138_v16 }
 0x361   : > { %4556 = vmatprep.subr.msk.bf16.mxu1 %vm908_vm0, %v3519_v51  ;;  %vm6524_vm0 = vmmov %vm6523_vm1 }
 0x362   : > { %v3563_v44 = vsel %vm6524_vm0, %v6190_v62, %v3562_v32 }
 0x367   : > { %4367 = vmatmul.mubr.msk.bf16.gmra.mrb[0].mxu1 %vm2001_vm2, %v3147_v8 }
 0x368   : > { %4372 = vmatprep.mubr.msk.bf16.mxu1 %vm2001_vm2, %v3301_v52 }
 0x36f   : > { %4373 = vmatmul.mubr.msk.bf16.vlgmr.msra.gmra.mrb[4].mxu1 %vm2001_vm2, %v6050_v61  ;;  %v3536_v61 = vsel %vm6521_vm14, %v3527_v33, %v3535_v55 }
 0x370   : > { %4381 = vmatpush3.bf16.msra.mxu1 %v3577_v15  ;;  %4376 = vmatprep.mubr.msk.bf16.mxu1 %vm2001_vm2, %v3305_v30 }
 0x371   : > { %4557 = vmatprep.subr.msk.bf16.mxu1 %vm6520_vm15, %v3664_v63 }
 0x377   : > { %4377 = vmatmul.mubr.msk.bf16.gmra.mrb[0].mxu1 %vm2001_vm2, %v3307_v59 }
 0x378   : > { %4382 = vmatprep.mubr.msk.bf16.mxu1 %vm2001_vm2, %v3536_v61 }
 0x37f   : > { %4383 = vmatmul.mubr.msk.bf16.vlgmr.msra.gmra.mrb[4].mxu1 %vm2001_vm2, %v3545_v5 }
 0x380   : > { %4391 = vmatpush3.bf16.msra.mxu1 %v3678_v40  ;;  %4386 = vmatprep.mubr.msk.bf16.mxu1 %vm2001_vm2, %v6202_v37  ;;  %v4702_v37 = vld [vmem:[%s5418_s28 + $0x20] sm:$0xff]  ;;  %s4966_s28 = scalar_lea.vmem %s4965_s21, 2048 }
 0x381   : > { %v3662_v54 = vpack.c.bf16 %v4703_v18, %v4702_v37  ;;  %p4968_p8 = scmp.lt.s32.totalorder %s4966_s28, %s4960_s14 }
 0x383   : > { %p4969_p4 = por %p4968_p8, %p4967_p2 }
 0x385   : > { %p4970_p10 = pnand %p4969_p4, %p4963_p3 }
 0x387   : > { %4387 = vmatmul.mubr.msk.bf16.gmra.mrb[0].mxu1 %vm2001_vm2, %v3563_v44 }
 0x388   : > { %4392 = vmatprep.mubr.msk.bf16.mxu1 %vm6525_vm9, %v3660_v22 }
 0x38f   : > { %4393 = vmatmul.mubr.msk.bf16.vlgmr.msra.gmra.mrb[4].mxu1 %vm6526_vm3, %v3661_v2 }
 0x390   : > { %4396 = vmatprep.mubr.msk.bf16.mxu1 %vm6527_vm13, %v3662_v54 }
 0x397   : > { %4397 = vmatmul.mubr.msk.bf16.gmra.mrb[0].mxu1 %vm6528_vm4, %v3663_v11 }
 0x3d2   : > { %v4304_v62 = vpop.f32.mrb[8].mxu0 }
 0x3d3   : > { %v2089_v58 = vpop.f32.mrb[9].mxu0 }
 0x3d4   : > { %v4305_v24 = vpop.f32.mrb[10].mxu0 }
 0x3d5   : > { %v2092_v42 = vpop.f32.mrb[11].mxu0 }
 0x462   : > { %v4394_v1 = vpop.f32.mrb[4].mxu1 }
 0x463   : > { %v4402_v27 = vadd.f32 %v4394_v1, %v4304_v62  ;;  %v3714_v17 = vpop.f32.mrb[5].mxu1 }
 0x464   : > { %v4403_v57 = vadd.f32 %v3714_v17, %v2089_v58  ;;  %v4395_v51 = vpop.f32.mrb[6].mxu1 }
 0x465   : > { %v3762_v16 = vadd.f32 %v4402_v27, %v4107_v4  ;;  %v4404_v14 = vadd.f32 %v4395_v51, %v4305_v24  ;;  %v3717_v7 = vpop.f32.mrb[7].mxu1 }
 0x466   : > { %v3760_v43 = vadd.f32 %v4403_v57, %v4107_v4  ;;  %v4405_v45 = vadd.f32 %v3717_v7, %v2092_v42 }
 0x467   : > { %3770 = vst.msk [vmem:[%s456_s29 + $0x10] sm:$0xff] %vm2001_vm2, %v3762_v16  ;;  %v3763_v34 = vadd.f32 %v4404_v14, %v4107_v4 }
 0x468   : > { %3768 = vst.msk [vmem:[%s456_s29] sm:$0xff] %vm2001_vm2, %v3760_v43  ;;  %v3761_v49 = vadd.f32 %v4405_v45, %v4107_v4 }
 0x469   : > { %3771 = vst.msk [vmem:[%s456_s29 + $0x18] sm:$0xff] %vm2001_vm2, %v3763_v34 }
 0x46a   : > { %3769 = vst.msk [vmem:[%s456_s29 + $0x8] sm:$0xff] %vm2001_vm2, %v3761_v49  ;;  %v4398_v36 = vpop.f32.mrb[0].mxu1 }
 0x46b   : > { %v3766_v8 = vadd.f32 %v4398_v36, %v4107_v4  ;;  %v3730_v52 = vpop.f32.mrb[1].mxu1 }
 0x46c   : > { %v3764_v29 = vadd.f32 %v4107_v4, %v3730_v52  ;;  %v4399_v21 = vpop.f32.mrb[2].mxu1 }
 0x46d   : > { %3774 = vst.msk [vmem:[%s456_s29 + $0x30] sm:$0xff] %vm2001_vm2, %v3766_v8  ;;  %v3767_v12 = vadd.f32 %v4399_v21, %v4107_v4  ;;  %v3733_v0 = vpop.f32.mrb[3].mxu1 }
 0x46e   : > { %3772 = vst.msk [vmem:[%s456_s29 + $0x20] sm:$0xff] %vm2001_vm2, %v3764_v29  ;;  %v3765_v28 = vadd.f32 %v4107_v4, %v3733_v0 }
 0x46f   : > { %3775 = vst.msk [vmem:[%s456_s29 + $0x38] sm:$0xff] %vm2001_vm2, %v3767_v12 }
 0x470   : > { %3773 = vst.msk [vmem:[%s456_s29 + $0x28] sm:$0xff] %vm2001_vm2, %v3765_v28 }
 0x471   : > { %4973 = shalt.err (!%p4970_p10)
}
 0x472   : > { %s4974_s16 = scalar_lea.hbm %s6365_s17, 1024  ;;  %s4978_s20 = scalar_lea.hbm %s6529_s13, 2048 }
 0x473   : > { %p4975_p11 = scmp.ne.s32.totalorder %s6365_s17, %s4974_s16  ;;  %p4979_p7 = scmp.lt.u32.totalorder %s6365_s17, %s6529_s13 }
 0x474   : > { %p4980_p6 = scmp.lt.u32.totalorder %s4978_s20, %s4974_s16  ;;  %p4982_p12 = scmp.lt.u32.totalorder %s4974_s16, %s6365_s17 }
 0x475   : > { %p4976_p0 = pnand %p4975_p11, %p6530_p13 }
 0x476   : > { %p4981_p9 = por %p4980_p6, %p4979_p7 }
 0x477   : > { %p4977_p5 = pneg %p4976_p0 }
 0x478   : > { %p4983_p1 = por %p4982_p12, %p4981_p9 }
 0x47a   : > { %p4984_p3 = pnand %p4983_p1, %p4977_p5 }
 0x47c   : > { %4987 = shalt.err (!%p4984_p3)
}
 0x47d   : > { %s5063_s14 = smov 128   ;;  %s5064_s21 = smov 8  }
 0x47e   : > { %4592 = dma.vmem_to_hbm [thread:$0]  (%p6530_p13), %s6367_s27, 1024, %s6365_s17, %s3777_s15, %s5063_s14, %s5063_s14, %s5064_s21  }
 0x47f PF: > { %s3805_s28 = sand.u32 1, %s5030_s30   ;;  %p6531_p2 = scmp.ne.s32.totalorder %s6454_s9, 0 }
 0x480   : > { %p6532_p8 = scmp.ge.s32.totalorder %s5042_s12, 2  ;;  %s3806_s16 = scalar_lea.sflag [#allocation6], %s3805_s28 }
 0x482   : > { %p4624_p4 = pnand %p6532_p8, %p6531_p2 }
 0x484   : > { %5025 = dma.done.wait (!%p4624_p4), %s3806_s16, 1024  }
 0x485   : > { %5027 = vsyncadd (!%p4624_p4), %s3806_s16, 4294966272  ;;  %p26_p10 = scmp.ge.s32.totalorder %s5332_s19, 4   ;;  %s6533_s30 = smov %s5034_s10 }
 0x486   : > { %s6534_s10 = smov %s5038_s11  ;;  %s6535_s11 = smov %s5343_s26 }
 0x487   : > { %s6536_s12 = smov %s5332_s19  ;;  %28 = sbr.rel (!%p26_p10) target bundleno = 11 (0xb), region = 152 }
 0x48e   :  { %3811 = vsyncpa [#allocation5], 1 }
 0x48f   :  { %3813 = vsyncpa [#allocation5 + $0x1], 1 }
 0x490   :  { %3814 = vsyncpa [#allocation8], 1 }
 0x491   :  { %3815 = vsyncpa [#allocation11], 1 }
 0x492   :  { %3816 = vsyncpa [#allocation14], 1 }
 0x493   :  { %3817 = vsyncpa [#allocation17], 1 }
 0x494   :  { %3818 = vsyncpa [#allocation6], 1 }
 0x495   :  { %3820 = vsyncpa [#allocation6 + $0x1], 1 }

</bundles_post_ra>
